<compile_context>
chip_gen: v6e
topology: v6e:2x2x1
jax: 0.10.0
libtpu: 0.0.40
codegen_flags: <defaults>
</compile_context>

<pallas_src>
import jax
import jax.numpy as jnp
from jax.experimental import pallas as pl
from jax.experimental.pallas import tpu as pltpu

D_ENC = 768   # encoder output dim (head expects 3 * 768 features)
D_HID = 128   # classi_head hidden width


def _round_up(x, m):
    return ((x + m - 1) // m) * m


def _unimodal_kernel(imgs_ref, npyl_ref, npys_ref, wenc_ref, benc_ref,
                     w1_ref, b1_ref, w2_ref, b2_ref, out_ref, acc_ref):
    k = pl.program_id(1)

    # init accumulator at the start of every K sweep
    @pl.when(k == 0)
    def _():
        acc_ref[...] = jnp.zeros_like(acc_ref)

    # encoder hot path: (tb, tk) @ (tk, 768).  imgs arrive in native f32 and
    # are cast to bf16 per tile (avoids a wrapper-side full HBM pre-pass);
    # accumulation stays f32.
    acc_ref[...] += jnp.dot(imgs_ref[...].astype(jnp.bfloat16), wenc_ref[...],
                            preferred_element_type=jnp.float32)

    # epilogue: classification head, once per batch tile
    @pl.when(k == pl.num_programs(1) - 1)
    def _():
        x = acc_ref[...] + benc_ref[...]                      # (tb, 768) f32

        # Linear(3*768, 128) on cat((x, npy_l, npy_s), dim=1), expressed as
        # three partial matmuls against static slices of the resident W1 block.
        # npy_l / npy_s are the pre-reduced (f32 max/min -> bf16) slabs fed
        # from the wrapper.
        h = (jnp.dot(x.astype(jnp.bfloat16), w1_ref[0:D_ENC, :],
                     preferred_element_type=jnp.float32)
             + jnp.dot(npyl_ref[...], w1_ref[D_ENC:2 * D_ENC, :],
                       preferred_element_type=jnp.float32)
             + jnp.dot(npys_ref[...], w1_ref[2 * D_ENC:3 * D_ENC, :],
                       preferred_element_type=jnp.float32)
             + b1_ref[...])
        h = jnp.maximum(h, 0.0)                               # ReLU (f32, VPU)

        # Linear(128, 1): VPU multiply + cross-lane reduce in f32 (avoids an
        # N=1 MXU matmul); scalar bias b2 comes from SMEM.
        out = jnp.sum(h * w2_ref[...], axis=-1, keepdims=True) + b2_ref[0]
        out_ref[...] = out.astype(out_ref.dtype)


def prepare_params(params):
    """One-time (model-load-time) weight preparation.

    Keeps the per-call path free of full-weight casts/reshapes; re-casting
    w_enc (K x 768) f32->bf16 on every call would be a full HBM read+write of
    the largest tensor before the kernel even starts.
    """
    return {
        "w_enc": params["w_enc"].astype(jnp.bfloat16),                 # (K, 768)
        "b_enc": params["b_enc"].reshape(1, D_ENC).astype(jnp.float32),
        "w1":    params["w1"].astype(jnp.bfloat16),                    # (2304, 128)
        "b1":    params["b1"].reshape(1, D_HID).astype(jnp.float32),
        "w2":    params["w2"].reshape(1, D_HID).astype(jnp.float32),   # (128,1) -> row
        "b2":    params["b2"].reshape(1).astype(jnp.float32),
    }


def unimodal_encoder_v2(imgs, npy, prepared, *, tb=512, tk=1024):
    B = imgs.shape[0]
    K = 1
    for d in imgs.shape[1:]:
        K *= d

    w_enc = prepared["w_enc"]

    # ---- tiling -------------------------------------------------------------
    tb = min(tb, _round_up(B, 8))
    tk = min(tk, _round_up(K, 128))   # multiple of 128 (v5e MXU) / 256-friendly
    # v7x has 2 TensorCores: make sure the parallel batch axis has >= 2
    # programs whenever the batch is big enough to split.
    if _round_up(B, tb) // tb < 2 and B > 8:
        tb = _round_up((B + 1) // 2, 8)
    B_pad = _round_up(B, tb)
    K_pad = _round_up(K, tk)
    nb, nk = B_pad // tb, K_pad // tk

    # ---- npy reduction outside the kernel (tiny XLA op) ---------------------
    # topk(k=1) / topk(k=1, largest=False) over dim 1 == max / min.  Reduce in
    # f32 (matches PyTorch topk precision); cast only the (B,768) results that
    # feed the W1 MXU matmul to bf16.
    npy_f32 = npy.astype(jnp.float32)
    npy_l = jnp.max(npy_f32, axis=1).astype(jnp.bfloat16)
    npy_s = jnp.min(npy_f32, axis=1).astype(jnp.bfloat16)

    imgs_flat = imgs.reshape(B, K)    # native dtype; cast per-tile in-kernel

    # Padding only when shapes are not tile-aligned (none for aligned B / K).
    # TODO(synk): a predicated last tile would avoid this copy for ragged K.
    if B_pad != B:
        npy_l = jnp.pad(npy_l, ((0, B_pad - B), (0, 0)))
        npy_s = jnp.pad(npy_s, ((0, B_pad - B), (0, 0)))
    if B_pad != B or K_pad != K:
        imgs_flat = jnp.pad(imgs_flat, ((0, B_pad - B), (0, K_pad - K)))
    if K_pad != K:
        w_enc = jnp.pad(w_enc, ((0, K_pad - K), (0, 0)))

    # ---- cost estimate -------------------------------------------------------
    flops = 2 * B_pad * (K_pad * D_ENC + 3 * D_ENC * D_HID + D_HID)
    bytes_accessed = (imgs_flat.size * imgs_flat.dtype.itemsize
                      + 2 * (npy_l.size + npy_s.size)
                      + nb * w_enc.size * 2
                      + prepared["w1"].size * 2
                      + 4 * (prepared["b_enc"].size + prepared["b1"].size
                             + prepared["w2"].size + prepared["b2"].size)
                      + 4 * B_pad)

    # ---- pallas_call ---------------------------------------------------------
    def build(single_buffer_consts):
        # Grid-constant operands are DMA'd once; requesting a single buffer
        # saves the pointless second copy (w1 alone is 576 KiB).
        const_kw = ({"pipeline_mode": pl.Buffered(1)}
                    if single_buffer_consts else {})
        in_specs = [
            pl.BlockSpec((tb, tk), lambda i, k: (i, k)),                 # imgs tile (f32)
            pl.BlockSpec((tb, D_ENC), lambda i, k: (i, 0)),              # npy_l slab
            pl.BlockSpec((tb, D_ENC), lambda i, k: (i, 0)),              # npy_s slab
            pl.BlockSpec((tk, D_ENC), lambda i, k: (k, 0)),              # w_enc panel
            pl.BlockSpec((1, D_ENC), lambda i, k: (0, 0), **const_kw),   # b_enc
            pl.BlockSpec((3 * D_ENC, D_HID), lambda i, k: (0, 0), **const_kw),  # w1
            pl.BlockSpec((1, D_HID), lambda i, k: (0, 0), **const_kw),   # b1
            pl.BlockSpec((1, D_HID), lambda i, k: (0, 0), **const_kw),   # w2 row
            pl.BlockSpec(memory_space=pltpu.MemorySpace.SMEM),           # b2 scalar
        ]
        return pl.pallas_call(
            _unimodal_kernel,
            out_shape=jax.ShapeDtypeStruct((B_pad, 1), jnp.float32),
            grid=(nb, nk),
            in_specs=in_specs,
            out_specs=pl.BlockSpec((tb, 1), lambda i, k: (i, 0)),
            scratch_shapes=[pltpu.VMEM((tb, D_ENC), jnp.float32)],
            compiler_params=pltpu.CompilerParams(
                dimension_semantics=("parallel", "arbitrary"),
                # explicit scoped-VMEM budget: ~13 MiB working set at
                # tb=512/tk=1024; 48 MiB gives headroom and fits every
                # generation (v7x physical = 64 MiB per TC).
                vmem_limit_bytes=48 * 1024 * 1024),
            cost_estimate=pl.CostEstimate(flops=flops, transcendentals=0,
                                          bytes_accessed=bytes_accessed),
        )

    args = (imgs_flat, npy_l, npy_s, w_enc, prepared["b_enc"], prepared["w1"],
            prepared["b1"], prepared["w2"], prepared["b2"])
    try:
        out = build(True)(*args)
    except Exception:
        # Buffered(1) is only a VMEM-headroom hint; fall back to default
        # double-buffered specs if this JAX build rejects it.
        out = build(False)(*args)

    return out[:B]


def _reference(imgs, npy, params):
    B = imgs.shape[0]
    x = imgs.reshape(B, -1) @ params["w_enc"] + params["b_enc"]
    npy_l = jnp.max(npy, axis=1)
    npy_s = jnp.min(npy, axis=1)
    cat = jnp.concatenate((x, npy_l, npy_s), axis=1)
    h = jnp.maximum(cat @ params["w1"] + params["b1"], 0.0)
    return h @ params["w2"] + params["b2"]


if __name__ == "__main__":
    key = jax.random.PRNGKey(0)
    k_img, k_npy, k0, k1, k2, k3, k4, k5 = jax.random.split(key, 8)

    B, C, H, W = 2, 3, 16, 16           # C*H*W = 768 = encoder feature dim
    N = 8                                # npy candidates per sample
    D = D_ENC

    imgs = jax.random.normal(k_img, (B, C, H, W), dtype=jnp.float32)
    npy = jax.random.normal(k_npy, (B, N, D), dtype=jnp.float32)

    raw_params = {
        "w_enc": jax.random.normal(k0, (C * H * W, D), dtype=jnp.float32) * 0.02,
        "b_enc": jax.random.normal(k1, (D,), dtype=jnp.float32) * 0.02,
        "w1":    jax.random.normal(k2, (3 * D, D_HID), dtype=jnp.float32) * 0.02,
        "b1":    jax.random.normal(k3, (D_HID,), dtype=jnp.float32) * 0.02,
        "w2":    jax.random.normal(k4, (D_HID, 1), dtype=jnp.float32) * 0.02,
        "b2":    jax.random.normal(k5, (1,), dtype=jnp.float32) * 0.02,
    }

    prepared = prepare_params(raw_params)   # one-time, load-time weight cast

    out = jax.block_until_ready(unimodal_encoder_v2(imgs, npy, prepared))
    ref = jax.block_until_ready(_reference(imgs, npy, raw_params))

    assert out.shape == (B, 1), out.shape
    # bf16 MXU operands with f32 accumulation -> tolerance relaxed vs f32 ref
    assert jnp.allclose(out, ref, atol=3e-2, rtol=3e-2), (out, ref)
    print("KERNEL_OK")
</pallas_src>

<mosaic_0001>
module attributes {stable_mosaic.version = 11 : i64} {
  func.func @_unimodal_kernel(%arg0: i32, %arg1: i32, %arg2: memref<8x768xf32, #tpu.memory_space<vmem>>, %arg3: memref<8x768xbf16, #tpu.memory_space<vmem>>, %arg4: memref<8x768xbf16, #tpu.memory_space<vmem>>, %arg5: memref<768x768xbf16, #tpu.memory_space<vmem>>, %arg6: memref<1x768xf32, #tpu.memory_space<vmem>>, %arg7: memref<2304x128xbf16, #tpu.memory_space<vmem>>, %arg8: memref<1x128xf32, #tpu.memory_space<vmem>>, %arg9: memref<1x128xf32, #tpu.memory_space<vmem>>, %arg10: memref<1xf32, #tpu.memory_space<smem>>, %arg11: memref<8x1xf32, #tpu.memory_space<vmem>>, %arg12: memref<8x768xf32, #tpu.memory_space<vmem>>) attributes {dimension_semantics = [#tpu.dimension_semantics<parallel>, #tpu.dimension_semantics<arbitrary>], iteration_bounds = array<i64: 1, 1>, scalar_prefetch = 0 : i64, scratch_operands = 1 : i64, tpu.core_type = #tpu.core_type<tc>, window_params = [{transform_indices = @transform_0, window_bounds = array<i64: 8, 768>}, {transform_indices = @transform_1, window_bounds = array<i64: 8, 768>}, {transform_indices = @transform_2, window_bounds = array<i64: 8, 768>}, {transform_indices = @transform_3, window_bounds = array<i64: 768, 768>}, {pipeline_mode = #tpu.pipeline_mode<synchronous>, transform_indices = @transform_4, window_bounds = array<i64: 1, 768>}, {pipeline_mode = #tpu.pipeline_mode<synchronous>, transform_indices = @transform_5, window_bounds = array<i64: 2304, 128>}, {pipeline_mode = #tpu.pipeline_mode<synchronous>, transform_indices = @transform_6, window_bounds = array<i64: 1, 128>}, {pipeline_mode = #tpu.pipeline_mode<synchronous>, transform_indices = @transform_7, window_bounds = array<i64: 1, 128>}, {transform_indices = @transform_8, window_bounds = array<i64: 1>}, {transform_indices = @transform_9, window_bounds = array<i64: 8, 1>}]} {
    %c0_i32 = arith.constant 0 : i32
    %0 = arith.cmpi eq, %arg1, %c0_i32 : i32
    %1 = arith.extui %0 : i1 to i32
    %c0_i32_0 = arith.constant 0 : i32
    %2 = arith.cmpi ne, %1, %c0_i32_0 : i32
    scf.if %2 {
      %cst_10 = arith.constant 0.000000e+00 : f32
      %13 = vector.broadcast %cst_10 : f32 to vector<8x768xf32>
      %c0_11 = arith.constant 0 : index
      %c0_12 = arith.constant 0 : index
      %14 = vector.load %arg12[%c0_11, %c0_12] : memref<8x768xf32, #tpu.memory_space<vmem>>, vector<8x768xf32>
      tpu.vector_store %arg12[%c0_11, %c0_12], %13 {strides = array<i32>} : memref<8x768xf32, #tpu.memory_space<vmem>>, vector<8x768xf32>,
    } else {
    }
    %c0 = arith.constant 0 : index
    %c0_1 = arith.constant 0 : index
    %3 = vector.load %arg12[%c0, %c0_1] : memref<8x768xf32, #tpu.memory_space<vmem>>, vector<8x768xf32>
    %c0_2 = arith.constant 0 : index
    %c0_3 = arith.constant 0 : index
    %4 = vector.load %arg2[%c0_2, %c0_3] : memref<8x768xf32, #tpu.memory_space<vmem>>, vector<8x768xf32>
    %5 = arith.truncf %4 : vector<8x768xf32> to vector<8x768xbf16>
    %c0_4 = arith.constant 0 : index
    %c0_5 = arith.constant 0 : index
    %6 = vector.load %arg5[%c0_4, %c0_5] : memref<768x768xbf16, #tpu.memory_space<vmem>>, vector<768x768xbf16>
    %cst = arith.constant dense<0.000000e+00> : vector<8x768xf32>
    %7 = tpu.matmul %5, %6, %cst {dimension_numbers = #tpu.dot_dimension_numbers<[1], [0], [0], [1], [0, 0, 1, 1], [], []>} : vector<8x768xbf16>, vector<768x768xbf16>, vector<8x768xf32> -> vector<8x768xf32>
    %8 = arith.addf %3, %7 : vector<8x768xf32>
    %c0_6 = arith.constant 0 : index
    %c0_7 = arith.constant 0 : index
    %9 = vector.load %arg12[%c0_6, %c0_7] : memref<8x768xf32, #tpu.memory_space<vmem>>, vector<8x768xf32>
    tpu.vector_store %arg12[%c0_6, %c0_7], %8 {strides = array<i32>} : memref<8x768xf32, #tpu.memory_space<vmem>>, vector<8x768xf32>,
    %c0_i32_8 = arith.constant 0 : i32
    %10 = arith.cmpi eq, %arg1, %c0_i32_8 : i32
    %11 = arith.extui %10 : i1 to i32
    %c0_i32_9 = arith.constant 0 : i32
    %12 = arith.cmpi ne, %11, %c0_i32_9 : i32
    scf.if %12 {
      %c0_10 = arith.constant 0 : index
      %c0_11 = arith.constant 0 : index
      %13 = vector.load %arg12[%c0_10, %c0_11] : memref<8x768xf32, #tpu.memory_space<vmem>>, vector<8x768xf32>
      %c0_12 = arith.constant 0 : index
      %c0_13 = arith.constant 0 : index
      %14 = vector.load %arg6[%c0_12, %c0_13] : memref<1x768xf32, #tpu.memory_space<vmem>>, vector<1x768xf32>
      %15 = vector.broadcast %14 : vector<1x768xf32> to vector<8x768xf32>
      %16 = arith.addf %13, %15 : vector<8x768xf32>
      %17 = arith.truncf %16 : vector<8x768xf32> to vector<8x768xbf16>
      %c0_14 = arith.constant 0 : index
      %c0_15 = arith.constant 0 : index
      %18 = vector.load %arg7[%c0_14, %c0_15] : memref<2304x128xbf16, #tpu.memory_space<vmem>>, vector<768x128xbf16>
      %cst_16 = arith.constant dense<0.000000e+00> : vector<8x128xf32>
      %19 = tpu.matmul %17, %18, %cst_16 {dimension_numbers = #tpu.dot_dimension_numbers<[1], [0], [0], [1], [0, 0, 1, 1], [], []>} : vector<8x768xbf16>, vector<768x128xbf16>, vector<8x128xf32> -> vector<8x128xf32>
      %c0_17 = arith.constant 0 : index
      %c0_18 = arith.constant 0 : index
      %20 = vector.load %arg3[%c0_17, %c0_18] : memref<8x768xbf16, #tpu.memory_space<vmem>>, vector<8x768xbf16>
      %c768 = arith.constant 768 : index
      %c0_19 = arith.constant 0 : index
      %21 = vector.load %arg7[%c768, %c0_19] : memref<2304x128xbf16, #tpu.memory_space<vmem>>, vector<768x128xbf16>
      %cst_20 = arith.constant dense<0.000000e+00> : vector<8x128xf32>
      %22 = tpu.matmul %20, %21, %cst_20 {dimension_numbers = #tpu.dot_dimension_numbers<[1], [0], [0], [1], [0, 0, 1, 1], [], []>} : vector<8x768xbf16>, vector<768x128xbf16>, vector<8x128xf32> -> vector<8x128xf32>
      %23 = arith.addf %19, %22 : vector<8x128xf32>
      %c0_21 = arith.constant 0 : index
      %c0_22 = arith.constant 0 : index
      %24 = vector.load %arg4[%c0_21, %c0_22] : memref<8x768xbf16, #tpu.memory_space<vmem>>, vector<8x768xbf16>
      %c1536 = arith.constant 1536 : index
      %c0_23 = arith.constant 0 : index
      %25 = vector.load %arg7[%c1536, %c0_23] : memref<2304x128xbf16, #tpu.memory_space<vmem>>, vector<768x128xbf16>
      %cst_24 = arith.constant dense<0.000000e+00> : vector<8x128xf32>
      %26 = tpu.matmul %24, %25, %cst_24 {dimension_numbers = #tpu.dot_dimension_numbers<[1], [0], [0], [1], [0, 0, 1, 1], [], []>} : vector<8x768xbf16>, vector<768x128xbf16>, vector<8x128xf32> -> vector<8x128xf32>
      %27 = arith.addf %23, %26 : vector<8x128xf32>
      %c0_25 = arith.constant 0 : index
      %c0_26 = arith.constant 0 : index
      %28 = vector.load %arg8[%c0_25, %c0_26] : memref<1x128xf32, #tpu.memory_space<vmem>>, vector<1x128xf32>
      %29 = vector.broadcast %28 : vector<1x128xf32> to vector<8x128xf32>
      %30 = arith.addf %27, %29 : vector<8x128xf32>
      %cst_27 = arith.constant 0.000000e+00 : f32
      %31 = vector.broadcast %cst_27 : f32 to vector<8x128xf32>
      %32 = arith.maximumf %30, %31 : vector<8x128xf32>
      %c0_28 = arith.constant 0 : index
      %c0_29 = arith.constant 0 : index
      %33 = vector.load %arg9[%c0_28, %c0_29] : memref<1x128xf32, #tpu.memory_space<vmem>>, vector<1x128xf32>
      %34 = vector.broadcast %33 : vector<1x128xf32> to vector<8x128xf32>
      %35 = arith.mulf %32, %34 : vector<8x128xf32>
      %cst_30 = arith.constant dense<0.000000e+00> : vector<8xf32>
      %36 = vector.multi_reduction <add>, %35, %cst_30 [1] : vector<8x128xf32> to vector<8xf32>
      %37 = vector.shape_cast %36 : vector<8xf32> to vector<8x1xf32>
      %c0_31 = arith.constant 0 : index
      %38 = memref.load %arg10[%c0_31] : memref<1xf32, #tpu.memory_space<smem>>
      %39 = vector.broadcast %38 : f32 to vector<8x1xf32>
      %40 = arith.addf %37, %39 : vector<8x1xf32>
      %c0_32 = arith.constant 0 : index
      %c0_33 = arith.constant 0 : index
      %41 = vector.load %arg11[%c0_32, %c0_33] : memref<8x1xf32, #tpu.memory_space<vmem>>, vector<8x1xf32>
      tpu.vector_store %arg11[%c0_32, %c0_33], %40 {strides = array<i32>} : memref<8x1xf32, #tpu.memory_space<vmem>>, vector<8x1xf32>,
    } else {
    }
    return
  }
  func.func @transform_0(%arg0: i32, %arg1: i32) -> (i32, i32) {
    %c0_i32 = arith.constant 0 : i32
    return %arg0, %arg1 : i32, i32
  }
  func.func @transform_1(%arg0: i32, %arg1: i32) -> (i32, i32) {
    %c0_i32 = arith.constant 0 : i32
    %c0_i32_0 = arith.constant 0 : i32
    return %arg0, %c0_i32 : i32, i32
  }
  func.func @transform_2(%arg0: i32, %arg1: i32) -> (i32, i32) {
    %c0_i32 = arith.constant 0 : i32
    %c0_i32_0 = arith.constant 0 : i32
    return %arg0, %c0_i32 : i32, i32
  }
  func.func @transform_3(%arg0: i32, %arg1: i32) -> (i32, i32) {
    %c0_i32 = arith.constant 0 : i32
    %c0_i32_0 = arith.constant 0 : i32
    return %arg1, %c0_i32 : i32, i32
  }
  func.func @transform_4(%arg0: i32, %arg1: i32) -> (i32, i32) {
    %c0_i32 = arith.constant 0 : i32
    %c0_i32_0 = arith.constant 0 : i32
    %c0_i32_1 = arith.constant 0 : i32
    return %c0_i32, %c0_i32_0 : i32, i32
  }
  func.func @transform_5(%arg0: i32, %arg1: i32) -> (i32, i32) {
    %c0_i32 = arith.constant 0 : i32
    %c0_i32_0 = arith.constant 0 : i32
    %c0_i32_1 = arith.constant 0 : i32
    return %c0_i32, %c0_i32_0 : i32, i32
  }
  func.func @transform_6(%arg0: i32, %arg1: i32) -> (i32, i32) {
    %c0_i32 = arith.constant 0 : i32
    %c0_i32_0 = arith.constant 0 : i32
    %c0_i32_1 = arith.constant 0 : i32
    return %c0_i32, %c0_i32_0 : i32, i32
  }
  func.func @transform_7(%arg0: i32, %arg1: i32) -> (i32, i32) {
    %c0_i32 = arith.constant 0 : i32
    %c0_i32_0 = arith.constant 0 : i32
    %c0_i32_1 = arith.constant 0 : i32
    return %c0_i32, %c0_i32_0 : i32, i32
  }
  func.func @transform_8(%arg0: i32, %arg1: i32) -> i32 {
    %c0_i32 = arith.constant 0 : i32
    %c0_i32_0 = arith.constant 0 : i32
    return %c0_i32 : i32
  }
  func.func @transform_9(%arg0: i32, %arg1: i32) -> (i32, i32) {
    %c0_i32 = arith.constant 0 : i32
    %c0_i32_0 = arith.constant 0 : i32
    return %arg0, %c0_i32 : i32, i32
  }
}

module attributes {stable_mosaic.version = 11 : i64} {
  func.func @_unimodal_kernel(%arg0: i32, %arg1: i32, %arg2: memref<8x768xf32, #tpu.memory_space<vmem>>, %arg3: memref<8x768xbf16, #tpu.memory_space<vmem>>, %arg4: memref<8x768xbf16, #tpu.memory_space<vmem>>, %arg5: memref<768x768xbf16, #tpu.memory_space<vmem>>, %arg6: memref<1x768xf32, #tpu.memory_space<vmem>>, %arg7: memref<2304x128xbf16, #tpu.memory_space<vmem>>, %arg8: memref<1x128xf32, #tpu.memory_space<vmem>>, %arg9: memref<1x128xf32, #tpu.memory_space<vmem>>, %arg10: memref<1xf32, #tpu.memory_space<smem>>, %arg11: memref<8x1xf32, #tpu.memory_space<vmem>>, %arg12: memref<8x768xf32, #tpu.memory_space<vmem>>) attributes {dimension_semantics = [#tpu.dimension_semantics<parallel>, #tpu.dimension_semantics<arbitrary>], iteration_bounds = array<i64: 1, 1>, scalar_prefetch = 0 : i64, scratch_operands = 1 : i64, tpu.core_type = #tpu.core_type<tc>, window_params = [{transform_indices = @transform_0, window_bounds = array<i64: 8, 768>}, {transform_indices = @transform_1, window_bounds = array<i64: 8, 768>}, {transform_indices = @transform_2, window_bounds = array<i64: 8, 768>}, {transform_indices = @transform_3, window_bounds = array<i64: 768, 768>}, {pipeline_mode = #tpu.pipeline_mode<synchronous>, transform_indices = @transform_4, window_bounds = array<i64: 1, 768>}, {pipeline_mode = #tpu.pipeline_mode<synchronous>, transform_indices = @transform_5, window_bounds = array<i64: 2304, 128>}, {pipeline_mode = #tpu.pipeline_mode<synchronous>, transform_indices = @transform_6, window_bounds = array<i64: 1, 128>}, {pipeline_mode = #tpu.pipeline_mode<synchronous>, transform_indices = @transform_7, window_bounds = array<i64: 1, 128>}, {transform_indices = @transform_8, window_bounds = array<i64: 1>}, {transform_indices = @transform_9, window_bounds = array<i64: 8, 1>}]} {
    %c0_i32 = arith.constant 0 : i32
    %0 = arith.cmpi eq, %arg1, %c0_i32 : i32
    %1 = arith.extui %0 : i1 to i32
    %c0_i32_0 = arith.constant 0 : i32
    %2 = arith.cmpi ne, %1, %c0_i32_0 : i32
    scf.if %2 {
      %cst_10 = arith.constant 0.000000e+00 : f32
      %13 = vector.broadcast %cst_10 : f32 to vector<8x768xf32>
      %c0_11 = arith.constant 0 : index
      %c0_12 = arith.constant 0 : index
      %14 = vector.load %arg12[%c0_11, %c0_12] : memref<8x768xf32, #tpu.memory_space<vmem>>, vector<8x768xf32>
      tpu.vector_store %arg12[%c0_11, %c0_12], %13 {strides = array<i32>} : memref<8x768xf32, #tpu.memory_space<vmem>>, vector<8x768xf32>,
    } else {
    }
    %c0 = arith.constant 0 : index
    %c0_1 = arith.constant 0 : index
    %3 = vector.load %arg12[%c0, %c0_1] : memref<8x768xf32, #tpu.memory_space<vmem>>, vector<8x768xf32>
    %c0_2 = arith.constant 0 : index
    %c0_3 = arith.constant 0 : index
    %4 = vector.load %arg2[%c0_2, %c0_3] : memref<8x768xf32, #tpu.memory_space<vmem>>, vector<8x768xf32>
    %5 = arith.truncf %4 : vector<8x768xf32> to vector<8x768xbf16>
    %c0_4 = arith.constant 0 : index
    %c0_5 = arith.constant 0 : index
    %6 = vector.load %arg5[%c0_4, %c0_5] : memref<768x768xbf16, #tpu.memory_space<vmem>>, vector<768x768xbf16>
    %cst = arith.constant dense<0.000000e+00> : vector<8x768xf32>
    %7 = tpu.matmul %5, %6, %cst {dimension_numbers = #tpu.dot_dimension_numbers<[1], [0], [0], [1], [0, 0, 1, 1], [], []>} : vector<8x768xbf16>, vector<768x768xbf16>, vector<8x768xf32> -> vector<8x768xf32>
    %8 = arith.addf %3, %7 : vector<8x768xf32>
    %c0_6 = arith.constant 0 : index
    %c0_7 = arith.constant 0 : index
    %9 = vector.load %arg12[%c0_6, %c0_7] : memref<8x768xf32, #tpu.memory_space<vmem>>, vector<8x768xf32>
    tpu.vector_store %arg12[%c0_6, %c0_7], %8 {strides = array<i32>} : memref<8x768xf32, #tpu.memory_space<vmem>>, vector<8x768xf32>,
    %c0_i32_8 = arith.constant 0 : i32
    %10 = arith.cmpi eq, %arg1, %c0_i32_8 : i32
    %11 = arith.extui %10 : i1 to i32
    %c0_i32_9 = arith.constant 0 : i32
    %12 = arith.cmpi ne, %11, %c0_i32_9 : i32
    scf.if %12 {
      %c0_10 = arith.constant 0 : index
      %c0_11 = arith.constant 0 : index
      %13 = vector.load %arg12[%c0_10, %c0_11] : memref<8x768xf32, #tpu.memory_space<vmem>>, vector<8x768xf32>
      %c0_12 = arith.constant 0 : index
      %c0_13 = arith.constant 0 : index
      %14 = vector.load %arg6[%c0_12, %c0_13] : memref<1x768xf32, #tpu.memory_space<vmem>>, vector<1x768xf32>
      %15 = vector.broadcast %14 : vector<1x768xf32> to vector<8x768xf32>
      %16 = arith.addf %13, %15 : vector<8x768xf32>
      %17 = arith.truncf %16 : vector<8x768xf32> to vector<8x768xbf16>
      %c0_14 = arith.constant 0 : index
      %c0_15 = arith.constant 0 : index
      %18 = vector.load %arg7[%c0_14, %c0_15] : memref<2304x128xbf16, #tpu.memory_space<vmem>>, vector<768x128xbf16>
      %cst_16 = arith.constant dense<0.000000e+00> : vector<8x128xf32>
      %19 = tpu.matmul %17, %18, %cst_16 {dimension_numbers = #tpu.dot_dimension_numbers<[1], [0], [0], [1], [0, 0, 1, 1], [], []>} : vector<8x768xbf16>, vector<768x128xbf16>, vector<8x128xf32> -> vector<8x128xf32>
      %c0_17 = arith.constant 0 : index
      %c0_18 = arith.constant 0 : index
      %20 = vector.load %arg3[%c0_17, %c0_18] : memref<8x768xbf16, #tpu.memory_space<vmem>>, vector<8x768xbf16>
      %c768 = arith.constant 768 : index
      %c0_19 = arith.constant 0 : index
      %21 = vector.load %arg7[%c768, %c0_19] : memref<2304x128xbf16, #tpu.memory_space<vmem>>, vector<768x128xbf16>
      %cst_20 = arith.constant dense<0.000000e+00> : vector<8x128xf32>
      %22 = tpu.matmul %20, %21, %cst_20 {dimension_numbers = #tpu.dot_dimension_numbers<[1], [0], [0], [1], [0, 0, 1, 1], [], []>} : vector<8x768xbf16>, vector<768x128xbf16>, vector<8x128xf32> -> vector<8x128xf32>
      %23 = arith.addf %19, %22 : vector<8x128xf32>
      %c0_21 = arith.constant 0 : index
      %c0_22 = arith.constant 0 : index
      %24 = vector.load %arg4[%c0_21, %c0_22] : memref<8x768xbf16, #tpu.memory_space<vmem>>, vector<8x768xbf16>
      %c1536 = arith.constant 1536 : index
      %c0_23 = arith.constant 0 : index
      %25 = vector.load %arg7[%c1536, %c0_23] : memref<2304x128xbf16, #tpu.memory_space<vmem>>, vector<768x128xbf16>
      %cst_24 = arith.constant dense<0.000000e+00> : vector<8x128xf32>
      %26 = tpu.matmul %24, %25, %cst_24 {dimension_numbers = #tpu.dot_dimension_numbers<[1], [0], [0], [1], [0, 0, 1, 1], [], []>} : vector<8x768xbf16>, vector<768x128xbf16>, vector<8x128xf32> -> vector<8x128xf32>
      %27 = arith.addf %23, %26 : vector<8x128xf32>
      %c0_25 = arith.constant 0 : index
      %c0_26 = arith.constant 0 : index
      %28 = vector.load %arg8[%c0_25, %c0_26] : memref<1x128xf32, #tpu.memory_space<vmem>>, vector<1x128xf32>
      %29 = vector.broadcast %28 : vector<1x128xf32> to vector<8x128xf32>
      %30 = arith.addf %27, %29 : vector<8x128xf32>
      %cst_27 = arith.constant 0.000000e+00 : f32
      %31 = vector.broadcast %cst_27 : f32 to vector<8x128xf32>
      %32 = arith.maximumf %30, %31 : vector<8x128xf32>
      %c0_28 = arith.constant 0 : index
      %c0_29 = arith.constant 0 : index
      %33 = vector.load %arg9[%c0_28, %c0_29] : memref<1x128xf32, #tpu.memory_space<vmem>>, vector<1x128xf32>
      %34 = vector.broadcast %33 : vector<1x128xf32> to vector<8x128xf32>
      %35 = arith.mulf %32, %34 : vector<8x128xf32>
      %cst_30 = arith.constant dense<0.000000e+00> : vector<8xf32>
      %36 = vector.multi_reduction <add>, %35, %cst_30 [1] : vector<8x128xf32> to vector<8xf32>
      %37 = vector.shape_cast %36 : vector<8xf32> to vector<8x1xf32>
      %c0_31 = arith.constant 0 : index
      %38 = memref.load %arg10[%c0_31] : memref<1xf32, #tpu.memory_space<smem>>
      %39 = vector.broadcast %38 : f32 to vector<8x1xf32>
      %40 = arith.addf %37, %39 : vector<8x1xf32>
      %c0_32 = arith.constant 0 : index
      %c0_33 = arith.constant 0 : index
      %41 = vector.load %arg11[%c0_32, %c0_33] : memref<8x1xf32, #tpu.memory_space<vmem>>, vector<8x1xf32>
      tpu.vector_store %arg11[%c0_32, %c0_33], %40 {strides = array<i32>} : memref<8x1xf32, #tpu.memory_space<vmem>>, vector<8x1xf32>,
    } else {
    }
    return
  }
  func.func @transform_0(%arg0: i32, %arg1: i32) -> (i32, i32) {
    %c0_i32 = arith.constant 0 : i32
    return %arg0, %arg1 : i32, i32
  }
  func.func @transform_1(%arg0: i32, %arg1: i32) -> (i32, i32) {
    %c0_i32 = arith.constant 0 : i32
    %c0_i32_0 = arith.constant 0 : i32
    return %arg0, %c0_i32 : i32, i32
  }
  func.func @transform_2(%arg0: i32, %arg1: i32) -> (i32, i32) {
    %c0_i32 = arith.constant 0 : i32
    %c0_i32_0 = arith.constant 0 : i32
    return %arg0, %c0_i32 : i32, i32
  }
  func.func @transform_3(%arg0: i32, %arg1: i32) -> (i32, i32) {
    %c0_i32 = arith.constant 0 : i32
    %c0_i32_0 = arith.constant 0 : i32
    return %arg1, %c0_i32 : i32, i32
  }
  func.func @transform_4(%arg0: i32, %arg1: i32) -> (i32, i32) {
    %c0_i32 = arith.constant 0 : i32
    %c0_i32_0 = arith.constant 0 : i32
    %c0_i32_1 = arith.constant 0 : i32
    return %c0_i32, %c0_i32_0 : i32, i32
  }
  func.func @transform_5(%arg0: i32, %arg1: i32) -> (i32, i32) {
    %c0_i32 = arith.constant 0 : i32
    %c0_i32_0 = arith.constant 0 : i32
    %c0_i32_1 = arith.constant 0 : i32
    return %c0_i32, %c0_i32_0 : i32, i32
  }
  func.func @transform_6(%arg0: i32, %arg1: i32) -> (i32, i32) {
    %c0_i32 = arith.constant 0 : i32
    %c0_i32_0 = arith.constant 0 : i32
    %c0_i32_1 = arith.constant 0 : i32
    return %c0_i32, %c0_i32_0 : i32, i32
  }
  func.func @transform_7(%arg0: i32, %arg1: i32) -> (i32, i32) {
    %c0_i32 = arith.constant 0 : i32
    %c0_i32_0 = arith.constant 0 : i32
    %c0_i32_1 = arith.constant 0 : i32
    return %c0_i32, %c0_i32_0 : i32, i32
  }
  func.func @transform_8(%arg0: i32, %arg1: i32) -> i32 {
    %c0_i32 = arith.constant 0 : i32
    %c0_i32_0 = arith.constant 0 : i32
    return %c0_i32 : i32
  }
  func.func @transform_9(%arg0: i32, %arg1: i32) -> (i32, i32) {
    %c0_i32 = arith.constant 0 : i32
    %c0_i32_0 = arith.constant 0 : i32
    return %arg0, %c0_i32 : i32, i32
  }
}

</mosaic_0001>

<bundles_post_ra>
// kernel: tpu_custom_call.1
= control target key start
LH: loop header
LB: loop body
LE: loop exit
PB: predicated region body
PF: predicated region fallthrough
CT: control target
= control target key end

     0   :  { %15 = vsyncpa [#allocation5], 0  ;;  %s5503_s0 = inlined_call_operand.hbm [shape: f32[8,768], index: 0, kind: input, shape index: {}]   ;;  %s5504_s1 = inlined_call_operand.hbm [shape: bf16[8,768], index: 1, kind: input, shape index: {}]   ;;  %s5505_s2 = inlined_call_operand.hbm [shape: bf16[8,768], index: 2, kind: input, shape index: {}]   ;;  %s5506_s3 = inlined_call_operand.hbm [shape: bf16[768,768], index: 3, kind: input, shape index: {}]   ;;  %s5507_s4 = inlined_call_operand.hbm [shape: f32[1,768], index: 4, kind: input, shape index: {}]   ;;  %s5508_s5 = inlined_call_operand.hbm [shape: bf16[2304,128], index: 5, kind: input, shape index: {}]   ;;  %s5509_s6 = inlined_call_operand.hbm [shape: f32[1,128], index: 6, kind: input, shape index: {}]   ;;  %s5510_s7 = inlined_call_operand.hbm [shape: f32[1,128], index: 7, kind: input, shape index: {}]   ;;  %s5511_s8 = inlined_call_operand.<no memory space> [shape: f32[1], index: 8, kind: input, shape index: {}]   ;;  %s5512_s9 = inlined_call_operand.vmem [shape: f32[8,1], index: 9, kind: output, shape index: {}]  }
   0x1   :  { %16 = vsyncpa [#allocation7], 0 }
   0x2   :  { %17 = vsyncpa [#allocation10], 0 }
   0x3   :  { %18 = vsyncpa [#allocation13], 0 }
   0x4   :  { %19 = vsyncpa [#allocation16], 0  ;;  %s5329_s30 = smov [#allocation6]   ;;  %s5330_s11 = smov [#allocation9]  }
   0x5   :  { %s36_s10 = sshll.u32 %s5329_s30, 4  ;;  %s55_s12 = sshll.u32 %s5330_s11, 4  ;;  %s37_s10 = int_to_ptr.vmem [resolvable:$true] %s36_s10  ;;  %s56_s12 = int_to_ptr.vmem [resolvable:$true] %s55_s12 }
   0x6   :  { %s5167_s13 = scalar_lea.vmem %s37_s10, 384  ;;  %p5172_p1 = scmp.lt.s32.totalorder %s37_s10, %s37_s10 }
   0x7   :  { %p5168_p0 = scmp.ne.s32.totalorder %s37_s10, %s5167_s13  ;;  %p5173_p2 = scmp.lt.s32.totalorder %s5167_s13, %s5167_s13 }
   0x9   :  { %p5174_p3 = por %p5173_p2, %p5172_p1 }
   0xb   :  { %p5175_p4 = pnand %p5174_p3, %p5168_p0 }
   0xd   :  { %5178 = shalt.err (!%p5175_p4)
}
   0xe   :  { %39 = dma.hbm_to_vmem [thread:$0]  %s5504_s1, 384, %s37_s10, [#allocation7]  }
   0xf   :  { %s5187_s16 = scalar_lea.vmem %s56_s12, 36864  ;;  %p5192_p6 = scmp.lt.s32.totalorder %s56_s12, %s56_s12 }
  0x10   :  { %p5188_p5 = scmp.ne.s32.totalorder %s56_s12, %s5187_s16  ;;  %p5193_p7 = scmp.lt.s32.totalorder %s5187_s16, %s5187_s16 }
  0x12   :  { %p5194_p8 = por %p5193_p7, %p5192_p6 }
  0x14   :  { %p5195_p9 = pnand %p5194_p8, %p5188_p5 }
  0x16   :  { %5198 = shalt.err (!%p5195_p9)
}
  0x17   :  { %s5331_s17 = smov 384   ;;  %s5332_s18 = smov 24  }
  0x18   :  { %61 = dma.hbm_to_vmem [thread:$0]  %s5506_s3, 36864, %s56_s12, [#allocation10], %s5331_s17, %s5331_s17, %s5332_s18  }
  0x19   :  { %s5333_s21 = smov [#allocation12]  }
  0x1a   :  { %s77_s22 = sshll.u32 %s5333_s21, 4  ;;  %s78_s22 = int_to_ptr.vmem [resolvable:$true] %s77_s22 }
  0x1b   :  { %s5207_s23 = scalar_lea.vmem %s78_s22, 18432  ;;  %p5212_p11 = scmp.lt.s32.totalorder %s78_s22, %s78_s22 }
  0x1c   :  { %p5208_p10 = scmp.ne.s32.totalorder %s78_s22, %s5207_s23  ;;  %p5213_p12 = scmp.lt.s32.totalorder %s5207_s23, %s5207_s23 }
  0x1e   :  { %p5214_p13 = por %p5213_p12, %p5212_p11 }
  0x20   :  { %p5215_p0 = pnand %p5214_p13, %p5208_p10 }
  0x22   :  { %5218 = shalt.err (!%p5215_p0)
}
  0x23   :  { %s5334_s1 = smov 64   ;;  %s5335_s24 = smov 4  }
  0x24   :  { %83 = dma.hbm_to_vmem [thread:$0]  %s5508_s5, 18432, %s78_s22, [#allocation13], %s5334_s1, %s5334_s1, %s5335_s24  }
  0x25   :  { %s5336_s27 = smov [#allocation4]   ;;  %s5337_s3 = smov [#allocation8]  }
  0x26   :  { %s26_s28 = sshll.u32 %s5336_s27, 4  ;;  %s46_s29 = sshll.u32 %s5337_s3, 4  ;;  %s27_s28 = int_to_ptr.vmem [resolvable:$true] %s26_s28  ;;  %s47_s29 = int_to_ptr.vmem [resolvable:$true] %s46_s29 }
  0x27   :  { %s5227_s30 = scalar_lea.vmem %s27_s28, 768  ;;  %p5232_p2 = scmp.lt.s32.totalorder %s27_s28, %s27_s28 }
  0x28   :  { %p5228_p1 = scmp.ne.s32.totalorder %s27_s28, %s5227_s30  ;;  %p5233_p3 = scmp.lt.s32.totalorder %s5227_s30, %s5227_s30 }
  0x2a   :  { %p5234_p4 = por %p5233_p3, %p5232_p2 }
  0x2c   :  { %p5235_p5 = pnand %p5234_p4, %p5228_p1 }
  0x2e   :  { %5238 = shalt.err (!%p5235_p5)
}
  0x2f   :  { %29 = dma.hbm_to_vmem [thread:$0]  %s5503_s0, 768, %s27_s28, [#allocation5]  }
  0x30   :  { %s5247_s12 = scalar_lea.vmem %s47_s29, 384  ;;  %p5252_p7 = scmp.lt.s32.totalorder %s47_s29, %s47_s29 }
  0x31   :  { %p5248_p6 = scmp.ne.s32.totalorder %s47_s29, %s5247_s12  ;;  %p5253_p8 = scmp.lt.s32.totalorder %s5247_s12, %s5247_s12 }
  0x33   :  { %p5254_p9 = por %p5253_p8, %p5252_p7 }
  0x35   :  { %p5255_p10 = pnand %p5254_p9, %p5248_p6 }
  0x37   :  { %5258 = shalt.err (!%p5255_p10)
}
  0x38   :  { %49 = dma.hbm_to_vmem [thread:$0]  %s5505_s2, 384, %s47_s29, [#allocation7]  }
  0x39   :  { %s5338_s14 = smov [#allocation11]   ;;  %s5339_s16 = smov [#allocation14]  }
  0x3a   :  { %s68_s15 = sshll.u32 %s5338_s14, 4  ;;  %s90_s17 = sshll.u32 %s5339_s16, 4  ;;  %s69_s15 = int_to_ptr.vmem [resolvable:$true] %s68_s15  ;;  %s91_s17 = int_to_ptr.vmem [resolvable:$true] %s90_s17 }
  0x3b   :  { %s5267_s18 = scalar_lea.vmem %s69_s15, 96  ;;  %p5272_p12 = scmp.lt.s32.totalorder %s69_s15, %s69_s15 }
  0x3c   :  { %p5268_p11 = scmp.ne.s32.totalorder %s69_s15, %s5267_s18  ;;  %p5273_p13 = scmp.lt.s32.totalorder %s5267_s18, %s5267_s18 }
  0x3e   :  { %p5274_p0 = por %p5273_p13, %p5272_p12 }
  0x40   :  { %p5275_p1 = pnand %p5274_p0, %p5268_p11 }
  0x42   :  { %5278 = shalt.err (!%p5275_p1)
}
  0x43   :  { %71 = dma.hbm_to_vmem [thread:$0]  %s5507_s4, 96, %s69_s15, [#allocation10]  }
  0x44   :  { %s5287_s20 = scalar_lea.vmem %s91_s17, 16  ;;  %s5291_s2 = scalar_lea.vmem %s91_s17, 32 }
  0x45   :  { %p5288_p2 = scmp.ne.s32.totalorder %s91_s17, %s5287_s20  ;;  %p5292_p3 = scmp.lt.s32.totalorder %s91_s17, %s91_s17 }
  0x46   :  { %p5293_p4 = scmp.lt.s32.totalorder %s5291_s2, %s5287_s20 }
  0x48   :  { %p5294_p5 = por %p5293_p4, %p5292_p3 }
  0x4a   :  { %p5295_p6 = pnand %p5294_p5, %p5288_p2 }
  0x4c   :  { %5298 = shalt.err (!%p5295_p6)
}
  0x4d   :  { %93 = dma.hbm_to_vmem [thread:$0]  %s5509_s6, 16, %s91_s17, [#allocation13]  }
  0x4e   :  { %s5340_s23 = smov [#allocation15]  }
  0x4f   :  { %s100_s1 = sshll.u32 %s5340_s23, 4  ;;  %s101_s1 = int_to_ptr.vmem [resolvable:$true] %s100_s1 }
  0x50   :  { %s5307_s24 = scalar_lea.vmem %s101_s1, 16  ;;  %s5311_s25 = scalar_lea.vmem %s101_s1, 32 }
  0x51   :  { %p5308_p7 = scmp.ne.s32.totalorder %s101_s1, %s5307_s24  ;;  %p5312_p8 = scmp.lt.s32.totalorder %s101_s1, %s101_s1 }
  0x52   :  { %p5313_p9 = scmp.lt.s32.totalorder %s5311_s25, %s5307_s24 }
  0x54   :  { %p5314_p10 = por %p5313_p9, %p5312_p8 }
  0x56   :  { %p5315_p11 = pnand %p5314_p10, %p5308_p7 }
  0x58   :  { %5318 = shalt.err (!%p5315_p11)
}
  0x59   :  { %103 = dma.hbm_to_vmem [thread:$0]  %s5510_s7, 16, %s101_s1, [#allocation16]  }
  0x5a   :  { %5319 = dma.done.wait [#allocation5], 768  }
  0x5b   :  { %5320 = vsyncadd [#allocation5], 4294966528 }
  0x5c   :  { %5321 = dma.done.wait [#allocation7], 768  }
  0x5d   :  { %5322 = vsyncadd [#allocation7], 4294966528 }
  0x5e   :  { %5323 = dma.done.wait [#allocation10], 36960  }
  0x5f   :  { %5324 = vsyncadd [#allocation10], 4294930336 }
  0x60   :  { %5325 = dma.done.wait [#allocation13], 18448  }
  0x61   :  { %5326 = vsyncadd [#allocation13], 4294948848 }
  0x62   :  { %5327 = dma.done.wait [#allocation16], 16  }
  0x63   :  { %5328 = vsyncadd [#allocation16], 4294967280  ;;  %v4571_v0 = vld [vmem:[#allocation9 + $0x154] ss:$24 sps:$4 sm:$0xff]   ;;  %v4575_v2 = vld [vmem:[#allocation9 + $0x150] ss:$24 sps:$4 sm:$0xff]  }
  0x64   :  { %v4573_v1 = vld [vmem:[#allocation9 + $0x454] ss:$24 sps:$4 sm:$0xff]   ;;  %1887 = vmatprep.subr.bf16.mxu0 %v4571_v0  ;;  %v4576_v3 = vld [vmem:[#allocation9 + $0x450] ss:$24 sps:$4 sm:$0xff]   ;;  %v4577_v4 = vld [vmem:[#allocation9 + $0x124] ss:$24 sps:$4 sm:$0xff]  }
  0x65   :  { %1928 = vmatprep.subr.bf16.mxu1 %v4573_v1  ;;  %1888 = vmatpush1.bf16.msra.mxu0 %v4575_v2  ;;  %v4579_v5 = vld [vmem:[#allocation9 + $0x424] ss:$24 sps:$4 sm:$0xff]   ;;  %v4581_v6 = vld [vmem:[#allocation9 + $0x120] ss:$24 sps:$4 sm:$0xff]   ;;  %v4583_v8 = vld [vmem:[#allocation9 + $0xf4] ss:$24 sps:$4 sm:$0xff]  }
  0x66   :  { %1929 = vmatpush1.bf16.msra.mxu1 %v4576_v3  ;;  %1889 = vmatprep.subr.bf16.mxu0 %v4577_v4  ;;  %v4582_v7 = vld [vmem:[#allocation9 + $0x420] ss:$24 sps:$4 sm:$0xff]   ;;  %v4585_v9 = vld [vmem:[#allocation9 + $0x3f4] ss:$24 sps:$4 sm:$0xff]   ;;  %v4587_v10 = vld [vmem:[#allocation9 + $0xf0] ss:$24 sps:$4 sm:$0xff]  }
  0x67   :  { %1930 = vmatprep.subr.bf16.mxu1 %v4579_v5  ;;  %v4588_v11 = vld [vmem:[#allocation9 + $0x3f0] ss:$24 sps:$4 sm:$0xff]   ;;  %v4589_v12 = vld [vmem:[#allocation9 + $0xc4] ss:$24 sps:$4 sm:$0xff]   ;;  %v4593_v14 = vld [vmem:[#allocation9 + $0xc0] ss:$24 sps:$4 sm:$0xff]  }
  0x68   :  { %v4591_v13 = vld [vmem:[#allocation9 + $0x3c4] ss:$24 sps:$4 sm:$0xff]   ;;  %v4594_v15 = vld [vmem:[#allocation9 + $0x3c0] ss:$24 sps:$4 sm:$0xff]   ;;  %v4595_v16 = vld [vmem:[#allocation9 + $0x94] ss:$24 sps:$4 sm:$0xff]  }
  0x69   :  { %1890 = vmatpush1.bf16.msra.mxu0 %v4581_v6  ;;  %v4597_v17 = vld [vmem:[#allocation9 + $0x394] ss:$24 sps:$4 sm:$0xff]   ;;  %v4599_v18 = vld [vmem:[#allocation9 + $0x90] ss:$24 sps:$4 sm:$0xff]   ;;  %v4601_v20 = vld [vmem:[#allocation9 + $0x64] ss:$24 sps:$4 sm:$0xff]  }
  0x6a   :  { %1931 = vmatpush1.bf16.msra.mxu1 %v4582_v7  ;;  %1891 = vmatprep.subr.bf16.mxu0 %v4583_v8  ;;  %v4600_v19 = vld [vmem:[#allocation9 + $0x390] ss:$24 sps:$4 sm:$0xff]   ;;  %v4603_v21 = vld [vmem:[#allocation9 + $0x364] ss:$24 sps:$4 sm:$0xff]   ;;  %v4605_v22 = vld [vmem:[#allocation9 + $0x60] ss:$24 sps:$4 sm:$0xff]  }
  0x6b   :  { %1932 = vmatprep.subr.bf16.mxu1 %v4585_v9  ;;  %v4606_v23 = vld [vmem:[#allocation9 + $0x360] ss:$24 sps:$4 sm:$0xff]   ;;  %v4607_v24 = vld [vmem:[#allocation9 + $0x34] ss:$24 sps:$4 sm:$0xff]   ;;  %v4611_v26 = vld [vmem:[#allocation9 + $0x30] ss:$24 sps:$4 sm:$0xff]  }
  0x6c   :  { %v4609_v25 = vld [vmem:[#allocation9 + $0x334] ss:$24 sps:$4 sm:$0xff]   ;;  %v4612_v27 = vld [vmem:[#allocation9 + $0x330] ss:$24 sps:$4 sm:$0xff]   ;;  %v4613_v28 = vld [vmem:[#allocation9 + $0x4] ss:$24 sps:$4 sm:$0xff]  }
  0x6d   :  { %1892 = vmatpush1.bf16.msra.mxu0 %v4587_v10  ;;  %v4615_v29 = vld [vmem:[#allocation9 + $0x304] ss:$24 sps:$4 sm:$0xff]   ;;  %v4617_v30 = vld [vmem:[#allocation9] ss:$24 sps:$4 sm:$0xff]   ;;  %v4619_v32 = vld [vmem:[#allocation9 + $0x2d4] ss:$24 sps:$4 sm:$0xff]  }
  0x6e   :  { %1933 = vmatpush1.bf16.msra.mxu1 %v4588_v11  ;;  %1893 = vmatprep.subr.bf16.mxu0 %v4589_v12  ;;  %v4618_v31 = vld [vmem:[#allocation9 + $0x300] ss:$24 sps:$4 sm:$0xff]   ;;  %v4621_v33 = vld [vmem:[#allocation9 + $0x5d4] ss:$24 sps:$4 sm:$0xff]   ;;  %v4623_v34 = vld [vmem:[#allocation9 + $0x2d0] ss:$24 sps:$4 sm:$0xff]  }
  0x6f   :  { %1934 = vmatprep.subr.bf16.mxu1 %v4591_v13  ;;  %v4624_v35 = vld [vmem:[#allocation9 + $0x5d0] ss:$24 sps:$4 sm:$0xff]   ;;  %v4625_v36 = vld [vmem:[#allocation9 + $0x2a4] ss:$24 sps:$4 sm:$0xff]   ;;  %v4629_v38 = vld [vmem:[#allocation9 + $0x2a0] ss:$24 sps:$4 sm:$0xff]  }
  0x70   :  { %v4627_v37 = vld [vmem:[#allocation9 + $0x5a4] ss:$24 sps:$4 sm:$0xff]   ;;  %v4630_v39 = vld [vmem:[#allocation9 + $0x5a0] ss:$24 sps:$4 sm:$0xff]   ;;  %v4631_v40 = vld [vmem:[#allocation9 + $0x274] ss:$24 sps:$4 sm:$0xff]  }
  0x71   :  { %1894 = vmatpush1.bf16.msra.mxu0 %v4593_v14  ;;  %v4633_v41 = vld [vmem:[#allocation9 + $0x574] ss:$24 sps:$4 sm:$0xff]   ;;  %v4635_v42 = vld [vmem:[#allocation9 + $0x270] ss:$24 sps:$4 sm:$0xff]   ;;  %v4637_v44 = vld [vmem:[#allocation9 + $0x244] ss:$24 sps:$4 sm:$0xff]  }
  0x72   :  { %1935 = vmatpush1.bf16.msra.mxu1 %v4594_v15  ;;  %1895 = vmatprep.subr.bf16.mxu0 %v4595_v16  ;;  %v4636_v43 = vld [vmem:[#allocation9 + $0x570] ss:$24 sps:$4 sm:$0xff]   ;;  %v4639_v45 = vld [vmem:[#allocation9 + $0x544] ss:$24 sps:$4 sm:$0xff]   ;;  %v4641_v47 = vld [vmem:[#allocation9 + $0x240] ss:$24 sps:$4 sm:$0xff]  }
  0x73   :  { %1936 = vmatprep.subr.bf16.mxu1 %v4597_v17  ;;  %v148_v46 = vld [vmem:[#allocation4 + $0x8] sm:$0xff]  ;;  %v4642_v48 = vld [vmem:[#allocation9 + $0x540] ss:$24 sps:$4 sm:$0xff]   ;;  %v4649_v56 = vld [vmem:[#allocation9 + $0x1e4] ss:$24 sps:$4 sm:$0xff]   ;;  %vm3904_vm0 = vcmask 7168  }
  0x74   :  { %v5415_v49 = vpack.c.bf16 %v148_v46, %v148_v46  ;;  %v150_v50 = vld [vmem:[#allocation4 + $0x18] sm:$0xff]  ;;  %v4643_v51 = vld [vmem:[#allocation9 + $0x214] ss:$24 sps:$4 sm:$0xff]   ;;  %v4647_v54 = vld [vmem:[#allocation9 + $0x210] ss:$24 sps:$4 sm:$0xff]  }
  0x75   :  { %1896 = vmatpush1.bf16.msra.mxu0 %v4599_v18  ;;  %v5417_v52 = vpack.c.bf16 %v150_v50, %v150_v50  ;;  %v4645_v53 = vld [vmem:[#allocation9 + $0x514] ss:$24 sps:$4 sm:$0xff]   ;;  %v4648_v55 = vld [vmem:[#allocation9 + $0x510] ss:$24 sps:$4 sm:$0xff]   ;;  %v4651_v57 = vld [vmem:[#allocation9 + $0x4e4] ss:$24 sps:$4 sm:$0xff]  }
  0x76   :  { %1937 = vmatpush1.bf16.msra.mxu1 %v4600_v19  ;;  %1897 = vmatprep.subr.bf16.mxu0 %v4601_v20  ;;  %v4653_v58 = vld [vmem:[#allocation9 + $0x1e0] ss:$24 sps:$4 sm:$0xff]   ;;  %v4655_v60 = vld [vmem:[#allocation9 + $0x1b4] ss:$24 sps:$4 sm:$0xff]   ;;  %v4659_v62 = vld [vmem:[#allocation9 + $0x1b0] ss:$24 sps:$4 sm:$0xff]  }
  0x77   :  { %1938 = vmatprep.subr.bf16.mxu1 %v4603_v21  ;;  %1919 = vmatprep.mubr.bf16.mxu0 %v5415_v49  ;;  %v4654_v59 = vld [vmem:[#allocation9 + $0x4e0] ss:$24 sps:$4 sm:$0xff]   ;;  %v4657_v61 = vld [vmem:[#allocation9 + $0x4b4] ss:$24 sps:$4 sm:$0xff]   ;;  %v4660_v63 = vld [vmem:[#allocation9 + $0x4b0] ss:$24 sps:$4 sm:$0xff]  }
  0x78   :  { %1960 = vmatprep.mubr.bf16.mxu1 %v5417_v52  ;;  %v4661_v0 = vld [vmem:[#allocation9 + $0x184] ss:$24 sps:$4 sm:$0xff]   ;;  %v4665_v2 = vld [vmem:[#allocation9 + $0x180] ss:$24 sps:$4 sm:$0xff]   ;;  %v149_v5 = vld [vmem:[#allocation4 + $0x10] sm:$0xff] }
  0x79   :  { %1898 = vmatpush1.bf16.msra.mxu0 %v4605_v22  ;;  %v4663_v1 = vld [vmem:[#allocation9 + $0x484] ss:$24 sps:$4 sm:$0xff]   ;;  %v4666_v3 = vld [vmem:[#allocation9 + $0x480] ss:$24 sps:$4 sm:$0xff]   ;;  %v4669_v6 = vld [vmem:[#allocation9 + $0x754] ss:$24 sps:$4 sm:$0xff]   ;;  %v5423_v9 = vpack.c.bf16 %v149_v5, %v149_v5 }
  0x7a   :  { %1939 = vmatpush1.bf16.msra.mxu1 %v4606_v23  ;;  %1899 = vmatprep.subr.bf16.mxu0 %v4607_v24  ;;  %v147_v4 = vld [vmem:[#allocation4] sm:$0xff]  ;;  %v4672_v7 = vld [vmem:[#allocation9 + $0x15c] ss:$24 sps:$4 sm:$0xff]   ;;  %v4667_v10 = vld [vmem:[#allocation9 + $0x750] ss:$24 sps:$4 sm:$0xff]  }
  0x7b   :  { %1940 = vmatprep.subr.bf16.mxu1 %v4609_v25  ;;  %v5421_v8 = vpack.c.bf16 %v147_v4, %v147_v4  ;;  %v4670_v11 = vld [vmem:[#allocation9 + $0x158] ss:$24 sps:$4 sm:$0xff]   ;;  %v4675_v12 = vld [vmem:[#allocation9 + $0x724] ss:$24 sps:$4 sm:$0xff]   ;;  %v4676_v15 = vld [vmem:[#allocation9 + $0x128] ss:$24 sps:$4 sm:$0xff]  }
  0x7c   :  { %v4678_v13 = vld [vmem:[#allocation9 + $0x12c] ss:$24 sps:$4 sm:$0xff]   ;;  %v4673_v14 = vld [vmem:[#allocation9 + $0x720] ss:$24 sps:$4 sm:$0xff]   ;;  %v4684_v17 = vld [vmem:[#allocation9 + $0xfc] ss:$24 sps:$4 sm:$0xff]  }
  0x7d   :  { %1900 = vmatpush1.bf16.msra.mxu0 %v4611_v26  ;;  %v4681_v16 = vld [vmem:[#allocation9 + $0x6f4] ss:$24 sps:$4 sm:$0xff]   ;;  %v4679_v18 = vld [vmem:[#allocation9 + $0x6f0] ss:$24 sps:$4 sm:$0xff]   ;;  %v4687_v20 = vld [vmem:[#allocation9 + $0x6c4] ss:$24 sps:$4 sm:$0xff]  }
  0x7e   :  { %1941 = vmatpush1.bf16.msra.mxu1 %v4612_v27  ;;  %1901 = vmatprep.subr.bf16.mxu0 %v4613_v28  ;;  %v4682_v19 = vld [vmem:[#allocation9 + $0xf8] ss:$24 sps:$4 sm:$0xff]   ;;  %v4690_v21 = vld [vmem:[#allocation9 + $0xcc] ss:$24 sps:$4 sm:$0xff]   ;;  %v4688_v23 = vld [vmem:[#allocation9 + $0xc8] ss:$24 sps:$4 sm:$0xff]  }
  0x7f   :  { %1942 = vmatprep.subr.bf16.mxu1 %v4615_v29  ;;  %v4685_v22 = vld [vmem:[#allocation9 + $0x6c0] ss:$24 sps:$4 sm:$0xff]   ;;  %v4693_v24 = vld [vmem:[#allocation9 + $0x694] ss:$24 sps:$4 sm:$0xff]   ;;  %v4691_v26 = vld [vmem:[#allocation9 + $0x690] ss:$24 sps:$4 sm:$0xff]  }
  0x80   :  { %v4696_v25 = vld [vmem:[#allocation9 + $0x9c] ss:$24 sps:$4 sm:$0xff]   ;;  %v4694_v27 = vld [vmem:[#allocation9 + $0x98] ss:$24 sps:$4 sm:$0xff]   ;;  %v4702_v29 = vld [vmem:[#allocation9 + $0x6c] ss:$24 sps:$4 sm:$0xff]  }
  0x81   :  { %1902 = vmatpush1.bf16.msra.mxu0 %v4617_v30  ;;  %v4699_v28 = vld [vmem:[#allocation9 + $0x664] ss:$24 sps:$4 sm:$0xff]   ;;  %v4697_v30 = vld [vmem:[#allocation9 + $0x660] ss:$24 sps:$4 sm:$0xff]   ;;  %v4753_v4 = vld [vmem:[#allocation9 + $0x7b4] ss:$24 sps:$4 sm:$0xff]  }
  0x82   :  { %1943 = vmatpush1.bf16.msra.mxu1 %v4618_v31  ;;  %1903 = vmatprep.subr.bf16.mxu0 %v4619_v32  ;;  %v4700_v31 = vld [vmem:[#allocation9 + $0x68] ss:$24 sps:$4 sm:$0xff]   ;;  %v4705_v32 = vld [vmem:[#allocation9 + $0x634] ss:$24 sps:$4 sm:$0xff]   ;;  %v4723_v46 = vld [vmem:[#allocation9 + $0x8a4] ss:$24 sps:$4 sm:$0xff]  }
  0x83   :  { %1944 = vmatprep.subr.bf16.mxu1 %v4621_v33  ;;  %v4708_v33 = vld [vmem:[#allocation9 + $0x3c] ss:$24 sps:$4 sm:$0xff]   ;;  %v4724_v50 = vld [vmem:[#allocation9 + $0x2a8] ss:$24 sps:$4 sm:$0xff]  }
  0x84   :  { %v4756_v5 = vld [vmem:[#allocation9 + $0x1bc] ss:$24 sps:$4 sm:$0xff]  }
  0x85   :  { %1904 = vmatpush2.bf16.msra.mxu0 %v4623_v34  ;;  %v152_v34 = vld [vmem:[#allocation4 + $0x28] sm:$0xff] }
  0x86   :  { %1945 = vmatpush2.bf16.msra.mxu1 %v4624_v35  ;;  %1905 = vmatprep.subr.bf16.mxu0 %v4625_v36  ;;  %v5428_v35 = vpack.c.bf16 %v152_v34, %v152_v34  ;;  %v4703_v36 = vld [vmem:[#allocation9 + $0x630] ss:$24 sps:$4 sm:$0xff]  }
  0x87   :  { %1946 = vmatprep.subr.bf16.mxu1 %v4627_v37  ;;  %v4706_v37 = vld [vmem:[#allocation9 + $0x38] ss:$24 sps:$4 sm:$0xff]  }
  0x88   :  { %v4787_v34 = vld [vmem:[#allocation9 + $0x398] ss:$24 sps:$4 sm:$0xff]  }
  0x89   :  { %1906 = vmatpush2.bf16.msra.mxu0 %v4629_v38  ;;  %v4711_v38 = vld [vmem:[#allocation9 + $0x604] ss:$24 sps:$4 sm:$0xff]  }
  0x8a   :  { %1947 = vmatpush2.bf16.msra.mxu1 %v4630_v39  ;;  %1907 = vmatprep.subr.bf16.mxu0 %v4631_v40  ;;  %v4714_v39 = vld [vmem:[#allocation9 + $0xc] ss:$24 sps:$4 sm:$0xff]   ;;  %v4709_v40 = vld [vmem:[#allocation9 + $0x600] ss:$24 sps:$4 sm:$0xff]  }
  0x8b   :  { %1948 = vmatprep.subr.bf16.mxu1 %v4633_v41  ;;  %v4712_v41 = vld [vmem:[#allocation9 + $0x8] ss:$24 sps:$4 sm:$0xff]  }
  0x8d   :  { %1908 = vmatpush2.bf16.msra.mxu0 %v4635_v42  ;;  %v4717_v42 = vld [vmem:[#allocation9 + $0x8d4] ss:$24 sps:$4 sm:$0xff]  }
  0x8e   :  { %1949 = vmatpush2.bf16.msra.mxu1 %v4636_v43  ;;  %1909 = vmatprep.subr.bf16.mxu0 %v4637_v44  ;;  %v4720_v43 = vld [vmem:[#allocation9 + $0x2dc] ss:$24 sps:$4 sm:$0xff]   ;;  %v4715_v44 = vld [vmem:[#allocation9 + $0x8d0] ss:$24 sps:$4 sm:$0xff]  }
  0x8f   :  { %1950 = vmatprep.subr.bf16.mxu1 %v4639_v45  ;;  %v4718_v45 = vld [vmem:[#allocation9 + $0x2d8] ss:$24 sps:$4 sm:$0xff]  }
  0x91   :  { %1910 = vmatpush2.bf16.msra.mxu0 %v4641_v47  ;;  %v4726_v47 = vld [vmem:[#allocation9 + $0x2ac] ss:$24 sps:$4 sm:$0xff]  }
  0x92   :  { %1951 = vmatpush2.bf16.msra.mxu1 %v4642_v48  ;;  %1911 = vmatprep.subr.bf16.mxu0 %v4643_v51  ;;  %v4721_v48 = vld [vmem:[#allocation9 + $0x8a0] ss:$24 sps:$4 sm:$0xff]   ;;  %v4729_v51 = vld [vmem:[#allocation9 + $0x874] ss:$24 sps:$4 sm:$0xff]  }
  0x93   :  { %1952 = vmatprep.subr.bf16.mxu1 %v4645_v53  ;;  %v4732_v53 = vld [vmem:[#allocation9 + $0x27c] ss:$24 sps:$4 sm:$0xff]  }
  0x95   :  { %1912 = vmatpush2.bf16.msra.mxu0 %v4647_v54  ;;  %v4727_v54 = vld [vmem:[#allocation9 + $0x870] ss:$24 sps:$4 sm:$0xff]  }
  0x96   :  { %1953 = vmatpush2.bf16.msra.mxu1 %v4648_v55  ;;  %1913 = vmatprep.subr.bf16.mxu0 %v4649_v56  ;;  %v4730_v55 = vld [vmem:[#allocation9 + $0x278] ss:$24 sps:$4 sm:$0xff]   ;;  %v4735_v56 = vld [vmem:[#allocation9 + $0x844] ss:$24 sps:$4 sm:$0xff]  }
  0x97   :  { %1954 = vmatprep.subr.bf16.mxu1 %v4651_v57  ;;  %v4738_v57 = vld [vmem:[#allocation9 + $0x24c] ss:$24 sps:$4 sm:$0xff]  }
  0x99   :  { %1914 = vmatpush2.bf16.msra.mxu0 %v4653_v58  ;;  %v4733_v58 = vld [vmem:[#allocation9 + $0x840] ss:$24 sps:$4 sm:$0xff]  }
  0x9a   :  { %1955 = vmatpush2.bf16.msra.mxu1 %v4654_v59  ;;  %1915 = vmatprep.subr.bf16.mxu0 %v4655_v60  ;;  %v4736_v59 = vld [vmem:[#allocation9 + $0x248] ss:$24 sps:$4 sm:$0xff]   ;;  %v4741_v60 = vld [vmem:[#allocation9 + $0x814] ss:$24 sps:$4 sm:$0xff]  }
  0x9b   :  { %1956 = vmatprep.subr.bf16.mxu1 %v4657_v61  ;;  %v4744_v61 = vld [vmem:[#allocation9 + $0x21c] ss:$24 sps:$4 sm:$0xff]  }
  0x9d   :  { %1916 = vmatpush2.bf16.msra.mxu0 %v4659_v62  ;;  %v4739_v62 = vld [vmem:[#allocation9 + $0x810] ss:$24 sps:$4 sm:$0xff]  }
  0x9e   :  { %1957 = vmatpush2.bf16.msra.mxu1 %v4660_v63  ;;  %1917 = vmatprep.subr.bf16.mxu0 %v4661_v0  ;;  %v4742_v63 = vld [vmem:[#allocation9 + $0x218] ss:$24 sps:$4 sm:$0xff]   ;;  %v4747_v0 = vld [vmem:[#allocation9 + $0x7e4] ss:$24 sps:$4 sm:$0xff]  }
  0x9f   :  { %1958 = vmatprep.subr.bf16.mxu1 %v4663_v1  ;;  %v4750_v1 = vld [vmem:[#allocation9 + $0x1ec] ss:$24 sps:$4 sm:$0xff]  }
  0xa1   :  { %1918 = vmatpush2.bf16.msra.mxu0 %v4665_v2  ;;  %v4745_v2 = vld [vmem:[#allocation9 + $0x7e0] ss:$24 sps:$4 sm:$0xff]  }
  0xa2   :  { %1959 = vmatpush2.bf16.msra.mxu1 %v4666_v3  ;;  %1969 = vmatprep.subr.bf16.mxu0 %v4669_v6  ;;  %v4748_v3 = vld [vmem:[#allocation9 + $0x1e8] ss:$24 sps:$4 sm:$0xff]  }
  0xa3   :  { %2010 = vmatprep.subr.bf16.mxu1 %v4672_v7  ;;  %v4751_v6 = vld [vmem:[#allocation9 + $0x7b0] ss:$24 sps:$4 sm:$0xff]  }
  0xa4   :  { %1920 = vmatmul.mubr.bf16.vlgmr.msra.gmra.mxu0 %v5421_v8  ;;  %v4754_v7 = vld [vmem:[#allocation9 + $0x1b8] ss:$24 sps:$4 sm:$0xff]  }
  0xa5   :  { %1961 = vmatmul.mubr.bf16.vlgmr.msra.gmra.mxu1 %v5423_v9  ;;  %1970 = vmatpush1.bf16.msra.mxu0 %v4667_v10  ;;  %v4759_v10 = vld [vmem:[#allocation9 + $0x784] ss:$24 sps:$4 sm:$0xff]  }
  0xa6   :  { %2011 = vmatpush1.bf16.msra.mxu1 %v4670_v11  ;;  %1971 = vmatprep.subr.bf16.mxu0 %v4675_v12  ;;  %v4762_v11 = vld [vmem:[#allocation9 + $0x18c] ss:$24 sps:$4 sm:$0xff]   ;;  %v4757_v12 = vld [vmem:[#allocation9 + $0x780] ss:$24 sps:$4 sm:$0xff]  }
  0xa7   :  { %2012 = vmatprep.subr.bf16.mxu1 %v4678_v13  ;;  %2042 = vmatprep.mubr.bf16.mxu1 %v5415_v49  ;;  %v4760_v13 = vld [vmem:[#allocation9 + $0x188] ss:$24 sps:$4 sm:$0xff]  }
  0xa8   :  { %2001 = vmatprep.mubr.bf16.mxu0 %v5428_v35 }
  0xa9   :  { %1972 = vmatpush1.bf16.msra.mxu0 %v4673_v14  ;;  %v151_v14 = vld [vmem:[#allocation4 + $0x20] sm:$0xff] }
  0xaa   :  { %2013 = vmatpush1.bf16.msra.mxu1 %v4676_v15  ;;  %1973 = vmatprep.subr.bf16.mxu0 %v4681_v16  ;;  %v4765_v15 = vld [vmem:[#allocation9 + $0x45c] ss:$24 sps:$4 sm:$0xff]  }
  0xab   :  { %2014 = vmatprep.subr.bf16.mxu1 %v4684_v17  ;;  %v4768_v16 = vld [vmem:[#allocation9 + $0x75c] ss:$24 sps:$4 sm:$0xff]   ;;  %v5431_v17 = vpack.c.bf16 %v151_v14, %v151_v14 }
  0xac   :  { %v4852_v14 = vld [vmem:[#allocation9 + $0x7bc] ss:$24 sps:$4 sm:$0xff]  }
  0xad   :  { %1974 = vmatpush1.bf16.msra.mxu0 %v4679_v18  ;;  %v4763_v18 = vld [vmem:[#allocation9 + $0x458] ss:$24 sps:$4 sm:$0xff]  }
  0xae   :  { %2015 = vmatpush1.bf16.msra.mxu1 %v4682_v19  ;;  %1975 = vmatprep.subr.bf16.mxu0 %v4687_v20  ;;  %v4766_v19 = vld [vmem:[#allocation9 + $0x758] ss:$24 sps:$4 sm:$0xff]   ;;  %v4771_v20 = vld [vmem:[#allocation9 + $0x42c] ss:$24 sps:$4 sm:$0xff]  }
  0xaf   :  { %2016 = vmatprep.subr.bf16.mxu1 %v4690_v21  ;;  %v4774_v21 = vld [vmem:[#allocation9 + $0x72c] ss:$24 sps:$4 sm:$0xff]  }
  0xb1   :  { %1976 = vmatpush1.bf16.msra.mxu0 %v4685_v22  ;;  %v4769_v22 = vld [vmem:[#allocation9 + $0x428] ss:$24 sps:$4 sm:$0xff]  }
  0xb2   :  { %2017 = vmatpush1.bf16.msra.mxu1 %v4688_v23  ;;  %1977 = vmatprep.subr.bf16.mxu0 %v4693_v24  ;;  %v4772_v23 = vld [vmem:[#allocation9 + $0x728] ss:$24 sps:$4 sm:$0xff]   ;;  %v4777_v24 = vld [vmem:[#allocation9 + $0x3fc] ss:$24 sps:$4 sm:$0xff]  }
  0xb3   :  { %2018 = vmatprep.subr.bf16.mxu1 %v4696_v25  ;;  %v4780_v25 = vld [vmem:[#allocation9 + $0x6fc] ss:$24 sps:$4 sm:$0xff]  }
  0xb5   :  { %1978 = vmatpush1.bf16.msra.mxu0 %v4691_v26  ;;  %v4775_v26 = vld [vmem:[#allocation9 + $0x3f8] ss:$24 sps:$4 sm:$0xff]  }
  0xb6   :  { %2019 = vmatpush1.bf16.msra.mxu1 %v4694_v27  ;;  %1979 = vmatprep.subr.bf16.mxu0 %v4699_v28  ;;  %v4778_v27 = vld [vmem:[#allocation9 + $0x6f8] ss:$24 sps:$4 sm:$0xff]   ;;  %v4783_v28 = vld [vmem:[#allocation9 + $0x3cc] ss:$24 sps:$4 sm:$0xff]  }
  0xb7   :  { %2020 = vmatprep.subr.bf16.mxu1 %v4702_v29  ;;  %v4786_v29 = vld [vmem:[#allocation9 + $0x6cc] ss:$24 sps:$4 sm:$0xff]  }
  0xb9   :  { %1980 = vmatpush1.bf16.msra.mxu0 %v4697_v30  ;;  %v4781_v30 = vld [vmem:[#allocation9 + $0x3c8] ss:$24 sps:$4 sm:$0xff]  }
  0xba   :  { %2021 = vmatpush1.bf16.msra.mxu1 %v4700_v31  ;;  %1981 = vmatprep.subr.bf16.mxu0 %v4705_v32  ;;  %v4784_v31 = vld [vmem:[#allocation9 + $0x6c8] ss:$24 sps:$4 sm:$0xff]   ;;  %v4789_v32 = vld [vmem:[#allocation9 + $0x39c] ss:$24 sps:$4 sm:$0xff]  }
  0xbb   :  { %2022 = vmatprep.subr.bf16.mxu1 %v4708_v33  ;;  %v4792_v33 = vld [vmem:[#allocation9 + $0x69c] ss:$24 sps:$4 sm:$0xff]  }
  0xbd   :  { %1982 = vmatpush1.bf16.msra.mxu0 %v4703_v36  ;;  %v4790_v36 = vld [vmem:[#allocation9 + $0x698] ss:$24 sps:$4 sm:$0xff]  }
  0xbe   :  { %2023 = vmatpush1.bf16.msra.mxu1 %v4706_v37  ;;  %1983 = vmatprep.subr.bf16.mxu0 %v4711_v38  ;;  %v4795_v37 = vld [vmem:[#allocation9 + $0x36c] ss:$24 sps:$4 sm:$0xff]  }
  0xbf   :  { %2024 = vmatprep.subr.bf16.mxu1 %v4714_v39  ;;  %v4798_v38 = vld [vmem:[#allocation9 + $0x66c] ss:$24 sps:$4 sm:$0xff]   ;;  %v4793_v39 = vld [vmem:[#allocation9 + $0x368] ss:$24 sps:$4 sm:$0xff]  }
  0xc1   :  { %1984 = vmatpush1.bf16.msra.mxu0 %v4709_v40  ;;  %v4796_v40 = vld [vmem:[#allocation9 + $0x668] ss:$24 sps:$4 sm:$0xff]  }
  0xc2   :  { %2025 = vmatpush1.bf16.msra.mxu1 %v4712_v41  ;;  %1985 = vmatprep.subr.bf16.mxu0 %v4717_v42  ;;  %v4801_v41 = vld [vmem:[#allocation9 + $0x33c] ss:$24 sps:$4 sm:$0xff]  }
  0xc3   :  { %2026 = vmatprep.subr.bf16.mxu1 %v4720_v43  ;;  %v4804_v42 = vld [vmem:[#allocation9 + $0x63c] ss:$24 sps:$4 sm:$0xff]   ;;  %v4799_v43 = vld [vmem:[#allocation9 + $0x338] ss:$24 sps:$4 sm:$0xff]  }
  0xc5   :  { %1986 = vmatpush2.bf16.msra.mxu0 %v4715_v44  ;;  %v4802_v44 = vld [vmem:[#allocation9 + $0x638] ss:$24 sps:$4 sm:$0xff]  }
  0xc6   :  { %2027 = vmatpush2.bf16.msra.mxu1 %v4718_v45  ;;  %1987 = vmatprep.subr.bf16.mxu0 %v4723_v46  ;;  %v4807_v45 = vld [vmem:[#allocation9 + $0x30c] ss:$24 sps:$4 sm:$0xff]  }
  0xc7   :  { %2028 = vmatprep.subr.bf16.mxu1 %v4726_v47  ;;  %v4810_v46 = vld [vmem:[#allocation9 + $0x60c] ss:$24 sps:$4 sm:$0xff]   ;;  %v4805_v47 = vld [vmem:[#allocation9 + $0x308] ss:$24 sps:$4 sm:$0xff]  }
  0xc9   :  { %1988 = vmatpush2.bf16.msra.mxu0 %v4721_v48  ;;  %v4808_v48 = vld [vmem:[#allocation9 + $0x608] ss:$24 sps:$4 sm:$0xff]  }
  0xca   :  { %2029 = vmatpush2.bf16.msra.mxu1 %v4724_v50  ;;  %1989 = vmatprep.subr.bf16.mxu0 %v4729_v51  ;;  %v4813_v50 = vld [vmem:[#allocation9 + $0x5dc] ss:$24 sps:$4 sm:$0xff]  }
  0xcb   :  { %2030 = vmatprep.subr.bf16.mxu1 %v4732_v53  ;;  %v4816_v51 = vld [vmem:[#allocation9 + $0x8dc] ss:$24 sps:$4 sm:$0xff]   ;;  %v4811_v53 = vld [vmem:[#allocation9 + $0x5d8] ss:$24 sps:$4 sm:$0xff]  }
  0xcd   :  { %1990 = vmatpush2.bf16.msra.mxu0 %v4727_v54  ;;  %v4814_v54 = vld [vmem:[#allocation9 + $0x8d8] ss:$24 sps:$4 sm:$0xff]  }
  0xce   :  { %2031 = vmatpush2.bf16.msra.mxu1 %v4730_v55  ;;  %1991 = vmatprep.subr.bf16.mxu0 %v4735_v56  ;;  %v4819_v55 = vld [vmem:[#allocation9 + $0x5ac] ss:$24 sps:$4 sm:$0xff]  }
  0xcf   :  { %2032 = vmatprep.subr.bf16.mxu1 %v4738_v57  ;;  %v4822_v56 = vld [vmem:[#allocation9 + $0x8ac] ss:$24 sps:$4 sm:$0xff]   ;;  %v4817_v57 = vld [vmem:[#allocation9 + $0x5a8] ss:$24 sps:$4 sm:$0xff]  }
  0xd1   :  { %1992 = vmatpush2.bf16.msra.mxu0 %v4733_v58  ;;  %v4820_v58 = vld [vmem:[#allocation9 + $0x8a8] ss:$24 sps:$4 sm:$0xff]  }
  0xd2   :  { %2033 = vmatpush2.bf16.msra.mxu1 %v4736_v59  ;;  %1993 = vmatprep.subr.bf16.mxu0 %v4741_v60  ;;  %v4825_v59 = vld [vmem:[#allocation9 + $0x57c] ss:$24 sps:$4 sm:$0xff]  }
  0xd3   :  { %2034 = vmatprep.subr.bf16.mxu1 %v4744_v61  ;;  %v4828_v60 = vld [vmem:[#allocation9 + $0x87c] ss:$24 sps:$4 sm:$0xff]   ;;  %v4823_v61 = vld [vmem:[#allocation9 + $0x578] ss:$24 sps:$4 sm:$0xff]  }
  0xd5   :  { %1994 = vmatpush2.bf16.msra.mxu0 %v4739_v62  ;;  %v4826_v62 = vld [vmem:[#allocation9 + $0x878] ss:$24 sps:$4 sm:$0xff]  }
  0xd6   :  { %2035 = vmatpush2.bf16.msra.mxu1 %v4742_v63  ;;  %1995 = vmatprep.subr.bf16.mxu0 %v4747_v0  ;;  %v4831_v63 = vld [vmem:[#allocation9 + $0x54c] ss:$24 sps:$4 sm:$0xff]  }
  0xd7   :  { %2036 = vmatprep.subr.bf16.mxu1 %v4750_v1  ;;  %v4834_v0 = vld [vmem:[#allocation9 + $0x84c] ss:$24 sps:$4 sm:$0xff]   ;;  %v4829_v1 = vld [vmem:[#allocation9 + $0x548] ss:$24 sps:$4 sm:$0xff]  }
  0xd9   :  { %1996 = vmatpush2.bf16.msra.mxu0 %v4745_v2  ;;  %v4832_v2 = vld [vmem:[#allocation9 + $0x848] ss:$24 sps:$4 sm:$0xff]  }
  0xda   :  { %2037 = vmatpush2.bf16.msra.mxu1 %v4748_v3  ;;  %1997 = vmatprep.subr.bf16.mxu0 %v4753_v4  ;;  %v4837_v3 = vld [vmem:[#allocation9 + $0x51c] ss:$24 sps:$4 sm:$0xff]  }
  0xdb   :  { %2038 = vmatprep.subr.bf16.mxu1 %v4756_v5  ;;  %v4840_v4 = vld [vmem:[#allocation9 + $0x81c] ss:$24 sps:$4 sm:$0xff]   ;;  %v4835_v5 = vld [vmem:[#allocation9 + $0x518] ss:$24 sps:$4 sm:$0xff]  }
  0xdd   :  { %1998 = vmatpush2.bf16.msra.mxu0 %v4751_v6  ;;  %v4838_v6 = vld [vmem:[#allocation9 + $0x818] ss:$24 sps:$4 sm:$0xff]  }
  0xde   :  { %2039 = vmatpush2.bf16.msra.mxu1 %v4754_v7  ;;  %1999 = vmatprep.subr.bf16.mxu0 %v4759_v10  ;;  %v4843_v7 = vld [vmem:[#allocation9 + $0x4ec] ss:$24 sps:$4 sm:$0xff]  }
  0xdf   :  { %2040 = vmatprep.subr.bf16.mxu1 %v4762_v11  ;;  %v4846_v10 = vld [vmem:[#allocation9 + $0x7ec] ss:$24 sps:$4 sm:$0xff]   ;;  %v4841_v11 = vld [vmem:[#allocation9 + $0x4e8] ss:$24 sps:$4 sm:$0xff]  }
  0xe1   :  { %2000 = vmatpush2.bf16.msra.mxu0 %v4757_v12  ;;  %v4844_v12 = vld [vmem:[#allocation9 + $0x7e8] ss:$24 sps:$4 sm:$0xff]  }
  0xe2   :  { %2041 = vmatpush2.bf16.msra.mxu1 %v4760_v13  ;;  %2051 = vmatprep.subr.bf16.mxu0 %v4765_v15  ;;  %v4849_v13 = vld [vmem:[#allocation9 + $0x4bc] ss:$24 sps:$4 sm:$0xff]   ;;  %v4847_v15 = vld [vmem:[#allocation9 + $0x4b8] ss:$24 sps:$4 sm:$0xff]  }
  0xe3   :  { %2092 = vmatprep.subr.bf16.mxu1 %v4768_v16  ;;  %v4850_v16 = vld [vmem:[#allocation9 + $0x7b8] ss:$24 sps:$4 sm:$0xff]  }
  0xe4   :  { %2002 = vmatmul.mubr.bf16.vlgmr.msra.gmra.mxu0 %v5431_v17 }
  0xe5   :  { %2043 = vmatmul.mubr.bf16.vlgmr.msra.gmra.mxu1 %v5421_v8  ;;  %2052 = vmatpush1.bf16.msra.mxu0 %v4763_v18  ;;  %v4855_v18 = vld [vmem:[#allocation9 + $0x48c] ss:$24 sps:$4 sm:$0xff]  }
  0xe6   :  { %2093 = vmatpush1.bf16.msra.mxu1 %v4766_v19  ;;  %2053 = vmatprep.subr.bf16.mxu0 %v4771_v20  ;;  %v4858_v19 = vld [vmem:[#allocation9 + $0x78c] ss:$24 sps:$4 sm:$0xff]   ;;  %v4853_v20 = vld [vmem:[#allocation9 + $0x488] ss:$24 sps:$4 sm:$0xff]  }
  0xe7   :  { %2094 = vmatprep.subr.bf16.mxu1 %v4774_v21  ;;  %2083 = vmatprep.mubr.bf16.mxu0 %v5417_v52  ;;  %v4856_v21 = vld [vmem:[#allocation9 + $0x788] ss:$24 sps:$4 sm:$0xff]  }
  0xe8   :  { %2124 = vmatprep.mubr.bf16.mxu1 %v5428_v35 }
  0xe9   :  { %2054 = vmatpush1.bf16.msra.mxu0 %v4769_v22  ;;  %v4861_v22 = vld [vmem:[#allocation9 + $0x164] ss:$24 sps:$4 sm:$0xff]  }
  0xea   :  { %2095 = vmatpush1.bf16.msra.mxu1 %v4772_v23  ;;  %2055 = vmatprep.subr.bf16.mxu0 %v4777_v24  ;;  %v4864_v23 = vld [vmem:[#allocation9 + $0x464] ss:$24 sps:$4 sm:$0xff]   ;;  %v4859_v24 = vld [vmem:[#allocation9 + $0x160] ss:$24 sps:$4 sm:$0xff]  }
  0xeb   :  { %2096 = vmatprep.subr.bf16.mxu1 %v4780_v25  ;;  %v4862_v25 = vld [vmem:[#allocation9 + $0x460] ss:$24 sps:$4 sm:$0xff]  }
  0xed   :  { %2056 = vmatpush1.bf16.msra.mxu0 %v4775_v26  ;;  %v4867_v26 = vld [vmem:[#allocation9 + $0x134] ss:$24 sps:$4 sm:$0xff]  }
  0xee   :  { %2097 = vmatpush1.bf16.msra.mxu1 %v4778_v27  ;;  %2057 = vmatprep.subr.bf16.mxu0 %v4783_v28  ;;  %v4870_v27 = vld [vmem:[#allocation9 + $0x434] ss:$24 sps:$4 sm:$0xff]   ;;  %v4865_v28 = vld [vmem:[#allocation9 + $0x130] ss:$24 sps:$4 sm:$0xff]  }
  0xef   :  { %2098 = vmatprep.subr.bf16.mxu1 %v4786_v29  ;;  %v4868_v29 = vld [vmem:[#allocation9 + $0x430] ss:$24 sps:$4 sm:$0xff]  }
  0xf1   :  { %2058 = vmatpush1.bf16.msra.mxu0 %v4781_v30  ;;  %v4873_v30 = vld [vmem:[#allocation9 + $0x104] ss:$24 sps:$4 sm:$0xff]  }
  0xf2   :  { %2099 = vmatpush1.bf16.msra.mxu1 %v4784_v31  ;;  %2059 = vmatprep.subr.bf16.mxu0 %v4789_v32  ;;  %v4876_v31 = vld [vmem:[#allocation9 + $0x404] ss:$24 sps:$4 sm:$0xff]   ;;  %v4871_v32 = vld [vmem:[#allocation9 + $0x100] ss:$24 sps:$4 sm:$0xff]  }
  0xf3   :  { %2100 = vmatprep.subr.bf16.mxu1 %v4792_v33  ;;  %v4874_v33 = vld [vmem:[#allocation9 + $0x400] ss:$24 sps:$4 sm:$0xff]  }
  0xf5   :  { %2060 = vmatpush1.bf16.msra.mxu0 %v4787_v34  ;;  %v4879_v34 = vld [vmem:[#allocation9 + $0xd4] ss:$24 sps:$4 sm:$0xff]  }
  0xf6   :  { %2101 = vmatpush1.bf16.msra.mxu1 %v4790_v36  ;;  %2061 = vmatprep.subr.bf16.mxu0 %v4795_v37  ;;  %v4882_v36 = vld [vmem:[#allocation9 + $0x3d4] ss:$24 sps:$4 sm:$0xff]   ;;  %v4877_v37 = vld [vmem:[#allocation9 + $0xd0] ss:$24 sps:$4 sm:$0xff]  }
  0xf7   :  { %2102 = vmatprep.subr.bf16.mxu1 %v4798_v38  ;;  %v4880_v38 = vld [vmem:[#allocation9 + $0x3d0] ss:$24 sps:$4 sm:$0xff]  }
  0xf9   :  { %2062 = vmatpush1.bf16.msra.mxu0 %v4793_v39  ;;  %v4885_v39 = vld [vmem:[#allocation9 + $0xa4] ss:$24 sps:$4 sm:$0xff]  }
  0xfa   :  { %2103 = vmatpush1.bf16.msra.mxu1 %v4796_v40  ;;  %2063 = vmatprep.subr.bf16.mxu0 %v4801_v41  ;;  %v4888_v40 = vld [vmem:[#allocation9 + $0x3a4] ss:$24 sps:$4 sm:$0xff]   ;;  %v4883_v41 = vld [vmem:[#allocation9 + $0xa0] ss:$24 sps:$4 sm:$0xff]  }
  0xfb   :  { %2104 = vmatprep.subr.bf16.mxu1 %v4804_v42  ;;  %v4894_v42 = vld [vmem:[#allocation9 + $0x374] ss:$24 sps:$4 sm:$0xff]  }
  0xfd   :  { %2064 = vmatpush1.bf16.msra.mxu0 %v4799_v43  ;;  %v4889_v43 = vld [vmem:[#allocation9 + $0x70] ss:$24 sps:$4 sm:$0xff]  }
  0xfe   :  { %2105 = vmatpush1.bf16.msra.mxu1 %v4802_v44  ;;  %2065 = vmatprep.subr.bf16.mxu0 %v4807_v45  ;;  %v4892_v44 = vld [vmem:[#allocation9 + $0x370] ss:$24 sps:$4 sm:$0xff]   ;;  %v4897_v45 = vld [vmem:[#allocation9 + $0x44] ss:$24 sps:$4 sm:$0xff]  }
  0xff   :  { %2106 = vmatprep.subr.bf16.mxu1 %v4810_v46  ;;  %v4900_v46 = vld [vmem:[#allocation9 + $0x344] ss:$24 sps:$4 sm:$0xff]  }
 0x101   :  { %2066 = vmatpush1.bf16.msra.mxu0 %v4805_v47  ;;  %v4895_v47 = vld [vmem:[#allocation9 + $0x40] ss:$24 sps:$4 sm:$0xff]  }
 0x102   :  { %2107 = vmatpush1.bf16.msra.mxu1 %v4808_v48  ;;  %2067 = vmatprep.subr.bf16.mxu0 %v4813_v50  ;;  %v4898_v48 = vld [vmem:[#allocation9 + $0x340] ss:$24 sps:$4 sm:$0xff]   ;;  %v4903_v50 = vld [vmem:[#allocation9 + $0x14] ss:$24 sps:$4 sm:$0xff]  }
 0x103   :  { %2108 = vmatprep.subr.bf16.mxu1 %v4816_v51  ;;  %v4906_v51 = vld [vmem:[#allocation9 + $0x314] ss:$24 sps:$4 sm:$0xff]  }
 0x105   :  { %2068 = vmatpush2.bf16.msra.mxu0 %v4811_v53  ;;  %v4901_v53 = vld [vmem:[#allocation9 + $0x10] ss:$24 sps:$4 sm:$0xff]  }
 0x106   :  { %2109 = vmatpush2.bf16.msra.mxu1 %v4814_v54  ;;  %2069 = vmatprep.subr.bf16.mxu0 %v4819_v55  ;;  %v4904_v54 = vld [vmem:[#allocation9 + $0x310] ss:$24 sps:$4 sm:$0xff]   ;;  %v4909_v55 = vld [vmem:[#allocation9 + $0x2e4] ss:$24 sps:$4 sm:$0xff]  }
 0x107   :  { %2110 = vmatprep.subr.bf16.mxu1 %v4822_v56  ;;  %v4912_v56 = vld [vmem:[#allocation9 + $0x5e4] ss:$24 sps:$4 sm:$0xff]  }
 0x109   :  { %2070 = vmatpush2.bf16.msra.mxu0 %v4817_v57  ;;  %v4907_v57 = vld [vmem:[#allocation9 + $0x2e0] ss:$24 sps:$4 sm:$0xff]  }
 0x10a   :  { %2111 = vmatpush2.bf16.msra.mxu1 %v4820_v58  ;;  %2071 = vmatprep.subr.bf16.mxu0 %v4825_v59  ;;  %v4910_v58 = vld [vmem:[#allocation9 + $0x5e0] ss:$24 sps:$4 sm:$0xff]   ;;  %v4915_v59 = vld [vmem:[#allocation9 + $0x2b4] ss:$24 sps:$4 sm:$0xff]  }
 0x10b   :  { %2112 = vmatprep.subr.bf16.mxu1 %v4828_v60  ;;  %v4918_v60 = vld [vmem:[#allocation9 + $0x5b4] ss:$24 sps:$4 sm:$0xff]  }
 0x10d   :  { %2072 = vmatpush2.bf16.msra.mxu0 %v4823_v61  ;;  %v4913_v61 = vld [vmem:[#allocation9 + $0x2b0] ss:$24 sps:$4 sm:$0xff]  }
 0x10e   :  { %2113 = vmatpush2.bf16.msra.mxu1 %v4826_v62  ;;  %2073 = vmatprep.subr.bf16.mxu0 %v4831_v63  ;;  %v4916_v62 = vld [vmem:[#allocation9 + $0x5b0] ss:$24 sps:$4 sm:$0xff]   ;;  %v4921_v63 = vld [vmem:[#allocation9 + $0x284] ss:$24 sps:$4 sm:$0xff]  }
 0x10f   :  { %2114 = vmatprep.subr.bf16.mxu1 %v4834_v0  ;;  %v4924_v0 = vld [vmem:[#allocation9 + $0x584] ss:$24 sps:$4 sm:$0xff]  }
 0x111   :  { %2074 = vmatpush2.bf16.msra.mxu0 %v4829_v1  ;;  %v4919_v1 = vld [vmem:[#allocation9 + $0x280] ss:$24 sps:$4 sm:$0xff]  }
 0x112   :  { %2115 = vmatpush2.bf16.msra.mxu1 %v4832_v2  ;;  %2075 = vmatprep.subr.bf16.mxu0 %v4837_v3  ;;  %v4922_v2 = vld [vmem:[#allocation9 + $0x580] ss:$24 sps:$4 sm:$0xff]   ;;  %v4927_v3 = vld [vmem:[#allocation9 + $0x254] ss:$24 sps:$4 sm:$0xff]  }
 0x113   :  { %2116 = vmatprep.subr.bf16.mxu1 %v4840_v4  ;;  %v4930_v4 = vld [vmem:[#allocation9 + $0x554] ss:$24 sps:$4 sm:$0xff]  }
 0x115   :  { %2076 = vmatpush2.bf16.msra.mxu0 %v4835_v5  ;;  %v4925_v5 = vld [vmem:[#allocation9 + $0x250] ss:$24 sps:$4 sm:$0xff]  }
 0x116   :  { %2117 = vmatpush2.bf16.msra.mxu1 %v4838_v6  ;;  %2077 = vmatprep.subr.bf16.mxu0 %v4843_v7  ;;  %v4928_v6 = vld [vmem:[#allocation9 + $0x550] ss:$24 sps:$4 sm:$0xff]   ;;  %v4933_v7 = vld [vmem:[#allocation9 + $0x224] ss:$24 sps:$4 sm:$0xff]  }
 0x117   :  { %2118 = vmatprep.subr.bf16.mxu1 %v4846_v10  ;;  %v4936_v10 = vld [vmem:[#allocation9 + $0x524] ss:$24 sps:$4 sm:$0xff]  }
 0x119   :  { %2078 = vmatpush2.bf16.msra.mxu0 %v4841_v11  ;;  %v4931_v11 = vld [vmem:[#allocation9 + $0x220] ss:$24 sps:$4 sm:$0xff]  }
 0x11a   :  { %2119 = vmatpush2.bf16.msra.mxu1 %v4844_v12  ;;  %2079 = vmatprep.subr.bf16.mxu0 %v4849_v13  ;;  %v4934_v12 = vld [vmem:[#allocation9 + $0x520] ss:$24 sps:$4 sm:$0xff]   ;;  %v4939_v13 = vld [vmem:[#allocation9 + $0x1f4] ss:$24 sps:$4 sm:$0xff]  }
 0x11b   :  { %2120 = vmatprep.subr.bf16.mxu1 %v4852_v14  ;;  %v4942_v14 = vld [vmem:[#allocation9 + $0x4f4] ss:$24 sps:$4 sm:$0xff]  }
 0x11d   :  { %2080 = vmatpush2.bf16.msra.mxu0 %v4847_v15  ;;  %v4937_v15 = vld [vmem:[#allocation9 + $0x1f0] ss:$24 sps:$4 sm:$0xff]  }
 0x11e   :  { %2121 = vmatpush2.bf16.msra.mxu1 %v4850_v16  ;;  %2081 = vmatprep.subr.bf16.mxu0 %v4855_v18  ;;  %v4940_v16 = vld [vmem:[#allocation9 + $0x4f0] ss:$24 sps:$4 sm:$0xff]   ;;  %v4945_v18 = vld [vmem:[#allocation9 + $0x1c4] ss:$24 sps:$4 sm:$0xff]  }
 0x11f   :  { %2122 = vmatprep.subr.bf16.mxu1 %v4858_v19  ;;  %v4948_v19 = vld [vmem:[#allocation9 + $0x4c4] ss:$24 sps:$4 sm:$0xff]  }
 0x121   :  { %2082 = vmatpush2.bf16.msra.mxu0 %v4853_v20  ;;  %v4943_v20 = vld [vmem:[#allocation9 + $0x1c0] ss:$24 sps:$4 sm:$0xff]  }
 0x122   :  { %2123 = vmatpush2.bf16.msra.mxu1 %v4856_v21  ;;  %2133 = vmatprep.subr.bf16.mxu0 %v4861_v22  ;;  %v4946_v21 = vld [vmem:[#allocation9 + $0x4c0] ss:$24 sps:$4 sm:$0xff]   ;;  %v4951_v22 = vld [vmem:[#allocation9 + $0x194] ss:$24 sps:$4 sm:$0xff]  }
 0x123   :  { %2174 = vmatprep.subr.bf16.mxu1 %v4864_v23  ;;  %v4954_v23 = vld [vmem:[#allocation9 + $0x494] ss:$24 sps:$4 sm:$0xff]  }
 0x124   :  { %2084 = vmatmul.mubr.bf16.vlgmr.msra.gmra.mxu0 %v5423_v9 }
 0x125   :  { %2125 = vmatmul.mubr.bf16.vlgmr.msra.gmra.mxu1 %v5431_v17  ;;  %2134 = vmatpush1.bf16.msra.mxu0 %v4859_v24  ;;  %v4949_v24 = vld [vmem:[#allocation9 + $0x190] ss:$24 sps:$4 sm:$0xff]  }
 0x126   :  { %2175 = vmatpush1.bf16.msra.mxu1 %v4862_v25  ;;  %2135 = vmatprep.subr.bf16.mxu0 %v4867_v26  ;;  %v4952_v25 = vld [vmem:[#allocation9 + $0x490] ss:$24 sps:$4 sm:$0xff]   ;;  %v4957_v26 = vld [vmem:[#allocation9 + $0x764] ss:$24 sps:$4 sm:$0xff]  }
 0x127   :  { %2176 = vmatprep.subr.bf16.mxu1 %v4870_v27  ;;  %2165 = vmatprep.mubr.bf16.mxu0 %v5415_v49  ;;  %v4886_v49 = vld [vmem:[#allocation9 + $0x3a0] ss:$24 sps:$4 sm:$0xff]  }
 0x128   :  { %2206 = vmatprep.mubr.bf16.mxu1 %v5417_v52  ;;  %v4891_v52 = vld [vmem:[#allocation9 + $0x74] ss:$24 sps:$4 sm:$0xff]   ;;  %v4958_v27 = vld [vmem:[#allocation12 + $0x1f8] sm:$0xff]  }
 0x129   :  { %2136 = vmatpush1.bf16.msra.mxu0 %v4865_v28  ;;  %v4955_v28 = vld [vmem:[#allocation9 + $0x760] ss:$24 sps:$4 sm:$0xff]  }
 0x12a   :  { %2177 = vmatpush1.bf16.msra.mxu1 %v4868_v29  ;;  %2137 = vmatprep.subr.bf16.mxu0 %v4873_v30  ;;  %v4959_v29 = vld [vmem:[#allocation12 + $0x1b8] sm:$0xff]   ;;  %v5441_v30 = vld [vmem:[#allocation6] sm:$0xff] }
 0x12b   :  { %2178 = vmatprep.subr.bf16.mxu1 %v4876_v31  ;;  %v4962_v31 = vld [vmem:[#allocation9 + $0x734] ss:$24 sps:$4 sm:$0xff]  }
 0x12d   :  { %2138 = vmatpush1.bf16.msra.mxu0 %v4871_v32  ;;  %v4963_v32 = vld [vmem:[#allocation12 + $0x1f0] sm:$0xff]  }
 0x12e   :  { %2179 = vmatpush1.bf16.msra.mxu1 %v4874_v33  ;;  %2139 = vmatprep.subr.bf16.mxu0 %v4879_v34  ;;  %v4960_v33 = vld [vmem:[#allocation9 + $0x730] ss:$24 sps:$4 sm:$0xff]   ;;  %v4204_v34 = vcombine.high %v5441_v30, %v5441_v30 }
 0x12f   :  { %2180 = vmatprep.subr.bf16.mxu1 %v4882_v36 }
 0x131   :  { %2140 = vmatpush1.bf16.msra.mxu0 %v4877_v37 }
 0x132   :  { %2181 = vmatpush1.bf16.msra.mxu1 %v4880_v38  ;;  %2141 = vmatprep.subr.bf16.mxu0 %v4885_v39  ;;  %v4964_v38 = vld [vmem:[#allocation12 + $0x1b0] sm:$0xff]  }
 0x133   :  { %2182 = vmatprep.subr.bf16.mxu1 %v4888_v40  ;;  %v4967_v40 = vld [vmem:[#allocation9 + $0x704] ss:$24 sps:$4 sm:$0xff]  }
 0x135   :  { %2142 = vmatpush1.bf16.msra.mxu0 %v4883_v41 }
 0x136   :  { %2183 = vmatpush1.bf16.msra.mxu1 %v4886_v49  ;;  %2143 = vmatprep.subr.bf16.mxu0 %v4891_v52  ;;  %v4968_v52 = vld [vmem:[#allocation12 + $0x1e8] sm:$0xff]  }
 0x137   :  { %2184 = vmatprep.subr.bf16.mxu1 %v4894_v42  ;;  %v4965_v42 = vld [vmem:[#allocation9 + $0x700] ss:$24 sps:$4 sm:$0xff]  }
 0x139   :  { %2144 = vmatpush1.bf16.msra.mxu0 %v4889_v43  ;;  %v4969_v43 = vld [vmem:[#allocation12 + $0x1a8] sm:$0xff]  }
 0x13a   :  { %2185 = vmatpush1.bf16.msra.mxu1 %v4892_v44  ;;  %2145 = vmatprep.subr.bf16.mxu0 %v4897_v45  ;;  %v4972_v44 = vld [vmem:[#allocation9 + $0x6d4] ss:$24 sps:$4 sm:$0xff]  }
 0x13b   :  { %2186 = vmatprep.subr.bf16.mxu1 %v4900_v46  ;;  %v4973_v46 = vld [vmem:[#allocation12 + $0x1e0] sm:$0xff]  }
 0x13d   :  { %2146 = vmatpush1.bf16.msra.mxu0 %v4895_v47 }
 0x13e   :  { %2187 = vmatpush1.bf16.msra.mxu1 %v4898_v48  ;;  %2147 = vmatprep.subr.bf16.mxu0 %v4903_v50  ;;  %v4970_v48 = vld [vmem:[#allocation9 + $0x6d0] ss:$24 sps:$4 sm:$0xff]  }
 0x13f   :  { %2188 = vmatprep.subr.bf16.mxu1 %v4906_v51  ;;  %v4974_v50 = vld [vmem:[#allocation12 + $0x1a0] sm:$0xff]  }
 0x140   :  { %v4977_v51 = vld [vmem:[#allocation9 + $0x6a4] ss:$24 sps:$4 sm:$0xff]  }
 0x141   :  { %2148 = vmatpush1.bf16.msra.mxu0 %v4901_v53  ;;  %v4978_v53 = vld [vmem:[#allocation12 + $0x1d8] sm:$0xff]  }
 0x142   :  { %2189 = vmatpush1.bf16.msra.mxu1 %v4904_v54  ;;  %2149 = vmatprep.subr.bf16.mxu0 %v4909_v55  ;;  %v4979_v54 = vld [vmem:[#allocation12 + $0x198] sm:$0xff]   ;;  %v4982_v55 = vld [vmem:[#allocation9 + $0x674] ss:$24 sps:$4 sm:$0xff]  }
 0x143   :  { %2190 = vmatprep.subr.bf16.mxu1 %v4912_v56  ;;  %v4983_v56 = vld [vmem:[#allocation12 + $0x1d0] sm:$0xff]  }
 0x145   :  { %2150 = vmatpush2.bf16.msra.mxu0 %v4907_v57  ;;  %v4980_v57 = vld [vmem:[#allocation9 + $0x670] ss:$24 sps:$4 sm:$0xff]  }
 0x146   :  { %2191 = vmatpush2.bf16.msra.mxu1 %v4910_v58  ;;  %2151 = vmatprep.subr.bf16.mxu0 %v4915_v59  ;;  %v4984_v58 = vld [vmem:[#allocation12 + $0x190] sm:$0xff]  }
 0x147   :  { %2192 = vmatprep.subr.bf16.mxu1 %v4918_v60  ;;  %v4987_v59 = vld [vmem:[#allocation9 + $0x644] ss:$24 sps:$4 sm:$0xff]   ;;  %v4988_v60 = vld [vmem:[#allocation12 + $0x1c8] sm:$0xff]  }
 0x149   :  { %2152 = vmatpush2.bf16.msra.mxu0 %v4913_v61  ;;  %v4985_v61 = vld [vmem:[#allocation9 + $0x640] ss:$24 sps:$4 sm:$0xff]  }
 0x14a   :  { %2193 = vmatpush2.bf16.msra.mxu1 %v4916_v62  ;;  %2153 = vmatprep.subr.bf16.mxu0 %v4921_v63  ;;  %v4989_v62 = vld [vmem:[#allocation12 + $0x188] sm:$0xff]  }
 0x14b   :  { %2194 = vmatprep.subr.bf16.mxu1 %v4924_v0  ;;  %v4992_v63 = vld [vmem:[#allocation9 + $0x614] ss:$24 sps:$4 sm:$0xff]  }
 0x14c   :  { %v4993_v0 = vld [vmem:[#allocation12 + $0x1c0] sm:$0xff]  }
 0x14d   :  { %2154 = vmatpush2.bf16.msra.mxu0 %v4919_v1  ;;  %v4990_v1 = vld [vmem:[#allocation9 + $0x610] ss:$24 sps:$4 sm:$0xff]  }
 0x14e   :  { %2195 = vmatpush2.bf16.msra.mxu1 %v4922_v2  ;;  %2155 = vmatprep.subr.bf16.mxu0 %v4927_v3  ;;  %v4994_v2 = vld [vmem:[#allocation12 + $0x180] sm:$0xff]  }
 0x14f   :  { %2196 = vmatprep.subr.bf16.mxu1 %v4930_v4  ;;  %v4997_v3 = vld [vmem:[#allocation9 + $0x8e4] ss:$24 sps:$4 sm:$0xff]  }
 0x150   :  { %v5000_v4 = vld [vmem:[#allocation12 + $0x278] sm:$0xff]  }
 0x151   :  { %2156 = vmatpush2.bf16.msra.mxu0 %v4925_v5  ;;  %v5454_v5 = vld [vmem:[#allocation6 + $0x8] sm:$0xff] }
 0x152   :  { %2197 = vmatpush2.bf16.msra.mxu1 %v4928_v6  ;;  %2157 = vmatprep.subr.bf16.mxu0 %v4933_v7  ;;  %v4995_v6 = vld [vmem:[#allocation9 + $0x8e0] ss:$24 sps:$4 sm:$0xff]  }
 0x153   :  { %2198 = vmatprep.subr.bf16.mxu1 %v4936_v10  ;;  %v5001_v7 = vld [vmem:[#allocation12 + $0x238] sm:$0xff]   ;;  %v4203_v10 = vcombine.low %v5441_v30, %v5441_v30  ;;  %v5025_v30 = vld [vmem:[#allocation12 + $0x250] sm:$0xff]  }
 0x155   :  { %2158 = vmatpush2.bf16.msra.mxu0 %v4931_v11  ;;  %v5004_v11 = vld [vmem:[#allocation9 + $0x8b4] ss:$24 sps:$4 sm:$0xff]  }
 0x156   :  { %2199 = vmatpush2.bf16.msra.mxu1 %v4934_v12  ;;  %2159 = vmatprep.subr.bf16.mxu0 %v4939_v13  ;;  %v5005_v12 = vld [vmem:[#allocation12 + $0x270] sm:$0xff]   ;;  %v5002_v13 = vld [vmem:[#allocation9 + $0x8b0] ss:$24 sps:$4 sm:$0xff]  }
 0x157   :  { %2200 = vmatprep.subr.bf16.mxu1 %v4942_v14  ;;  %v5006_v14 = vld [vmem:[#allocation12 + $0x230] sm:$0xff]  }
 0x159   :  { %2160 = vmatpush2.bf16.msra.mxu0 %v4937_v15  ;;  %v4206_v15 = vcombine.high %v5454_v5, %v5454_v5 }
 0x15a   :  { %2201 = vmatpush2.bf16.msra.mxu1 %v4940_v16  ;;  %2161 = vmatprep.subr.bf16.mxu0 %v4945_v18  ;;  %v5009_v16 = vld [vmem:[#allocation9 + $0x884] ss:$24 sps:$4 sm:$0xff]   ;;  %v5010_v18 = vld [vmem:[#allocation12 + $0x268] sm:$0xff]  }
 0x15b   :  { %2202 = vmatprep.subr.bf16.mxu1 %v4948_v19  ;;  %v5007_v19 = vld [vmem:[#allocation9 + $0x880] ss:$24 sps:$4 sm:$0xff]  }
 0x15d   :  { %2162 = vmatpush2.bf16.msra.mxu0 %v4943_v20  ;;  %v5011_v20 = vld [vmem:[#allocation12 + $0x228] sm:$0xff]  }
 0x15e   :  { %2203 = vmatpush2.bf16.msra.mxu1 %v4946_v21  ;;  %2163 = vmatprep.subr.bf16.mxu0 %v4951_v22  ;;  %v5014_v21 = vld [vmem:[#allocation9 + $0x854] ss:$24 sps:$4 sm:$0xff]  }
 0x15f   :  { %2204 = vmatprep.subr.bf16.mxu1 %v4954_v23  ;;  %v5015_v22 = vld [vmem:[#allocation12 + $0x260] sm:$0xff]  }
 0x160   :  { %v5012_v23 = vld [vmem:[#allocation9 + $0x850] ss:$24 sps:$4 sm:$0xff]  }
 0x161   :  { %2164 = vmatpush2.bf16.msra.mxu0 %v4949_v24  ;;  %v5016_v24 = vld [vmem:[#allocation12 + $0x220] sm:$0xff]  }
 0x162   :  { %2205 = vmatpush2.bf16.msra.mxu1 %v4952_v25  ;;  %2215 = vmatprep.subr.bf16.mxu0 %v4957_v26  ;;  %v5019_v25 = vld [vmem:[#allocation9 + $0x824] ss:$24 sps:$4 sm:$0xff]  }
 0x163   :  { %4361 = vmatprep.subr.bf16.mxu1 %v4958_v27  ;;  %v5020_v26 = vld [vmem:[#allocation12 + $0x258] sm:$0xff]  }
 0x164   :  { %v1921_v36 = vpop.f32.mrf.mxu0  ;;  %2166 = vmatmul.mubr.bf16.vlgmr.msra.gmra.mxu0 %v5421_v8  ;;  %v5017_v27 = vld [vmem:[#allocation9 + $0x820] ss:$24 sps:$4 sm:$0xff]  }
 0x165   :  { %v1962_v37 = vpop.f32.mrf.mxu1  ;;  %2207 = vmatmul.mubr.bf16.vlgmr.msra.gmra.mxu1 %v5423_v9  ;;  %2216 = vmatpush1.bf16.msra.mxu0 %v4955_v28  ;;  %v5021_v28 = vld [vmem:[#allocation12 + $0x218] sm:$0xff]  }
 0x166   :  { %v5447_v39 = vadd.f32 %v1962_v37, %v1921_v36  ;;  %4362 = vmatpush3.bf16.msra.mxu1 %v4959_v29  ;;  %v5449_v41 = vpop.f32.mrf.mxu0  ;;  %2217 = vmatprep.subr.bf16.mxu0 %v4962_v31  ;;  %v5024_v29 = vld [vmem:[#allocation9 + $0x7f4] ss:$24 sps:$4 sm:$0xff]   ;;  %v5022_v31 = vld [vmem:[#allocation9 + $0x7f0] ss:$24 sps:$4 sm:$0xff]   ;;  %v5027_v36 = vld [vmem:[#allocation9 + $0x7c0] ss:$24 sps:$4 sm:$0xff]  }
 0x167   :  { %v5451_v49 = vpop.f32.mrf.mxu1  ;;  %4363 = vmatprep.subr.bf16.mxu1 %v4963_v32  ;;  %2857 = vmatprep.mubr.bf16.mxu1 %v4204_v34  ;;  %v5026_v32 = vld [vmem:[#allocation12 + $0x210] sm:$0xff]   ;;  %v5030_v34 = vld [vmem:[#allocation12 + $0x248] sm:$0xff]  }
 0x168   :  { %2247 = vmatprep.mubr.bf16.mxu0 %v5428_v35  ;;  %v1925_v8 = vpop.f32.mrf.mxu0  ;;  %v4975_v35 = vld [vmem:[#allocation9 + $0x6a0] ss:$24 sps:$4 sm:$0xff]   ;;  %v5031_v37 = vld [vmem:[#allocation12 + $0x208] sm:$0xff]  }
 0x169   :  { %v1966_v9 = vpop.f32.mrf.mxu1  ;;  %2218 = vmatpush1.bf16.msra.mxu0 %v4960_v33  ;;  %v5029_v33 = vld [vmem:[#allocation9 + $0x7c4] ss:$24 sps:$4 sm:$0xff]   ;;  %v2279_v8 = vlaneseq }
 0x16a   :  { %4364 = vmatpush3.bf16.msra.mxu1 %v4964_v38  ;;  %v1926_v45 = vpop.f32.mrf.mxu0  ;;  %2219 = vmatprep.subr.bf16.mxu0 %v4967_v40  ;;  %v5034_v38 = vld [vmem:[#allocation9 + $0x794] ss:$24 sps:$4 sm:$0xff]   ;;  %v5040_v9 = vld [vmem:[#allocation12 + $0x78] sm:$0xff]  }
 0x16b   :  { %4365 = vmatprep.subr.bf16.mxu1 %v4968_v52  ;;  %v1967_v47 = vpop.f32.mrf.mxu1  ;;  %v5035_v40 = vld [vmem:[#allocation12 + $0x240] sm:$0xff]   ;;  %v4205_v45 = vcombine.low %v5454_v5, %v5454_v5 }
 0x16c   :  { %v5032_v52 = vld [vmem:[#allocation9 + $0x790] ss:$24 sps:$4 sm:$0xff]   ;;  %v5041_v47 = vld [vmem:[#allocation12 + $0x2b8] sm:$0xff]  }
 0x16d   :  { %2220 = vmatpush1.bf16.msra.mxu0 %v4965_v42  ;;  %v5036_v42 = vld [vmem:[#allocation12 + $0x200] sm:$0xff]  }
 0x16e   :  { %4366 = vmatpush3.bf16.msra.mxu1 %v4969_v43  ;;  %2221 = vmatprep.subr.bf16.mxu0 %v4972_v44  ;;  %v5039_v43 = vld [vmem:[#allocation12 + $0x2f8] sm:$0xff]   ;;  %v5460_v44 = vshrl.u32 %v2279_v8, 7  ;;  %v5051_v5 = vld [vmem:[#allocation12 + $0x2e0] sm:$0xff]   ;;  %v5076_v8 = vld [vmem:[#allocation12 + $0xb0] sm:$0xff]  }
 0x16f   :  { %4367 = vmatprep.subr.bf16.mxu1 %v4973_v46  ;;  %v5464_v46 = vld [vmem:[#allocation6 + $0x10] sm:$0xff] }
 0x171   :  { %2222 = vmatpush1.bf16.msra.mxu0 %v4970_v48  ;;  %v5042_v48 = vld [vmem:[#allocation12 + $0x38] sm:$0xff]  }
 0x172   :  { %4368 = vmatpush3.bf16.msra.mxu1 %v4974_v50  ;;  %2223 = vmatprep.subr.bf16.mxu0 %v4977_v51  ;;  %v2285_v50 = vsub.s32 1, %v5460_v44  ;;  %v5043_v51 = vld [vmem:[#allocation12 + $0x2f0] sm:$0xff]  }
 0x173   :  { %4369 = vmatprep.subr.bf16.mxu1 %v4978_v53  ;;  %v5044_v53 = vld [vmem:[#allocation12 + $0x70] sm:$0xff]  }
 0x175   :  { %2224 = vmatpush1.bf16.msra.mxu0 %v4975_v35  ;;  %v4208_v35 = vcombine.high %v5464_v46, %v5464_v46 }
 0x176   :  { %4370 = vmatpush3.bf16.msra.mxu1 %v4979_v54  ;;  %2225 = vmatprep.subr.bf16.mxu0 %v4982_v55  ;;  %v5471_v55 = vld [vmem:[#allocation11] sm:$0x3f] }
 0x177   :  { %4371 = vmatprep.subr.bf16.mxu1 %v4983_v56 }
 0x179   :  { %2226 = vmatpush1.bf16.msra.mxu0 %v4980_v57  ;;  %v1965_v57 = vadd.f32 %v5451_v49, %v5449_v41  ;;  %v5049_v41 = vld [vmem:[#allocation12 + $0x2a8] sm:$0xff]  }
 0x17a   :  { %4372 = vmatpush3.bf16.msra.mxu1 %v4984_v58  ;;  %2227 = vmatprep.subr.bf16.mxu0 %v4987_v59  ;;  %v2286_v58 = vrot.slane %v5471_v55, %v2285_v50  ;;  %v5045_v59 = vld [vmem:[#allocation12 + $0x2b0] sm:$0xff]   ;;  %v5050_v49 = vld [vmem:[#allocation12 + $0x28] sm:$0xff]   ;;  %v5103_v50 = vld [vmem:[#allocation12 + $0x160] sm:$0xff]  }
 0x17b   :  { %4373 = vmatprep.subr.bf16.mxu1 %v4988_v60  ;;  %v5046_v60 = vld [vmem:[#allocation12 + $0x30] sm:$0xff]  }
 0x17d   :  { %2228 = vmatpush1.bf16.msra.mxu0 %v4985_v61 }
 0x17e   :  { %4374 = vmatpush3.bf16.msra.mxu1 %v4989_v62  ;;  %2229 = vmatprep.subr.bf16.mxu0 %v4992_v63  ;;  %v5047_v62 = vld [vmem:[#allocation12 + $0x2e8] sm:$0xff]  }
 0x17f   :  { %4375 = vmatprep.subr.bf16.mxu1 %v4993_v0  ;;  %v5048_v63 = vld [vmem:[#allocation12 + $0x68] sm:$0xff]  }
 0x181   :  { %2230 = vmatpush1.bf16.msra.mxu0 %v4990_v1 }
 0x182   :  { %4376 = vmatpush3.bf16.msra.mxu1 %v4994_v2  ;;  %2231 = vmatprep.subr.bf16.mxu0 %v4997_v3 }
 0x183   :  { %4383 = vmatprep.subr.bf16.mxu1 %v5000_v4 }
 0x185   :  { %2858 = vmatmul.mubr.bf16.vlgmr.msra.gmra.mxu1 %v4203_v10  ;;  %2232 = vmatpush2.bf16.msra.mxu0 %v4995_v6  ;;  %v5052_v10 = vld [vmem:[#allocation12 + $0x60] sm:$0xff]  }
 0x186   :  { %4384 = vmatpush3.bf16.msra.mxu1 %v5001_v7  ;;  %2233 = vmatprep.subr.bf16.mxu0 %v5004_v11  ;;  %v5053_v11 = vld [vmem:[#allocation12 + $0x2a0] sm:$0xff]  }
 0x187   :  { %4385 = vmatprep.subr.bf16.mxu1 %v5005_v12  ;;  %2897 = vmatprep.mubr.bf16.mxu1 %v4206_v15  ;;  %v5054_v12 = vld [vmem:[#allocation12 + $0x20] sm:$0xff]   ;;  %v5057_v15 = vld [vmem:[#allocation12 + $0x298] sm:$0xff]  }
 0x189   :  { %2234 = vmatpush2.bf16.msra.mxu0 %v5002_v13  ;;  %v5055_v13 = vld [vmem:[#allocation12 + $0x2d8] sm:$0xff]  }
 0x18a   :  { %4386 = vmatpush3.bf16.msra.mxu1 %v5006_v14  ;;  %2235 = vmatprep.subr.bf16.mxu0 %v5009_v16  ;;  %v5056_v14 = vld [vmem:[#allocation12 + $0x58] sm:$0xff]  }
 0x18b   :  { %4387 = vmatprep.subr.bf16.mxu1 %v5010_v18  ;;  %v5058_v16 = vld [vmem:[#allocation12 + $0x18] sm:$0xff]   ;;  %v5059_v18 = vld [vmem:[#allocation12 + $0x2d0] sm:$0xff]  }
 0x18d   :  { %2236 = vmatpush2.bf16.msra.mxu0 %v5007_v19  ;;  %v5060_v19 = vld [vmem:[#allocation12 + $0x50] sm:$0xff]  }
 0x18e   :  { %4388 = vmatpush3.bf16.msra.mxu1 %v5011_v20  ;;  %2237 = vmatprep.subr.bf16.mxu0 %v5014_v21  ;;  %v5061_v20 = vld [vmem:[#allocation12 + $0x290] sm:$0xff]  }
 0x18f   :  { %4389 = vmatprep.subr.bf16.mxu1 %v5015_v22  ;;  %v5062_v21 = vld [vmem:[#allocation12 + $0x10] sm:$0xff]   ;;  %v2281_v22 = vsub.s32 0, %v5460_v44 }
 0x191   :  { %2238 = vmatpush2.bf16.msra.mxu0 %v5012_v23  ;;  %v5063_v23 = vld [vmem:[#allocation12 + $0x2c8] sm:$0xff]  }
 0x192   :  { %4390 = vmatpush3.bf16.msra.mxu1 %v5016_v24  ;;  %2239 = vmatprep.subr.bf16.mxu0 %v5019_v25  ;;  %v5064_v24 = vld [vmem:[#allocation12 + $0x48] sm:$0xff]  }
 0x193   :  { %4391 = vmatprep.subr.bf16.mxu1 %v5020_v26  ;;  %v5065_v25 = vld [vmem:[#allocation12 + $0x288] sm:$0xff]  }
 0x194   :  { %v5066_v26 = vld [vmem:[#allocation12 + $0x8] sm:$0xff]  }
 0x195   :  { %2240 = vmatpush2.bf16.msra.mxu0 %v5017_v27 }
 0x196   :  { %4392 = vmatpush3.bf16.msra.mxu1 %v5021_v28  ;;  %2241 = vmatprep.subr.bf16.mxu0 %v5024_v29  ;;  %v2282_v28 = vrot.slane %v5471_v55, %v2281_v22  ;;  %v5067_v29 = vld [vmem:[#allocation12 + $0x2c0] sm:$0xff]  }
 0x197   :  { %4393 = vmatprep.subr.bf16.mxu1 %v5025_v30  ;;  %v5068_v30 = vld [vmem:[#allocation12 + $0x40] sm:$0xff]  }
 0x198   :  { %v5123_v22 = vld [vmem:[#allocation12 + $0x100] sm:$0xff]  }
 0x199   :  { %2242 = vmatpush2.bf16.msra.mxu0 %v5022_v31  ;;  %v5069_v31 = vld [vmem:[#allocation12 + $0x280] sm:$0xff]  }
 0x19a   :  { %4394 = vmatpush3.bf16.msra.mxu1 %v5026_v32  ;;  %2243 = vmatprep.subr.bf16.mxu0 %v5029_v33  ;;  %v5070_v32 = vld [vmem:[#allocation12] sm:$0xff]  }
 0x19b   :  { %4395 = vmatprep.subr.bf16.mxu1 %v5030_v34  ;;  %v5073_v34 = vld [vmem:[#allocation12 + $0xf8] sm:$0xff]  }
 0x19d   :  { %2244 = vmatpush2.bf16.msra.mxu0 %v5027_v36  ;;  %v5091_v36 = vld [vmem:[#allocation12 + $0x178] sm:$0xff]  }
 0x19e   :  { %4396 = vmatpush3.bf16.msra.mxu1 %v5031_v37  ;;  %2245 = vmatprep.subr.bf16.mxu0 %v5034_v38  ;;  %v4207_v37 = vcombine.low %v5464_v46, %v5464_v46  ;;  %v5093_v38 = vld [vmem:[#allocation12 + $0x138] sm:$0xff]   ;;  %v5078_v46 = vld [vmem:[#allocation12 + $0xa8] sm:$0xff]  }
 0x19f   :  { %4397 = vmatprep.subr.bf16.mxu1 %v5035_v40 }
 0x1a1   :  { %2246 = vmatpush2.bf16.msra.mxu0 %v5032_v52  ;;  %v5075_v52 = vld [vmem:[#allocation12 + $0xf0] sm:$0xff]  }
 0x1a2   :  { %4398 = vmatpush3.bf16.msra.mxu1 %v5036_v42  ;;  %4405 = vmatprep.subr.bf16.mxu0 %v5039_v43  ;;  %v5095_v42 = vld [vmem:[#allocation12 + $0x170] sm:$0xff]  }
 0x1a3   :  { %4427 = vmatprep.subr.bf16.mxu1 %v5040_v9  ;;  %v5097_v43 = vld [vmem:[#allocation12 + $0x130] sm:$0xff]   ;;  %v5077_v9 = vld [vmem:[#allocation12 + $0xe8] sm:$0xff]  }
 0x1a4   :  { %v5469_v54 = vpop.f32.mrf.mxu0  ;;  %2248 = vmatmul.mubr.bf16.vlgmr.msra.gmra.mxu0 %v5431_v17 }
 0x1a5   :  { %2898 = vmatmul.mubr.bf16.vlgmr.msra.gmra.mxu1 %v4205_v45  ;;  %v5474_v56 = vpop.f32.mrf.mxu1  ;;  %4406 = vmatpush3.bf16.msra.mxu0 %v5041_v47  ;;  %v2004_v27 = vadd.f32 %v5469_v54, %v5447_v39  ;;  %v5074_v39 = vld [vmem:[#allocation12 + $0xb8] sm:$0xff]   ;;  %v5099_v45 = vld [vmem:[#allocation12 + $0x168] sm:$0xff]  }
 0x1a6   :  { %4428 = vmatpush3.bf16.msra.mxu1 %v5042_v48  ;;  %v2005_v61 = vpop.f32.mrf.mxu0  ;;  %4407 = vmatprep.subr.bf16.mxu0 %v5043_v51  ;;  %v5101_v47 = vld [vmem:[#allocation12 + $0x128] sm:$0xff]   ;;  %v5079_v48 = vld [vmem:[#allocation12 + $0xe0] sm:$0xff]   ;;  %v5107_v54 = vld [vmem:[#allocation12 + $0x158] sm:$0xff]  }
 0x1a7   :  { %4429 = vmatprep.subr.bf16.mxu1 %v5044_v53  ;;  %v5479_v0 = vpop.f32.mrf.mxu1  ;;  %v2006_v17 = vadd.f32 %v2005_v61, %v1965_v57  ;;  %2937 = vmatprep.mubr.bf16.mxu0 %v4208_v35  ;;  %v2309_v33 = vadd.f32 %v2282_v28, %v2004_v27  ;;  %v5080_v51 = vld [vmem:[#allocation12 + $0xa0] sm:$0xff]   ;;  %v5081_v35 = vld [vmem:[#allocation12 + $0xd8] sm:$0xff]   ;;  %v5084_v61 = vld [vmem:[#allocation12 + $0x90] sm:$0xff]  }
 0x1a8   :  { %v2007_v1 = vpop.f32.mrf.mxu0  ;;  %v5105_v53 = vld [vmem:[#allocation12 + $0x120] sm:$0xff]   ;;  %v5082_v57 = vld [vmem:[#allocation12 + $0x98] sm:$0xff]  }
 0x1a9   :  { %v2048_v2 = vpop.f32.mrf.mxu1  ;;  %v2310_v3 = vadd.f32 %v2286_v58, %v2006_v17  ;;  %4408 = vmatpush3.bf16.msra.mxu0 %v5045_v59  ;;  %v2315_v40 = vpack.c.bf16 %v2309_v33, %v2309_v33  ;;  %v5109_v58 = vld [vmem:[#allocation12 + $0x118] sm:$0xff]   ;;  %v5083_v59 = vld [vmem:[#allocation12 + $0xd0] sm:$0xff]   ;;  %v5086_v17 = vld [vmem:[#allocation12 + $0x88] sm:$0xff]  }
 0x1aa   :  { %4430 = vmatpush3.bf16.msra.mxu1 %v5046_v60  ;;  %v2008_v4 = vpop.f32.mrf.mxu0  ;;  %4409 = vmatprep.subr.bf16.mxu0 %v5047_v62  ;;  %v5111_v60 = vld [vmem:[#allocation12 + $0x150] sm:$0xff]   ;;  %v5087_v1 = vld [vmem:[#allocation12 + $0xc0] sm:$0xff]   ;;  %v5125_v27 = vld [vmem:[#allocation12 + $0x3f8] sm:$0xff]  }
 0x1ab   :  { %4431 = vmatprep.subr.bf16.mxu1 %v5048_v63  ;;  %v2049_v6 = vpop.f32.mrf.mxu1  ;;  %v2316_v7 = vpack.c.bf16 %v2310_v3, %v2310_v3  ;;  %v5113_v62 = vld [vmem:[#allocation12 + $0x110] sm:$0xff]   ;;  %v5085_v63 = vld [vmem:[#allocation12 + $0xc8] sm:$0xff]   ;;  %v5088_v2 = vld [vmem:[#allocation12 + $0x80] sm:$0xff]  }
 0x1ac   :  { %v5089_v3 = vld [vmem:[#allocation12 + $0x378] sm:$0xff]   ;;  %v5115_v6 = vld [vmem:[#allocation12 + $0x148] sm:$0xff]  }
 0x1ad   :  { %4410 = vmatpush3.bf16.msra.mxu0 %v5049_v41  ;;  %3265 = vmatprep.mubr.bf16.mxu1 %v2316_v7  ;;  %v2289_v41 = vsub.s32 2, %v5460_v44  ;;  %v5096_v33 = vld [vmem:[#allocation12 + $0x368] sm:$0xff]  }
 0x1ae   :  { %4432 = vmatpush3.bf16.msra.mxu1 %v5050_v49  ;;  %4411 = vmatprep.subr.bf16.mxu0 %v5051_v5  ;;  %v2293_v49 = vsub.s32 3, %v5460_v44 }
 0x1af   :  { %4433 = vmatprep.subr.bf16.mxu1 %v5052_v10  ;;  %v5117_v10 = vld [vmem:[#allocation12 + $0x108] sm:$0xff]  }
 0x1b1   :  { %4412 = vmatpush3.bf16.msra.mxu0 %v5053_v11 }
 0x1b2   :  { %4434 = vmatpush3.bf16.msra.mxu1 %v5054_v12  ;;  %4413 = vmatprep.subr.bf16.mxu0 %v5055_v13  ;;  %v2290_v12 = vrot.slane %v5471_v55, %v2289_v41 }
 0x1b3   :  { %4435 = vmatprep.subr.bf16.mxu1 %v5056_v14 }
 0x1b5   :  { %4414 = vmatpush3.bf16.msra.mxu0 %v5057_v15 }
 0x1b6   :  { %4436 = vmatpush3.bf16.msra.mxu1 %v5058_v16  ;;  %4415 = vmatprep.subr.bf16.mxu0 %v5059_v18  ;;  %v2294_v16 = vrot.slane %v5471_v55, %v2293_v49 }
 0x1b7   :  { %4437 = vmatprep.subr.bf16.mxu1 %v5060_v19 }
 0x1b9   :  { %4416 = vmatpush3.bf16.msra.mxu0 %v5061_v20  ;;  %v5119_v20 = vld [vmem:[#allocation12 + $0x140] sm:$0xff]  }
 0x1ba   :  { %4438 = vmatpush3.bf16.msra.mxu1 %v5062_v21  ;;  %4417 = vmatprep.subr.bf16.mxu0 %v5063_v23 }
 0x1bb   :  { %4439 = vmatprep.subr.bf16.mxu1 %v5064_v24 }
 0x1bd   :  { %4418 = vmatpush3.bf16.msra.mxu0 %v5065_v25  ;;  %v3353_v25 = vld [vmem:[#allocation8] sm:$0xff] }
 0x1be   :  { %4440 = vmatpush3.bf16.msra.mxu1 %v5066_v26  ;;  %4419 = vmatprep.subr.bf16.mxu0 %v5067_v29  ;;  %v5090_v29 = vld [vmem:[#allocation12 + $0x338] sm:$0xff]  }
 0x1bf   :  { %4441 = vmatprep.subr.bf16.mxu1 %v5068_v30 }
 0x1c1   :  { %4420 = vmatpush3.bf16.msra.mxu0 %v5069_v31  ;;  %v5092_v31 = vld [vmem:[#allocation12 + $0x370] sm:$0xff]  }
 0x1c2   :  { %4442 = vmatpush3.bf16.msra.mxu1 %v5070_v32  ;;  %4449 = vmatprep.subr.bf16.mxu0 %v5073_v34  ;;  %v5094_v32 = vld [vmem:[#allocation12 + $0x330] sm:$0xff]   ;;  %v5098_v34 = vld [vmem:[#allocation12 + $0x328] sm:$0xff]  }
 0x1c3   :  { %4471 = vmatprep.subr.bf16.mxu1 %v5091_v36  ;;  %v5100_v36 = vld [vmem:[#allocation12 + $0x360] sm:$0xff]  }
 0x1c4   :  { %2938 = vmatmul.mubr.bf16.vlgmr.msra.gmra.mxu0 %v4207_v37  ;;  %v5102_v37 = vld [vmem:[#allocation12 + $0x320] sm:$0xff]  }
 0x1c5   :  { %3266 = vmatmul.mubr.bf16.vlgmr.msra.gmra.mxu1 %v2315_v40  ;;  %4450 = vmatpush3.bf16.msra.mxu0 %v5074_v39  ;;  %v5104_v39 = vld [vmem:[#allocation12 + $0x358] sm:$0xff]   ;;  %v5108_v40 = vld [vmem:[#allocation12 + $0x350] sm:$0xff]  }
 0x1c6   :  { %4472 = vmatpush3.bf16.msra.mxu1 %v5093_v38  ;;  %4451 = vmatprep.subr.bf16.mxu0 %v5075_v52  ;;  %v5106_v38 = vld [vmem:[#allocation12 + $0x318] sm:$0xff]   ;;  %v5110_v52 = vld [vmem:[#allocation12 + $0x310] sm:$0xff]  }
 0x1c7   :  { %4473 = vmatprep.subr.bf16.mxu1 %v5095_v42  ;;  %v5112_v42 = vld [vmem:[#allocation12 + $0x348] sm:$0xff]  }
 0x1c9   :  { %4452 = vmatpush3.bf16.msra.mxu0 %v5076_v8  ;;  %v5114_v8 = vld [vmem:[#allocation12 + $0x308] sm:$0xff]  }
 0x1ca   :  { %4474 = vmatpush3.bf16.msra.mxu1 %v5097_v43  ;;  %4453 = vmatprep.subr.bf16.mxu0 %v5077_v9  ;;  %v5116_v43 = vld [vmem:[#allocation12 + $0x340] sm:$0xff]  }
 0x1cb   :  { %4475 = vmatprep.subr.bf16.mxu1 %v5099_v45  ;;  %v5118_v9 = vld [vmem:[#allocation12 + $0x300] sm:$0xff]   ;;  %v5122_v45 = vld [vmem:[#allocation12 + $0x478] sm:$0xff]  }
 0x1cd   :  { %4454 = vmatpush3.bf16.msra.mxu0 %v5078_v46  ;;  %v3355_v46 = vld [vmem:[#allocation8 + $0x10] sm:$0xff] }
 0x1ce   :  { %4476 = vmatpush3.bf16.msra.mxu1 %v5101_v47  ;;  %4455 = vmatprep.subr.bf16.mxu0 %v5079_v48  ;;  %v4305_v47 = vcombine.low %v3353_v25, %v3353_v25  ;;  %v5124_v48 = vld [vmem:[#allocation12 + $0x438] sm:$0xff]  }
 0x1cf   :  { %4477 = vmatprep.subr.bf16.mxu1 %v5103_v50  ;;  %v4310_v50 = vcombine.high %v3355_v46, %v3355_v46 }
 0x1d1   :  { %4456 = vmatpush3.bf16.msra.mxu0 %v5080_v51  ;;  %v5126_v51 = vld [vmem:[#allocation12 + $0x470] sm:$0xff]  }
 0x1d2   :  { %4478 = vmatpush3.bf16.msra.mxu1 %v5105_v53  ;;  %4457 = vmatprep.subr.bf16.mxu0 %v5081_v35  ;;  %v5128_v53 = vld [vmem:[#allocation12 + $0x430] sm:$0xff]   ;;  %v5130_v35 = vld [vmem:[#allocation12 + $0x468] sm:$0xff]  }
 0x1d3   :  { %4479 = vmatprep.subr.bf16.mxu1 %v5107_v54  ;;  %v5132_v54 = vld [vmem:[#allocation12 + $0x428] sm:$0xff]  }
 0x1d5   :  { %4458 = vmatpush3.bf16.msra.mxu0 %v5082_v57  ;;  %v5134_v57 = vld [vmem:[#allocation12 + $0x460] sm:$0xff]  }
 0x1d6   :  { %4480 = vmatpush3.bf16.msra.mxu1 %v5109_v58  ;;  %4459 = vmatprep.subr.bf16.mxu0 %v5083_v59  ;;  %v5136_v58 = vld [vmem:[#allocation12 + $0x420] sm:$0xff]   ;;  %v5138_v59 = vld [vmem:[#allocation12 + $0x458] sm:$0xff]  }
 0x1d7   :  { %4481 = vmatprep.subr.bf16.mxu1 %v5111_v60  ;;  %v5140_v60 = vld [vmem:[#allocation12 + $0x418] sm:$0xff]  }
 0x1d9   :  { %4460 = vmatpush3.bf16.msra.mxu0 %v5084_v61  ;;  %v5142_v61 = vld [vmem:[#allocation12 + $0x450] sm:$0xff]  }
 0x1da   :  { %4482 = vmatpush3.bf16.msra.mxu1 %v5113_v62  ;;  %4461 = vmatprep.subr.bf16.mxu0 %v5085_v63  ;;  %v5144_v62 = vld [vmem:[#allocation12 + $0x410] sm:$0xff]   ;;  %v5146_v63 = vld [vmem:[#allocation12 + $0x448] sm:$0xff]  }
 0x1db   :  { %4483 = vmatprep.subr.bf16.mxu1 %v5115_v6 }
 0x1dd   :  { %4462 = vmatpush3.bf16.msra.mxu0 %v5086_v17 }
 0x1de   :  { %4463 = vmatprep.subr.bf16.mxu0 %v5087_v1  ;;  %4484 = vmatpush3.bf16.msra.mxu1 %v5117_v10 }
 0x1df   :  { %4485 = vmatprep.subr.bf16.mxu1 %v5119_v20  ;;  %v2301_v20 = vsub.s32 5, %v5460_v44 }
 0x1e1   :  { %4464 = vmatpush3.bf16.msra.mxu0 %v5088_v2 }
 0x1e2   :  { %4493 = vmatprep.subr.bf16.mxu0 %v5089_v3  ;;  %4486 = vmatpush3.bf16.msra.mxu1 %v5123_v22  ;;  %v5148_v3 = vld [vmem:[#allocation12 + $0x408] sm:$0xff]  }
 0x1e3   :  { %4515 = vmatprep.subr.bf16.mxu1 %v5125_v27 }
 0x1e4   :  { %v2085_v4 = vpop.f32.mrf.mxu0 }
 0x1e5   :  { %v2126_v5 = vpop.f32.mrf.mxu1  ;;  %v2086_v7 = vadd.f32 %v2085_v4, %v5474_v56  ;;  %v5150_v4 = vld [vmem:[#allocation12 + $0x440] sm:$0xff]  }
 0x1e6   :  { %v2087_v11 = vpop.f32.mrf.mxu0 }
 0x1e7   :  { %v2128_v13 = vpop.f32.mrf.mxu1  ;;  %v2088_v14 = vadd.f32 %v2087_v11, %v5479_v0  ;;  %v2127_v15 = vadd.f32 %v2126_v5, %v2086_v7  ;;  %v4306_v0 = vcombine.high %v3353_v25, %v3353_v25  ;;  %v5152_v7 = vld [vmem:[#allocation12 + $0x400] sm:$0xff]   ;;  %v2302_v25 = vrot.slane %v5471_v55, %v2301_v20 }
 0x1e8   :  { %v2089_v18 = vpop.f32.mrf.mxu0 }
 0x1e9   :  { %v2130_v19 = vpop.f32.mrf.mxu1  ;;  %v2129_v21 = vadd.f32 %v2128_v13, %v2088_v14  ;;  %v2311_v23 = vadd.f32 %v2290_v12, %v2127_v15  ;;  %v4309_v12 = vcombine.low %v3355_v46, %v3355_v46  ;;  %v5143_v46 = vld [vmem:[#allocation12 + $0x398] sm:$0xff]  }
 0x1ea   :  { %v2090_v24 = vpop.f32.mrf.mxu0  ;;  %v2297_v19 = vsub.s32 4, %v5460_v44 }
 0x1eb   :  { %v2131_v56 = vpop.f32.mrf.mxu1  ;;  %v2312_v26 = vadd.f32 %v2294_v16, %v2129_v21  ;;  %v2317_v30 = vpack.c.bf16 %v2311_v23, %v2311_v23 }
 0x1ec   :  { %v2298_v22 = vrot.slane %v5471_v55, %v2297_v19  ;;  %v5131_v55 = vld [vmem:[#allocation12 + $0x3b0] sm:$0xff]  }
 0x1ed   :  { %v2318_v28 = vpack.c.bf16 %v2312_v26, %v2312_v26 }
 0x1ef   :  { %3305 = vmatprep.mubr.bf16.mxu0 %v2318_v28 }
 0x1f0   :  { %3306 = vmatmul.mubr.bf16.vlgmr.msra.gmra.mxu0 %v2317_v30 }
 0x1f1   :  { %4494 = vmatpush3.bf16.msra.mxu0 %v5090_v29  ;;  %3793 = vmatprep.mubr.bf16.mxu0 %v4306_v0 }
 0x1f2   :  { %4495 = vmatprep.subr.bf16.mxu0 %v5092_v31 }
 0x1f5   :  { %4496 = vmatpush3.bf16.msra.mxu0 %v5094_v32  ;;  %v3354_v32 = vld [vmem:[#allocation8 + $0x8] sm:$0xff] }
 0x1f6   :  { %4497 = vmatprep.subr.bf16.mxu0 %v5096_v33 }
 0x1f9   :  { %4498 = vmatpush3.bf16.msra.mxu0 %v5098_v34 }
 0x1fa   :  { %4499 = vmatprep.subr.bf16.mxu0 %v5100_v36 }
 0x1fd   :  { %4500 = vmatpush3.bf16.msra.mxu0 %v5102_v37 }
 0x1fe   :  { %4501 = vmatprep.subr.bf16.mxu0 %v5104_v39  ;;  %v5127_v39 = vld [vmem:[#allocation12 + $0x3b8] sm:$0xff]  }
 0x201   :  { %4502 = vmatpush3.bf16.msra.mxu0 %v5106_v38  ;;  %v4308_v38 = vcombine.high %v3354_v32, %v3354_v32 }
 0x202   :  { %4503 = vmatprep.subr.bf16.mxu0 %v5108_v40 }
 0x205   :  { %4504 = vmatpush3.bf16.msra.mxu0 %v5110_v52  ;;  %v5129_v52 = vld [vmem:[#allocation12 + $0x3f0] sm:$0xff]  }
 0x206   :  { %4505 = vmatprep.subr.bf16.mxu0 %v5112_v42  ;;  %v5133_v42 = vld [vmem:[#allocation12 + $0x3e8] sm:$0xff]  }
 0x209   :  { %4506 = vmatpush3.bf16.msra.mxu0 %v5114_v8  ;;  %v5135_v8 = vld [vmem:[#allocation12 + $0x3a8] sm:$0xff]  }
 0x20a   :  { %4507 = vmatprep.subr.bf16.mxu0 %v5116_v43  ;;  %v5137_v43 = vld [vmem:[#allocation12 + $0x3e0] sm:$0xff]  }
 0x20d   :  { %4508 = vmatpush3.bf16.msra.mxu0 %v5118_v9  ;;  %v5139_v9 = vld [vmem:[#allocation12 + $0x3a0] sm:$0xff]  }
 0x20e   :  { %4537 = vmatprep.subr.bf16.mxu0 %v5122_v45  ;;  %v5141_v45 = vld [vmem:[#allocation12 + $0x3d8] sm:$0xff]  }
 0x210   :  { %3794 = vmatmul.mubr.bf16.vlgmr.msra.gmra.mxu0 %v4305_v47  ;;  %v5145_v47 = vld [vmem:[#allocation12 + $0x3d0] sm:$0xff]  }
 0x211   :  { %4538 = vmatpush3.bf16.msra.mxu0 %v5124_v48  ;;  %3873 = vmatprep.mubr.bf16.mxu0 %v4310_v50  ;;  %v5147_v48 = vld [vmem:[#allocation12 + $0x390] sm:$0xff]   ;;  %v5149_v50 = vld [vmem:[#allocation12 + $0x3c8] sm:$0xff]  }
 0x212   :  { %4539 = vmatprep.subr.bf16.mxu0 %v5126_v51  ;;  %v5151_v51 = vld [vmem:[#allocation12 + $0x388] sm:$0xff]  }
 0x215   :  { %4540 = vmatpush3.bf16.msra.mxu0 %v5128_v53 }
 0x216   :  { %4541 = vmatprep.subr.bf16.mxu0 %v5130_v35 }
 0x219   :  { %4542 = vmatpush3.bf16.msra.mxu0 %v5132_v54  ;;  %v5155_v54 = vld [vmem:[#allocation12 + $0x3c0] sm:$0xff]  }
 0x21a   :  { %4543 = vmatprep.subr.bf16.mxu0 %v5134_v57 }
 0x21d   :  { %4544 = vmatpush3.bf16.msra.mxu0 %v5136_v58 }
 0x21e   :  { %4545 = vmatprep.subr.bf16.mxu0 %v5138_v59 }
 0x221   :  { %4546 = vmatpush3.bf16.msra.mxu0 %v5140_v60 }
 0x222   :  { %4547 = vmatprep.subr.bf16.mxu0 %v5142_v61  ;;  %v5156_v61 = vld [vmem:[#allocation12 + $0x380] sm:$0xff]  }
 0x224   :  { %v2167_v17 = vpop.f32.mrf.mxu0 }
 0x225   :  { %v2208_v1 = vpop.f32.mrf.mxu1  ;;  %4548 = vmatpush3.bf16.msra.mxu0 %v5144_v62 }
 0x226   :  { %v2209_v2 = vadd.f32 %v2208_v1, %v2167_v17  ;;  %v2169_v41 = vpop.f32.mrf.mxu0  ;;  %4549 = vmatprep.subr.bf16.mxu0 %v5146_v63 }
 0x227   :  { %v2210_v49 = vpop.f32.mrf.mxu1 }
 0x228   :  { %v2171_v5 = vpop.f32.mrf.mxu0  ;;  %v2211_v24 = vadd.f32 %v2210_v49, %v2169_v41 }
 0x229   :  { %v2212_v6 = vpop.f32.mrf.mxu1  ;;  %4550 = vmatpush3.bf16.msra.mxu0 %v5148_v3 }
 0x22a   :  { %v2172_v10 = vpop.f32.mrf.mxu0  ;;  %4551 = vmatprep.subr.bf16.mxu0 %v5150_v4 }
 0x22b   :  { %v2213_v11 = vpop.f32.mrf.mxu1 }
 0x22d   :  { %4552 = vmatpush3.bf16.msra.mxu0 %v5152_v7 }
 0x230   :  { %3874 = vmatmul.mubr.bf16.vlgmr.msra.gmra.mxu0 %v4309_v12 }
 0x245   :  { %v4377_v13 = vpop.f32.mrf.mxu1 }
 0x247   :  { %v4378_v14 = vpop.f32.mrf.mxu1 }
 0x248   :  { %v4379_v15 = vadd.f32 %v4378_v14, %v4377_v13 }
 0x249   :  { %v4380_v16 = vpop.f32.mrf.mxu1 }
 0x24b   :  { %v4381_v18 = vpop.f32.mrf.mxu1 }
 0x264   :  { %v2249_v21 = vpop.f32.mrf.mxu0 }
 0x265   :  { %v4399_v23 = vpop.f32.mrf.mxu1  ;;  %v2250_v56 = vadd.f32 %v2249_v21, %v2209_v2  ;;  %v4307_v2 = vcombine.low %v3354_v32, %v3354_v32 }
 0x266   :  { %v2251_v26 = vpop.f32.mrf.mxu0 }
 0x267   :  { %v4400_v27 = vpop.f32.mrf.mxu1  ;;  %v2252_v28 = vadd.f32 %v2251_v26, %v2211_v24  ;;  %v2313_v0 = vadd.f32 %v2298_v22, %v2250_v56 }
 0x268   :  { %v4401_v29 = vadd.f32 %v4400_v27, %v4399_v23  ;;  %v2253_v30 = vpop.f32.mrf.mxu0 }
 0x269   :  { %v4402_v31 = vpop.f32.mrf.mxu1  ;;  %v2314_v33 = vadd.f32 %v2302_v25, %v2252_v28  ;;  %v2319_v40 = vpack.c.bf16 %v2313_v0, %v2313_v0 }
 0x26a   :  { %v2900_v34 = vadd.f32 %v4401_v29, %v4379_v15  ;;  %v2254_v36 = vpop.f32.mrf.mxu0 }
 0x26b   :  { %v4403_v44 = vpop.f32.mrf.mxu1  ;;  %v2320_v37 = vpack.c.bf16 %v2314_v33, %v2314_v33  ;;  %v4359_v33 = vld [vmem:[#allocation14] ss:$0 sm:$0xff] }
 0x26c   :  { %v4360_v44 = vld [vmem:[#allocation15] ss:$0 sm:$0xff] }
 0x26d   :  { %3345 = vmatprep.mubr.bf16.mxu1 %v2320_v37 }
 0x26e   :  { %3346 = vmatmul.mubr.bf16.vlgmr.msra.gmra.mxu1 %v2319_v40 }
 0x26f   :  { %4516 = vmatpush3.bf16.msra.mxu1 %v5127_v39  ;;  %3833 = vmatprep.mubr.bf16.mxu1 %v4308_v38  ;;  %v3902_v38 = vstv %s5511_s8 }
 0x270   :  { %4517 = vmatprep.subr.bf16.mxu1 %v5129_v52 }
 0x273   :  { %4518 = vmatpush3.bf16.msra.mxu1 %v5131_v55 }
 0x274   :  { %4519 = vmatprep.subr.bf16.mxu1 %v5133_v42 }
 0x277   :  { %4520 = vmatpush3.bf16.msra.mxu1 %v5135_v8 }
 0x278   :  { %4521 = vmatprep.subr.bf16.mxu1 %v5137_v43 }
 0x27b   :  { %4522 = vmatpush3.bf16.msra.mxu1 %v5139_v9 }
 0x27c   :  { %4523 = vmatprep.subr.bf16.mxu1 %v5141_v45 }
 0x27f   :  { %4524 = vmatpush3.bf16.msra.mxu1 %v5143_v46 }
 0x280   :  { %4525 = vmatprep.subr.bf16.mxu1 %v5145_v47 }
 0x283   :  { %4526 = vmatpush3.bf16.msra.mxu1 %v5147_v48 }
 0x284   :  { %v4421_v53 = vpop.f32.mrf.mxu0  ;;  %4527 = vmatprep.subr.bf16.mxu1 %v5149_v50 }
 0x285   :  { %v4443_v35 = vpop.f32.mrf.mxu1 }
 0x286   :  { %v4422_v57 = vpop.f32.mrf.mxu0 }
 0x287   :  { %v4444_v58 = vpop.f32.mrf.mxu1  ;;  %v4423_v59 = vadd.f32 %v4422_v57, %v4421_v53  ;;  %4528 = vmatpush3.bf16.msra.mxu1 %v5151_v51 }
 0x288   :  { %v4445_v60 = vadd.f32 %v4444_v58, %v4443_v35  ;;  %4529 = vmatprep.subr.bf16.mxu1 %v5155_v54  ;;  %v4424_v63 = vpop.f32.mrf.mxu0 }
 0x289   :  { %v4446_v62 = vpop.f32.mrf.mxu1  ;;  %v2940_v17 = vadd.f32 %v4423_v59, %v2900_v34 }
 0x28a   :  { %v4425_v3 = vpop.f32.mrf.mxu0 }
 0x28b   :  { %v4447_v1 = vpop.f32.mrf.mxu1  ;;  %v3268_v41 = vadd.f32 %v4445_v60, %v2940_v17  ;;  %4530 = vmatpush3.bf16.msra.mxu1 %v5156_v61 }
 0x28e   :  { %3834 = vmatmul.mubr.bf16.vlgmr.msra.gmra.mxu1 %v4307_v2 }
 0x2b0   :  { %v4465_v49 = vpop.f32.mrf.mxu0 }
 0x2b2   :  { %v4466_v4 = vpop.f32.mrf.mxu0 }
 0x2b3   :  { %v4467_v5 = vadd.f32 %v4466_v4, %v4465_v49 }
 0x2b4   :  { %v4468_v6 = vpop.f32.mrf.mxu0 }
 0x2b5   :  { %v3308_v7 = vadd.f32 %v4467_v5, %v3268_v41 }
 0x2b6   :  { %v4469_v10 = vpop.f32.mrf.mxu0 }
 0x2d0   :  { %v4509_v11 = vpop.f32.mrf.mxu0 }
 0x2d2   :  { %v4510_v12 = vpop.f32.mrf.mxu0 }
 0x2d3   :  { %v4511_v13 = vadd.f32 %v4510_v12, %v4509_v11 }
 0x2d4   :  { %v4512_v14 = vpop.f32.mrf.mxu0 }
 0x2d6   :  { %v4513_v15 = vpop.f32.mrf.mxu0 }
 0x2f0   :  { %v4553_v16 = vpop.f32.mrf.mxu0 }
 0x2f2   :  { %v4554_v18 = vpop.f32.mrf.mxu0 }
 0x2f3   :  { %v4555_v19 = vadd.f32 %v4554_v18, %v4553_v16 }
 0x2f4   :  { %v4556_v20 = vpop.f32.mrf.mxu0 }
 0x2f6   :  { %v4557_v21 = vpop.f32.mrf.mxu0 }
 0x32e   :  { %v4487_v22 = vpop.f32.mrf.mxu1 }
 0x330   :  { %v4488_v23 = vpop.f32.mrf.mxu1 }
 0x331   :  { %v4489_v27 = vadd.f32 %v4488_v23, %v4487_v22 }
 0x332   :  { %v4490_v24 = vpop.f32.mrf.mxu1 }
 0x333   :  { %v3348_v31 = vadd.f32 %v4489_v27, %v3308_v7 }
 0x334   :  { %v4491_v56 = vpop.f32.mrf.mxu1 }
 0x34e   :  { %v4531_v25 = vpop.f32.mrf.mxu1 }
 0x350   :  { %v4532_v26 = vpop.f32.mrf.mxu1 }
 0x351   :  { %v4533_v28 = vadd.f32 %v4532_v26, %v4531_v25 }
 0x352   :  { %v4534_v29 = vpop.f32.mrf.mxu1 }
 0x353   :  { %v3836_v0 = vadd.f32 %v4533_v28, %v4511_v13 }
 0x354   :  { %v4535_v30 = vpop.f32.mrf.mxu1 }
 0x355   :  { %v3876_v32 = vadd.f32 %v4555_v19, %v3836_v0 }
 0x357   :  { %v3881_v34 = vadd.f32 %v3876_v32, %v3348_v31 }
 0x359   :  { %v3889_v36 = vadd.f32 %v4359_v33, %v3881_v34 }
 0x35b   :  { %v3890_v37 = vmax.f32 %v3889_v36, 0.0 }
 0x35d   :  { %v3898_v39 = vmul.f32 %v4360_v44, %v3890_v37 }
 0x35f   :  { %3899 = vadd.xlane.f32.xlu0 %v3898_v39 }
 0x3e8   :  { %v3900_v40 = vpop.xlane.xlu0 %3899 }
 0x3e9   :  { %v3903_v52 = vadd.f32 %v3902_v38, %v3900_v40 }
 0x3eb   :  { %3905 = vst.msk [vmem:[%s5512_s9] sm:$0xff] %vm3904_vm0, %v3903_v52 }
 0x3ec   :  { %3910 = vsyncpa [#allocation5], 1 }
 0x3ed   :  { %3911 = vsyncpa [#allocation7], 1 }
 0x3ee   :  { %3912 = vsyncpa [#allocation10], 1 }
 0x3ef   :  { %3913 = vsyncpa [#allocation13], 1 }
 0x3f0   :  { %3914 = vsyncpa [#allocation16], 1 }

// kernel: tpu_custom_call.1
= control target key start
LH: loop header
LB: loop body
LE: loop exit
PB: predicated region body
PF: predicated region fallthrough
CT: control target
= control target key end

     0   :  { %15 = vsyncpa [#allocation5], 0  ;;  %s5503_s0 = inlined_call_operand.hbm [shape: f32[8,768], index: 0, kind: input, shape index: {}]   ;;  %s5504_s1 = inlined_call_operand.hbm [shape: bf16[8,768], index: 1, kind: input, shape index: {}]   ;;  %s5505_s2 = inlined_call_operand.hbm [shape: bf16[8,768], index: 2, kind: input, shape index: {}]   ;;  %s5506_s3 = inlined_call_operand.hbm [shape: bf16[768,768], index: 3, kind: input, shape index: {}]   ;;  %s5507_s4 = inlined_call_operand.hbm [shape: f32[1,768], index: 4, kind: input, shape index: {}]   ;;  %s5508_s5 = inlined_call_operand.hbm [shape: bf16[2304,128], index: 5, kind: input, shape index: {}]   ;;  %s5509_s6 = inlined_call_operand.hbm [shape: f32[1,128], index: 6, kind: input, shape index: {}]   ;;  %s5510_s7 = inlined_call_operand.hbm [shape: f32[1,128], index: 7, kind: input, shape index: {}]   ;;  %s5511_s8 = inlined_call_operand.<no memory space> [shape: f32[1], index: 8, kind: input, shape index: {}]   ;;  %s5512_s9 = inlined_call_operand.vmem [shape: f32[8,1], index: 9, kind: output, shape index: {}]  }
   0x1   :  { %16 = vsyncpa [#allocation7], 0 }
   0x2   :  { %17 = vsyncpa [#allocation10], 0 }
   0x3   :  { %18 = vsyncpa [#allocation13], 0 }
   0x4   :  { %19 = vsyncpa [#allocation16], 0  ;;  %s5329_s30 = smov [#allocation6]   ;;  %s5330_s11 = smov [#allocation9]  }
   0x5   :  { %s36_s10 = sshll.u32 %s5329_s30, 4  ;;  %s55_s12 = sshll.u32 %s5330_s11, 4  ;;  %s37_s10 = int_to_ptr.vmem [resolvable:$true] %s36_s10  ;;  %s56_s12 = int_to_ptr.vmem [resolvable:$true] %s55_s12 }
   0x6   :  { %s5167_s13 = scalar_lea.vmem %s37_s10, 384  ;;  %p5172_p1 = scmp.lt.s32.totalorder %s37_s10, %s37_s10 }
   0x7   :  { %p5168_p0 = scmp.ne.s32.totalorder %s37_s10, %s5167_s13  ;;  %p5173_p2 = scmp.lt.s32.totalorder %s5167_s13, %s5167_s13 }
   0x9   :  { %p5174_p3 = por %p5173_p2, %p5172_p1 }
   0xb   :  { %p5175_p4 = pnand %p5174_p3, %p5168_p0 }
   0xd   :  { %5178 = shalt.err (!%p5175_p4)
}
   0xe   :  { %39 = dma.hbm_to_vmem [thread:$0]  %s5504_s1, 384, %s37_s10, [#allocation7]  }
   0xf   :  { %s5187_s16 = scalar_lea.vmem %s56_s12, 36864  ;;  %p5192_p6 = scmp.lt.s32.totalorder %s56_s12, %s56_s12 }
  0x10   :  { %p5188_p5 = scmp.ne.s32.totalorder %s56_s12, %s5187_s16  ;;  %p5193_p7 = scmp.lt.s32.totalorder %s5187_s16, %s5187_s16 }
  0x12   :  { %p5194_p8 = por %p5193_p7, %p5192_p6 }
  0x14   :  { %p5195_p9 = pnand %p5194_p8, %p5188_p5 }
  0x16   :  { %5198 = shalt.err (!%p5195_p9)
}
  0x17   :  { %s5331_s17 = smov 384   ;;  %s5332_s18 = smov 24  }
  0x18   :  { %61 = dma.hbm_to_vmem [thread:$0]  %s5506_s3, 36864, %s56_s12, [#allocation10], %s5331_s17, %s5331_s17, %s5332_s18  }
  0x19   :  { %s5333_s21 = smov [#allocation12]  }
  0x1a   :  { %s77_s22 = sshll.u32 %s5333_s21, 4  ;;  %s78_s22 = int_to_ptr.vmem [resolvable:$true] %s77_s22 }
  0x1b   :  { %s5207_s23 = scalar_lea.vmem %s78_s22, 18432  ;;  %p5212_p11 = scmp.lt.s32.totalorder %s78_s22, %s78_s22 }
  0x1c   :  { %p5208_p10 = scmp.ne.s32.totalorder %s78_s22, %s5207_s23  ;;  %p5213_p12 = scmp.lt.s32.totalorder %s5207_s23, %s5207_s23 }
  0x1e   :  { %p5214_p13 = por %p5213_p12, %p5212_p11 }
  0x20   :  { %p5215_p0 = pnand %p5214_p13, %p5208_p10 }
  0x22   :  { %5218 = shalt.err (!%p5215_p0)
}
  0x23   :  { %s5334_s1 = smov 64   ;;  %s5335_s24 = smov 4  }
  0x24   :  { %83 = dma.hbm_to_vmem [thread:$0]  %s5508_s5, 18432, %s78_s22, [#allocation13], %s5334_s1, %s5334_s1, %s5335_s24  }
  0x25   :  { %s5336_s27 = smov [#allocation4]   ;;  %s5337_s3 = smov [#allocation8]  }
  0x26   :  { %s26_s28 = sshll.u32 %s5336_s27, 4  ;;  %s46_s29 = sshll.u32 %s5337_s3, 4  ;;  %s27_s28 = int_to_ptr.vmem [resolvable:$true] %s26_s28  ;;  %s47_s29 = int_to_ptr.vmem [resolvable:$true] %s46_s29 }
  0x27   :  { %s5227_s30 = scalar_lea.vmem %s27_s28, 768  ;;  %p5232_p2 = scmp.lt.s32.totalorder %s27_s28, %s27_s28 }
  0x28   :  { %p5228_p1 = scmp.ne.s32.totalorder %s27_s28, %s5227_s30  ;;  %p5233_p3 = scmp.lt.s32.totalorder %s5227_s30, %s5227_s30 }
  0x2a   :  { %p5234_p4 = por %p5233_p3, %p5232_p2 }
  0x2c   :  { %p5235_p5 = pnand %p5234_p4, %p5228_p1 }
  0x2e   :  { %5238 = shalt.err (!%p5235_p5)
}
  0x2f   :  { %29 = dma.hbm_to_vmem [thread:$0]  %s5503_s0, 768, %s27_s28, [#allocation5]  }
  0x30   :  { %s5247_s12 = scalar_lea.vmem %s47_s29, 384  ;;  %p5252_p7 = scmp.lt.s32.totalorder %s47_s29, %s47_s29 }
  0x31   :  { %p5248_p6 = scmp.ne.s32.totalorder %s47_s29, %s5247_s12  ;;  %p5253_p8 = scmp.lt.s32.totalorder %s5247_s12, %s5247_s12 }
  0x33   :  { %p5254_p9 = por %p5253_p8, %p5252_p7 }
  0x35   :  { %p5255_p10 = pnand %p5254_p9, %p5248_p6 }
  0x37   :  { %5258 = shalt.err (!%p5255_p10)
}
  0x38   :  { %49 = dma.hbm_to_vmem [thread:$0]  %s5505_s2, 384, %s47_s29, [#allocation7]  }
  0x39   :  { %s5338_s14 = smov [#allocation11]   ;;  %s5339_s16 = smov [#allocation14]  }
  0x3a   :  { %s68_s15 = sshll.u32 %s5338_s14, 4  ;;  %s90_s17 = sshll.u32 %s5339_s16, 4  ;;  %s69_s15 = int_to_ptr.vmem [resolvable:$true] %s68_s15  ;;  %s91_s17 = int_to_ptr.vmem [resolvable:$true] %s90_s17 }
  0x3b   :  { %s5267_s18 = scalar_lea.vmem %s69_s15, 96  ;;  %p5272_p12 = scmp.lt.s32.totalorder %s69_s15, %s69_s15 }
  0x3c   :  { %p5268_p11 = scmp.ne.s32.totalorder %s69_s15, %s5267_s18  ;;  %p5273_p13 = scmp.lt.s32.totalorder %s5267_s18, %s5267_s18 }
  0x3e   :  { %p5274_p0 = por %p5273_p13, %p5272_p12 }
  0x40   :  { %p5275_p1 = pnand %p5274_p0, %p5268_p11 }
  0x42   :  { %5278 = shalt.err (!%p5275_p1)
}
  0x43   :  { %71 = dma.hbm_to_vmem [thread:$0]  %s5507_s4, 96, %s69_s15, [#allocation10]  }
  0x44   :  { %s5287_s20 = scalar_lea.vmem %s91_s17, 16  ;;  %s5291_s2 = scalar_lea.vmem %s91_s17, 32 }
  0x45   :  { %p5288_p2 = scmp.ne.s32.totalorder %s91_s17, %s5287_s20  ;;  %p5292_p3 = scmp.lt.s32.totalorder %s91_s17, %s91_s17 }
  0x46   :  { %p5293_p4 = scmp.lt.s32.totalorder %s5291_s2, %s5287_s20 }
  0x48   :  { %p5294_p5 = por %p5293_p4, %p5292_p3 }
  0x4a   :  { %p5295_p6 = pnand %p5294_p5, %p5288_p2 }
  0x4c   :  { %5298 = shalt.err (!%p5295_p6)
}
  0x4d   :  { %93 = dma.hbm_to_vmem [thread:$0]  %s5509_s6, 16, %s91_s17, [#allocation13]  }
  0x4e   :  { %s5340_s23 = smov [#allocation15]  }
  0x4f   :  { %s100_s1 = sshll.u32 %s5340_s23, 4  ;;  %s101_s1 = int_to_ptr.vmem [resolvable:$true] %s100_s1 }
  0x50   :  { %s5307_s24 = scalar_lea.vmem %s101_s1, 16  ;;  %s5311_s25 = scalar_lea.vmem %s101_s1, 32 }
  0x51   :  { %p5308_p7 = scmp.ne.s32.totalorder %s101_s1, %s5307_s24  ;;  %p5312_p8 = scmp.lt.s32.totalorder %s101_s1, %s101_s1 }
  0x52   :  { %p5313_p9 = scmp.lt.s32.totalorder %s5311_s25, %s5307_s24 }
  0x54   :  { %p5314_p10 = por %p5313_p9, %p5312_p8 }
  0x56   :  { %p5315_p11 = pnand %p5314_p10, %p5308_p7 }
  0x58   :  { %5318 = shalt.err (!%p5315_p11)
}
  0x59   :  { %103 = dma.hbm_to_vmem [thread:$0]  %s5510_s7, 16, %s101_s1, [#allocation16]  }
  0x5a   :  { %5319 = dma.done.wait [#allocation5], 768  }
  0x5b   :  { %5320 = vsyncadd [#allocation5], 4294966528 }
  0x5c   :  { %5321 = dma.done.wait [#allocation7], 768  }
  0x5d   :  { %5322 = vsyncadd [#allocation7], 4294966528 }
  0x5e   :  { %5323 = dma.done.wait [#allocation10], 36960  }
  0x5f   :  { %5324 = vsyncadd [#allocation10], 4294930336 }
  0x60   :  { %5325 = dma.done.wait [#allocation13], 18448  }
  0x61   :  { %5326 = vsyncadd [#allocation13], 4294948848 }
  0x62   :  { %5327 = dma.done.wait [#allocation16], 16  }
  0x63   :  { %5328 = vsyncadd [#allocation16], 4294967280  ;;  %v4571_v0 = vld [vmem:[#allocation9 + $0x154] ss:$24 sps:$4 sm:$0xff]   ;;  %v4575_v2 = vld [vmem:[#allocation9 + $0x150] ss:$24 sps:$4 sm:$0xff]  }
  0x64   :  { %v4573_v1 = vld [vmem:[#allocation9 + $0x454] ss:$24 sps:$4 sm:$0xff]   ;;  %1887 = vmatprep.subr.bf16.mxu0 %v4571_v0  ;;  %v4576_v3 = vld [vmem:[#allocation9 + $0x450] ss:$24 sps:$4 sm:$0xff]   ;;  %v4577_v4 = vld [vmem:[#allocation9 + $0x124] ss:$24 sps:$4 sm:$0xff]  }
  0x65   :  { %1928 = vmatprep.subr.bf16.mxu1 %v4573_v1  ;;  %1888 = vmatpush1.bf16.msra.mxu0 %v4575_v2  ;;  %v4579_v5 = vld [vmem:[#allocation9 + $0x424] ss:$24 sps:$4 sm:$0xff]   ;;  %v4581_v6 = vld [vmem:[#allocation9 + $0x120] ss:$24 sps:$4 sm:$0xff]   ;;  %v4583_v8 = vld [vmem:[#allocation9 + $0xf4] ss:$24 sps:$4 sm:$0xff]  }
  0x66   :  { %1929 = vmatpush1.bf16.msra.mxu1 %v4576_v3  ;;  %1889 = vmatprep.subr.bf16.mxu0 %v4577_v4  ;;  %v4582_v7 = vld [vmem:[#allocation9 + $0x420] ss:$24 sps:$4 sm:$0xff]   ;;  %v4585_v9 = vld [vmem:[#allocation9 + $0x3f4] ss:$24 sps:$4 sm:$0xff]   ;;  %v4587_v10 = vld [vmem:[#allocation9 + $0xf0] ss:$24 sps:$4 sm:$0xff]  }
  0x67   :  { %1930 = vmatprep.subr.bf16.mxu1 %v4579_v5  ;;  %v4588_v11 = vld [vmem:[#allocation9 + $0x3f0] ss:$24 sps:$4 sm:$0xff]   ;;  %v4589_v12 = vld [vmem:[#allocation9 + $0xc4] ss:$24 sps:$4 sm:$0xff]   ;;  %v4593_v14 = vld [vmem:[#allocation9 + $0xc0] ss:$24 sps:$4 sm:$0xff]  }
  0x68   :  { %v4591_v13 = vld [vmem:[#allocation9 + $0x3c4] ss:$24 sps:$4 sm:$0xff]   ;;  %v4594_v15 = vld [vmem:[#allocation9 + $0x3c0] ss:$24 sps:$4 sm:$0xff]   ;;  %v4595_v16 = vld [vmem:[#allocation9 + $0x94] ss:$24 sps:$4 sm:$0xff]  }
  0x69   :  { %1890 = vmatpush1.bf16.msra.mxu0 %v4581_v6  ;;  %v4597_v17 = vld [vmem:[#allocation9 + $0x394] ss:$24 sps:$4 sm:$0xff]   ;;  %v4599_v18 = vld [vmem:[#allocation9 + $0x90] ss:$24 sps:$4 sm:$0xff]   ;;  %v4601_v20 = vld [vmem:[#allocation9 + $0x64] ss:$24 sps:$4 sm:$0xff]  }
  0x6a   :  { %1931 = vmatpush1.bf16.msra.mxu1 %v4582_v7  ;;  %1891 = vmatprep.subr.bf16.mxu0 %v4583_v8  ;;  %v4600_v19 = vld [vmem:[#allocation9 + $0x390] ss:$24 sps:$4 sm:$0xff]   ;;  %v4603_v21 = vld [vmem:[#allocation9 + $0x364] ss:$24 sps:$4 sm:$0xff]   ;;  %v4605_v22 = vld [vmem:[#allocation9 + $0x60] ss:$24 sps:$4 sm:$0xff]  }
  0x6b   :  { %1932 = vmatprep.subr.bf16.mxu1 %v4585_v9  ;;  %v4606_v23 = vld [vmem:[#allocation9 + $0x360] ss:$24 sps:$4 sm:$0xff]   ;;  %v4607_v24 = vld [vmem:[#allocation9 + $0x34] ss:$24 sps:$4 sm:$0xff]   ;;  %v4611_v26 = vld [vmem:[#allocation9 + $0x30] ss:$24 sps:$4 sm:$0xff]  }
  0x6c   :  { %v4609_v25 = vld [vmem:[#allocation9 + $0x334] ss:$24 sps:$4 sm:$0xff]   ;;  %v4612_v27 = vld [vmem:[#allocation9 + $0x330] ss:$24 sps:$4 sm:$0xff]   ;;  %v4613_v28 = vld [vmem:[#allocation9 + $0x4] ss:$24 sps:$4 sm:$0xff]  }
  0x6d   :  { %1892 = vmatpush1.bf16.msra.mxu0 %v4587_v10  ;;  %v4615_v29 = vld [vmem:[#allocation9 + $0x304] ss:$24 sps:$4 sm:$0xff]   ;;  %v4617_v30 = vld [vmem:[#allocation9] ss:$24 sps:$4 sm:$0xff]   ;;  %v4619_v32 = vld [vmem:[#allocation9 + $0x2d4] ss:$24 sps:$4 sm:$0xff]  }
  0x6e   :  { %1933 = vmatpush1.bf16.msra.mxu1 %v4588_v11  ;;  %1893 = vmatprep.subr.bf16.mxu0 %v4589_v12  ;;  %v4618_v31 = vld [vmem:[#allocation9 + $0x300] ss:$24 sps:$4 sm:$0xff]   ;;  %v4621_v33 = vld [vmem:[#allocation9 + $0x5d4] ss:$24 sps:$4 sm:$0xff]   ;;  %v4623_v34 = vld [vmem:[#allocation9 + $0x2d0] ss:$24 sps:$4 sm:$0xff]  }
  0x6f   :  { %1934 = vmatprep.subr.bf16.mxu1 %v4591_v13  ;;  %v4624_v35 = vld [vmem:[#allocation9 + $0x5d0] ss:$24 sps:$4 sm:$0xff]   ;;  %v4625_v36 = vld [vmem:[#allocation9 + $0x2a4] ss:$24 sps:$4 sm:$0xff]   ;;  %v4629_v38 = vld [vmem:[#allocation9 + $0x2a0] ss:$24 sps:$4 sm:$0xff]  }
  0x70   :  { %v4627_v37 = vld [vmem:[#allocation9 + $0x5a4] ss:$24 sps:$4 sm:$0xff]   ;;  %v4630_v39 = vld [vmem:[#allocation9 + $0x5a0] ss:$24 sps:$4 sm:$0xff]   ;;  %v4631_v40 = vld [vmem:[#allocation9 + $0x274] ss:$24 sps:$4 sm:$0xff]  }
  0x71   :  { %1894 = vmatpush1.bf16.msra.mxu0 %v4593_v14  ;;  %v4633_v41 = vld [vmem:[#allocation9 + $0x574] ss:$24 sps:$4 sm:$0xff]   ;;  %v4635_v42 = vld [vmem:[#allocation9 + $0x270] ss:$24 sps:$4 sm:$0xff]   ;;  %v4637_v44 = vld [vmem:[#allocation9 + $0x244] ss:$24 sps:$4 sm:$0xff]  }
  0x72   :  { %1935 = vmatpush1.bf16.msra.mxu1 %v4594_v15  ;;  %1895 = vmatprep.subr.bf16.mxu0 %v4595_v16  ;;  %v4636_v43 = vld [vmem:[#allocation9 + $0x570] ss:$24 sps:$4 sm:$0xff]   ;;  %v4639_v45 = vld [vmem:[#allocation9 + $0x544] ss:$24 sps:$4 sm:$0xff]   ;;  %v4641_v47 = vld [vmem:[#allocation9 + $0x240] ss:$24 sps:$4 sm:$0xff]  }
  0x73   :  { %1936 = vmatprep.subr.bf16.mxu1 %v4597_v17  ;;  %v148_v46 = vld [vmem:[#allocation4 + $0x8] sm:$0xff]  ;;  %v4642_v48 = vld [vmem:[#allocation9 + $0x540] ss:$24 sps:$4 sm:$0xff]   ;;  %v4649_v56 = vld [vmem:[#allocation9 + $0x1e4] ss:$24 sps:$4 sm:$0xff]   ;;  %vm3904_vm0 = vcmask 7168  }
  0x74   :  { %v5415_v49 = vpack.c.bf16 %v148_v46, %v148_v46  ;;  %v150_v50 = vld [vmem:[#allocation4 + $0x18] sm:$0xff]  ;;  %v4643_v51 = vld [vmem:[#allocation9 + $0x214] ss:$24 sps:$4 sm:$0xff]   ;;  %v4647_v54 = vld [vmem:[#allocation9 + $0x210] ss:$24 sps:$4 sm:$0xff]  }
  0x75   :  { %1896 = vmatpush1.bf16.msra.mxu0 %v4599_v18  ;;  %v5417_v52 = vpack.c.bf16 %v150_v50, %v150_v50  ;;  %v4645_v53 = vld [vmem:[#allocation9 + $0x514] ss:$24 sps:$4 sm:$0xff]   ;;  %v4648_v55 = vld [vmem:[#allocation9 + $0x510] ss:$24 sps:$4 sm:$0xff]   ;;  %v4651_v57 = vld [vmem:[#allocation9 + $0x4e4] ss:$24 sps:$4 sm:$0xff]  }
  0x76   :  { %1937 = vmatpush1.bf16.msra.mxu1 %v4600_v19  ;;  %1897 = vmatprep.subr.bf16.mxu0 %v4601_v20  ;;  %v4653_v58 = vld [vmem:[#allocation9 + $0x1e0] ss:$24 sps:$4 sm:$0xff]   ;;  %v4655_v60 = vld [vmem:[#allocation9 + $0x1b4] ss:$24 sps:$4 sm:$0xff]   ;;  %v4659_v62 = vld [vmem:[#allocation9 + $0x1b0] ss:$24 sps:$4 sm:$0xff]  }
  0x77   :  { %1938 = vmatprep.subr.bf16.mxu1 %v4603_v21  ;;  %1919 = vmatprep.mubr.bf16.mxu0 %v5415_v49  ;;  %v4654_v59 = vld [vmem:[#allocation9 + $0x4e0] ss:$24 sps:$4 sm:$0xff]   ;;  %v4657_v61 = vld [vmem:[#allocation9 + $0x4b4] ss:$24 sps:$4 sm:$0xff]   ;;  %v4660_v63 = vld [vmem:[#allocation9 + $0x4b0] ss:$24 sps:$4 sm:$0xff]  }
  0x78   :  { %1960 = vmatprep.mubr.bf16.mxu1 %v5417_v52  ;;  %v4661_v0 = vld [vmem:[#allocation9 + $0x184] ss:$24 sps:$4 sm:$0xff]   ;;  %v4665_v2 = vld [vmem:[#allocation9 + $0x180] ss:$24 sps:$4 sm:$0xff]   ;;  %v149_v5 = vld [vmem:[#allocation4 + $0x10] sm:$0xff] }
  0x79   :  { %1898 = vmatpush1.bf16.msra.mxu0 %v4605_v22  ;;  %v4663_v1 = vld [vmem:[#allocation9 + $0x484] ss:$24 sps:$4 sm:$0xff]   ;;  %v4666_v3 = vld [vmem:[#allocation9 + $0x480] ss:$24 sps:$4 sm:$0xff]   ;;  %v4669_v6 = vld [vmem:[#allocation9 + $0x754] ss:$24 sps:$4 sm:$0xff]   ;;  %v5423_v9 = vpack.c.bf16 %v149_v5, %v149_v5 }
  0x7a   :  { %1939 = vmatpush1.bf16.msra.mxu1 %v4606_v23  ;;  %1899 = vmatprep.subr.bf16.mxu0 %v4607_v24  ;;  %v147_v4 = vld [vmem:[#allocation4] sm:$0xff]  ;;  %v4672_v7 = vld [vmem:[#allocation9 + $0x15c] ss:$24 sps:$4 sm:$0xff]   ;;  %v4667_v10 = vld [vmem:[#allocation9 + $0x750] ss:$24 sps:$4 sm:$0xff]  }
  0x7b   :  { %1940 = vmatprep.subr.bf16.mxu1 %v4609_v25  ;;  %v5421_v8 = vpack.c.bf16 %v147_v4, %v147_v4  ;;  %v4670_v11 = vld [vmem:[#allocation9 + $0x158] ss:$24 sps:$4 sm:$0xff]   ;;  %v4675_v12 = vld [vmem:[#allocation9 + $0x724] ss:$24 sps:$4 sm:$0xff]   ;;  %v4676_v15 = vld [vmem:[#allocation9 + $0x128] ss:$24 sps:$4 sm:$0xff]  }
  0x7c   :  { %v4678_v13 = vld [vmem:[#allocation9 + $0x12c] ss:$24 sps:$4 sm:$0xff]   ;;  %v4673_v14 = vld [vmem:[#allocation9 + $0x720] ss:$24 sps:$4 sm:$0xff]   ;;  %v4684_v17 = vld [vmem:[#allocation9 + $0xfc] ss:$24 sps:$4 sm:$0xff]  }
  0x7d   :  { %1900 = vmatpush1.bf16.msra.mxu0 %v4611_v26  ;;  %v4681_v16 = vld [vmem:[#allocation9 + $0x6f4] ss:$24 sps:$4 sm:$0xff]   ;;  %v4679_v18 = vld [vmem:[#allocation9 + $0x6f0] ss:$24 sps:$4 sm:$0xff]   ;;  %v4687_v20 = vld [vmem:[#allocation9 + $0x6c4] ss:$24 sps:$4 sm:$0xff]  }
  0x7e   :  { %1941 = vmatpush1.bf16.msra.mxu1 %v4612_v27  ;;  %1901 = vmatprep.subr.bf16.mxu0 %v4613_v28  ;;  %v4682_v19 = vld [vmem:[#allocation9 + $0xf8] ss:$24 sps:$4 sm:$0xff]   ;;  %v4690_v21 = vld [vmem:[#allocation9 + $0xcc] ss:$24 sps:$4 sm:$0xff]   ;;  %v4688_v23 = vld [vmem:[#allocation9 + $0xc8] ss:$24 sps:$4 sm:$0xff]  }
  0x7f   :  { %1942 = vmatprep.subr.bf16.mxu1 %v4615_v29  ;;  %v4685_v22 = vld [vmem:[#allocation9 + $0x6c0] ss:$24 sps:$4 sm:$0xff]   ;;  %v4693_v24 = vld [vmem:[#allocation9 + $0x694] ss:$24 sps:$4 sm:$0xff]   ;;  %v4691_v26 = vld [vmem:[#allocation9 + $0x690] ss:$24 sps:$4 sm:$0xff]  }
  0x80   :  { %v4696_v25 = vld [vmem:[#allocation9 + $0x9c] ss:$24 sps:$4 sm:$0xff]   ;;  %v4694_v27 = vld [vmem:[#allocation9 + $0x98] ss:$24 sps:$4 sm:$0xff]   ;;  %v4702_v29 = vld [vmem:[#allocation9 + $0x6c] ss:$24 sps:$4 sm:$0xff]  }
  0x81   :  { %1902 = vmatpush1.bf16.msra.mxu0 %v4617_v30  ;;  %v4699_v28 = vld [vmem:[#allocation9 + $0x664] ss:$24 sps:$4 sm:$0xff]   ;;  %v4697_v30 = vld [vmem:[#allocation9 + $0x660] ss:$24 sps:$4 sm:$0xff]   ;;  %v4753_v4 = vld [vmem:[#allocation9 + $0x7b4] ss:$24 sps:$4 sm:$0xff]  }
  0x82   :  { %1943 = vmatpush1.bf16.msra.mxu1 %v4618_v31  ;;  %1903 = vmatprep.subr.bf16.mxu0 %v4619_v32  ;;  %v4700_v31 = vld [vmem:[#allocation9 + $0x68] ss:$24 sps:$4 sm:$0xff]   ;;  %v4705_v32 = vld [vmem:[#allocation9 + $0x634] ss:$24 sps:$4 sm:$0xff]   ;;  %v4723_v46 = vld [vmem:[#allocation9 + $0x8a4] ss:$24 sps:$4 sm:$0xff]  }
  0x83   :  { %1944 = vmatprep.subr.bf16.mxu1 %v4621_v33  ;;  %v4708_v33 = vld [vmem:[#allocation9 + $0x3c] ss:$24 sps:$4 sm:$0xff]   ;;  %v4724_v50 = vld [vmem:[#allocation9 + $0x2a8] ss:$24 sps:$4 sm:$0xff]  }
  0x84   :  { %v4756_v5 = vld [vmem:[#allocation9 + $0x1bc] ss:$24 sps:$4 sm:$0xff]  }
  0x85   :  { %1904 = vmatpush2.bf16.msra.mxu0 %v4623_v34  ;;  %v152_v34 = vld [vmem:[#allocation4 + $0x28] sm:$0xff] }
  0x86   :  { %1945 = vmatpush2.bf16.msra.mxu1 %v4624_v35  ;;  %1905 = vmatprep.subr.bf16.mxu0 %v4625_v36  ;;  %v5428_v35 = vpack.c.bf16 %v152_v34, %v152_v34  ;;  %v4703_v36 = vld [vmem:[#allocation9 + $0x630] ss:$24 sps:$4 sm:$0xff]  }
  0x87   :  { %1946 = vmatprep.subr.bf16.mxu1 %v4627_v37  ;;  %v4706_v37 = vld [vmem:[#allocation9 + $0x38] ss:$24 sps:$4 sm:$0xff]  }
  0x88   :  { %v4787_v34 = vld [vmem:[#allocation9 + $0x398] ss:$24 sps:$4 sm:$0xff]  }
  0x89   :  { %1906 = vmatpush2.bf16.msra.mxu0 %v4629_v38  ;;  %v4711_v38 = vld [vmem:[#allocation9 + $0x604] ss:$24 sps:$4 sm:$0xff]  }
  0x8a   :  { %1947 = vmatpush2.bf16.msra.mxu1 %v4630_v39  ;;  %1907 = vmatprep.subr.bf16.mxu0 %v4631_v40  ;;  %v4714_v39 = vld [vmem:[#allocation9 + $0xc] ss:$24 sps:$4 sm:$0xff]   ;;  %v4709_v40 = vld [vmem:[#allocation9 + $0x600] ss:$24 sps:$4 sm:$0xff]  }
  0x8b   :  { %1948 = vmatprep.subr.bf16.mxu1 %v4633_v41  ;;  %v4712_v41 = vld [vmem:[#allocation9 + $0x8] ss:$24 sps:$4 sm:$0xff]  }
  0x8d   :  { %1908 = vmatpush2.bf16.msra.mxu0 %v4635_v42  ;;  %v4717_v42 = vld [vmem:[#allocation9 + $0x8d4] ss:$24 sps:$4 sm:$0xff]  }
  0x8e   :  { %1949 = vmatpush2.bf16.msra.mxu1 %v4636_v43  ;;  %1909 = vmatprep.subr.bf16.mxu0 %v4637_v44  ;;  %v4720_v43 = vld [vmem:[#allocation9 + $0x2dc] ss:$24 sps:$4 sm:$0xff]   ;;  %v4715_v44 = vld [vmem:[#allocation9 + $0x8d0] ss:$24 sps:$4 sm:$0xff]  }
  0x8f   :  { %1950 = vmatprep.subr.bf16.mxu1 %v4639_v45  ;;  %v4718_v45 = vld [vmem:[#allocation9 + $0x2d8] ss:$24 sps:$4 sm:$0xff]  }
  0x91   :  { %1910 = vmatpush2.bf16.msra.mxu0 %v4641_v47  ;;  %v4726_v47 = vld [vmem:[#allocation9 + $0x2ac] ss:$24 sps:$4 sm:$0xff]  }
  0x92   :  { %1951 = vmatpush2.bf16.msra.mxu1 %v4642_v48  ;;  %1911 = vmatprep.subr.bf16.mxu0 %v4643_v51  ;;  %v4721_v48 = vld [vmem:[#allocation9 + $0x8a0] ss:$24 sps:$4 sm:$0xff]   ;;  %v4729_v51 = vld [vmem:[#allocation9 + $0x874] ss:$24 sps:$4 sm:$0xff]  }
  0x93   :  { %1952 = vmatprep.subr.bf16.mxu1 %v4645_v53  ;;  %v4732_v53 = vld [vmem:[#allocation9 + $0x27c] ss:$24 sps:$4 sm:$0xff]  }
  0x95   :  { %1912 = vmatpush2.bf16.msra.mxu0 %v4647_v54  ;;  %v4727_v54 = vld [vmem:[#allocation9 + $0x870] ss:$24 sps:$4 sm:$0xff]  }
  0x96   :  { %1953 = vmatpush2.bf16.msra.mxu1 %v4648_v55  ;;  %1913 = vmatprep.subr.bf16.mxu0 %v4649_v56  ;;  %v4730_v55 = vld [vmem:[#allocation9 + $0x278] ss:$24 sps:$4 sm:$0xff]   ;;  %v4735_v56 = vld [vmem:[#allocation9 + $0x844] ss:$24 sps:$4 sm:$0xff]  }
  0x97   :  { %1954 = vmatprep.subr.bf16.mxu1 %v4651_v57  ;;  %v4738_v57 = vld [vmem:[#allocation9 + $0x24c] ss:$24 sps:$4 sm:$0xff]  }
  0x99   :  { %1914 = vmatpush2.bf16.msra.mxu0 %v4653_v58  ;;  %v4733_v58 = vld [vmem:[#allocation9 + $0x840] ss:$24 sps:$4 sm:$0xff]  }
  0x9a   :  { %1955 = vmatpush2.bf16.msra.mxu1 %v4654_v59  ;;  %1915 = vmatprep.subr.bf16.mxu0 %v4655_v60  ;;  %v4736_v59 = vld [vmem:[#allocation9 + $0x248] ss:$24 sps:$4 sm:$0xff]   ;;  %v4741_v60 = vld [vmem:[#allocation9 + $0x814] ss:$24 sps:$4 sm:$0xff]  }
  0x9b   :  { %1956 = vmatprep.subr.bf16.mxu1 %v4657_v61  ;;  %v4744_v61 = vld [vmem:[#allocation9 + $0x21c] ss:$24 sps:$4 sm:$0xff]  }
  0x9d   :  { %1916 = vmatpush2.bf16.msra.mxu0 %v4659_v62  ;;  %v4739_v62 = vld [vmem:[#allocation9 + $0x810] ss:$24 sps:$4 sm:$0xff]  }
  0x9e   :  { %1957 = vmatpush2.bf16.msra.mxu1 %v4660_v63  ;;  %1917 = vmatprep.subr.bf16.mxu0 %v4661_v0  ;;  %v4742_v63 = vld [vmem:[#allocation9 + $0x218] ss:$24 sps:$4 sm:$0xff]   ;;  %v4747_v0 = vld [vmem:[#allocation9 + $0x7e4] ss:$24 sps:$4 sm:$0xff]  }
  0x9f   :  { %1958 = vmatprep.subr.bf16.mxu1 %v4663_v1  ;;  %v4750_v1 = vld [vmem:[#allocation9 + $0x1ec] ss:$24 sps:$4 sm:$0xff]  }
  0xa1   :  { %1918 = vmatpush2.bf16.msra.mxu0 %v4665_v2  ;;  %v4745_v2 = vld [vmem:[#allocation9 + $0x7e0] ss:$24 sps:$4 sm:$0xff]  }
  0xa2   :  { %1959 = vmatpush2.bf16.msra.mxu1 %v4666_v3  ;;  %1969 = vmatprep.subr.bf16.mxu0 %v4669_v6  ;;  %v4748_v3 = vld [vmem:[#allocation9 + $0x1e8] ss:$24 sps:$4 sm:$0xff]  }
  0xa3   :  { %2010 = vmatprep.subr.bf16.mxu1 %v4672_v7  ;;  %v4751_v6 = vld [vmem:[#allocation9 + $0x7b0] ss:$24 sps:$4 sm:$0xff]  }
  0xa4   :  { %1920 = vmatmul.mubr.bf16.vlgmr.msra.gmra.mxu0 %v5421_v8  ;;  %v4754_v7 = vld [vmem:[#allocation9 + $0x1b8] ss:$24 sps:$4 sm:$0xff]  }
  0xa5   :  { %1961 = vmatmul.mubr.bf16.vlgmr.msra.gmra.mxu1 %v5423_v9  ;;  %1970 = vmatpush1.bf16.msra.mxu0 %v4667_v10  ;;  %v4759_v10 = vld [vmem:[#allocation9 + $0x784] ss:$24 sps:$4 sm:$0xff]  }
  0xa6   :  { %2011 = vmatpush1.bf16.msra.mxu1 %v4670_v11  ;;  %1971 = vmatprep.subr.bf16.mxu0 %v4675_v12  ;;  %v4762_v11 = vld [vmem:[#allocation9 + $0x18c] ss:$24 sps:$4 sm:$0xff]   ;;  %v4757_v12 = vld [vmem:[#allocation9 + $0x780] ss:$24 sps:$4 sm:$0xff]  }
  0xa7   :  { %2012 = vmatprep.subr.bf16.mxu1 %v4678_v13  ;;  %2042 = vmatprep.mubr.bf16.mxu1 %v5415_v49  ;;  %v4760_v13 = vld [vmem:[#allocation9 + $0x188] ss:$24 sps:$4 sm:$0xff]  }
  0xa8   :  { %2001 = vmatprep.mubr.bf16.mxu0 %v5428_v35 }
  0xa9   :  { %1972 = vmatpush1.bf16.msra.mxu0 %v4673_v14  ;;  %v151_v14 = vld [vmem:[#allocation4 + $0x20] sm:$0xff] }
  0xaa   :  { %2013 = vmatpush1.bf16.msra.mxu1 %v4676_v15  ;;  %1973 = vmatprep.subr.bf16.mxu0 %v4681_v16  ;;  %v4765_v15 = vld [vmem:[#allocation9 + $0x45c] ss:$24 sps:$4 sm:$0xff]  }
  0xab   :  { %2014 = vmatprep.subr.bf16.mxu1 %v4684_v17  ;;  %v4768_v16 = vld [vmem:[#allocation9 + $0x75c] ss:$24 sps:$4 sm:$0xff]   ;;  %v5431_v17 = vpack.c.bf16 %v151_v14, %v151_v14 }
  0xac   :  { %v4852_v14 = vld [vmem:[#allocation9 + $0x7bc] ss:$24 sps:$4 sm:$0xff]  }
  0xad   :  { %1974 = vmatpush1.bf16.msra.mxu0 %v4679_v18  ;;  %v4763_v18 = vld [vmem:[#allocation9 + $0x458] ss:$24 sps:$4 sm:$0xff]  }
  0xae   :  { %2015 = vmatpush1.bf16.msra.mxu1 %v4682_v19  ;;  %1975 = vmatprep.subr.bf16.mxu0 %v4687_v20  ;;  %v4766_v19 = vld [vmem:[#allocation9 + $0x758] ss:$24 sps:$4 sm:$0xff]   ;;  %v4771_v20 = vld [vmem:[#allocation9 + $0x42c] ss:$24 sps:$4 sm:$0xff]  }
  0xaf   :  { %2016 = vmatprep.subr.bf16.mxu1 %v4690_v21  ;;  %v4774_v21 = vld [vmem:[#allocation9 + $0x72c] ss:$24 sps:$4 sm:$0xff]  }
  0xb1   :  { %1976 = vmatpush1.bf16.msra.mxu0 %v4685_v22  ;;  %v4769_v22 = vld [vmem:[#allocation9 + $0x428] ss:$24 sps:$4 sm:$0xff]  }
  0xb2   :  { %2017 = vmatpush1.bf16.msra.mxu1 %v4688_v23  ;;  %1977 = vmatprep.subr.bf16.mxu0 %v4693_v24  ;;  %v4772_v23 = vld [vmem:[#allocation9 + $0x728] ss:$24 sps:$4 sm:$0xff]   ;;  %v4777_v24 = vld [vmem:[#allocation9 + $0x3fc] ss:$24 sps:$4 sm:$0xff]  }
  0xb3   :  { %2018 = vmatprep.subr.bf16.mxu1 %v4696_v25  ;;  %v4780_v25 = vld [vmem:[#allocation9 + $0x6fc] ss:$24 sps:$4 sm:$0xff]  }
  0xb5   :  { %1978 = vmatpush1.bf16.msra.mxu0 %v4691_v26  ;;  %v4775_v26 = vld [vmem:[#allocation9 + $0x3f8] ss:$24 sps:$4 sm:$0xff]  }
  0xb6   :  { %2019 = vmatpush1.bf16.msra.mxu1 %v4694_v27  ;;  %1979 = vmatprep.subr.bf16.mxu0 %v4699_v28  ;;  %v4778_v27 = vld [vmem:[#allocation9 + $0x6f8] ss:$24 sps:$4 sm:$0xff]   ;;  %v4783_v28 = vld [vmem:[#allocation9 + $0x3cc] ss:$24 sps:$4 sm:$0xff]  }
  0xb7   :  { %2020 = vmatprep.subr.bf16.mxu1 %v4702_v29  ;;  %v4786_v29 = vld [vmem:[#allocation9 + $0x6cc] ss:$24 sps:$4 sm:$0xff]  }
  0xb9   :  { %1980 = vmatpush1.bf16.msra.mxu0 %v4697_v30  ;;  %v4781_v30 = vld [vmem:[#allocation9 + $0x3c8] ss:$24 sps:$4 sm:$0xff]  }
  0xba   :  { %2021 = vmatpush1.bf16.msra.mxu1 %v4700_v31  ;;  %1981 = vmatprep.subr.bf16.mxu0 %v4705_v32  ;;  %v4784_v31 = vld [vmem:[#allocation9 + $0x6c8] ss:$24 sps:$4 sm:$0xff]   ;;  %v4789_v32 = vld [vmem:[#allocation9 + $0x39c] ss:$24 sps:$4 sm:$0xff]  }
  0xbb   :  { %2022 = vmatprep.subr.bf16.mxu1 %v4708_v33  ;;  %v4792_v33 = vld [vmem:[#allocation9 + $0x69c] ss:$24 sps:$4 sm:$0xff]  }
  0xbd   :  { %1982 = vmatpush1.bf16.msra.mxu0 %v4703_v36  ;;  %v4790_v36 = vld [vmem:[#allocation9 + $0x698] ss:$24 sps:$4 sm:$0xff]  }
  0xbe   :  { %2023 = vmatpush1.bf16.msra.mxu1 %v4706_v37  ;;  %1983 = vmatprep.subr.bf16.mxu0 %v4711_v38  ;;  %v4795_v37 = vld [vmem:[#allocation9 + $0x36c] ss:$24 sps:$4 sm:$0xff]  }
  0xbf   :  { %2024 = vmatprep.subr.bf16.mxu1 %v4714_v39  ;;  %v4798_v38 = vld [vmem:[#allocation9 + $0x66c] ss:$24 sps:$4 sm:$0xff]   ;;  %v4793_v39 = vld [vmem:[#allocation9 + $0x368] ss:$24 sps:$4 sm:$0xff]  }
  0xc1   :  { %1984 = vmatpush1.bf16.msra.mxu0 %v4709_v40  ;;  %v4796_v40 = vld [vmem:[#allocation9 + $0x668] ss:$24 sps:$4 sm:$0xff]  }
  0xc2   :  { %2025 = vmatpush1.bf16.msra.mxu1 %v4712_v41  ;;  %1985 = vmatprep.subr.bf16.mxu0 %v4717_v42  ;;  %v4801_v41 = vld [vmem:[#allocation9 + $0x33c] ss:$24 sps:$4 sm:$0xff]  }
  0xc3   :  { %2026 = vmatprep.subr.bf16.mxu1 %v4720_v43  ;;  %v4804_v42 = vld [vmem:[#allocation9 + $0x63c] ss:$24 sps:$4 sm:$0xff]   ;;  %v4799_v43 = vld [vmem:[#allocation9 + $0x338] ss:$24 sps:$4 sm:$0xff]  }
  0xc5   :  { %1986 = vmatpush2.bf16.msra.mxu0 %v4715_v44  ;;  %v4802_v44 = vld [vmem:[#allocation9 + $0x638] ss:$24 sps:$4 sm:$0xff]  }
  0xc6   :  { %2027 = vmatpush2.bf16.msra.mxu1 %v4718_v45  ;;  %1987 = vmatprep.subr.bf16.mxu0 %v4723_v46  ;;  %v4807_v45 = vld [vmem:[#allocation9 + $0x30c] ss:$24 sps:$4 sm:$0xff]  }
  0xc7   :  { %2028 = vmatprep.subr.bf16.mxu1 %v4726_v47  ;;  %v4810_v46 = vld [vmem:[#allocation9 + $0x60c] ss:$24 sps:$4 sm:$0xff]   ;;  %v4805_v47 = vld [vmem:[#allocation9 + $0x308] ss:$24 sps:$4 sm:$0xff]  }
  0xc9   :  { %1988 = vmatpush2.bf16.msra.mxu0 %v4721_v48  ;;  %v4808_v48 = vld [vmem:[#allocation9 + $0x608] ss:$24 sps:$4 sm:$0xff]  }
  0xca   :  { %2029 = vmatpush2.bf16.msra.mxu1 %v4724_v50  ;;  %1989 = vmatprep.subr.bf16.mxu0 %v4729_v51  ;;  %v4813_v50 = vld [vmem:[#allocation9 + $0x5dc] ss:$24 sps:$4 sm:$0xff]  }
  0xcb   :  { %2030 = vmatprep.subr.bf16.mxu1 %v4732_v53  ;;  %v4816_v51 = vld [vmem:[#allocation9 + $0x8dc] ss:$24 sps:$4 sm:$0xff]   ;;  %v4811_v53 = vld [vmem:[#allocation9 + $0x5d8] ss:$24 sps:$4 sm:$0xff]  }
  0xcd   :  { %1990 = vmatpush2.bf16.msra.mxu0 %v4727_v54  ;;  %v4814_v54 = vld [vmem:[#allocation9 + $0x8d8] ss:$24 sps:$4 sm:$0xff]  }
  0xce   :  { %2031 = vmatpush2.bf16.msra.mxu1 %v4730_v55  ;;  %1991 = vmatprep.subr.bf16.mxu0 %v4735_v56  ;;  %v4819_v55 = vld [vmem:[#allocation9 + $0x5ac] ss:$24 sps:$4 sm:$0xff]  }
  0xcf   :  { %2032 = vmatprep.subr.bf16.mxu1 %v4738_v57  ;;  %v4822_v56 = vld [vmem:[#allocation9 + $0x8ac] ss:$24 sps:$4 sm:$0xff]   ;;  %v4817_v57 = vld [vmem:[#allocation9 + $0x5a8] ss:$24 sps:$4 sm:$0xff]  }
  0xd1   :  { %1992 = vmatpush2.bf16.msra.mxu0 %v4733_v58  ;;  %v4820_v58 = vld [vmem:[#allocation9 + $0x8a8] ss:$24 sps:$4 sm:$0xff]  }
  0xd2   :  { %2033 = vmatpush2.bf16.msra.mxu1 %v4736_v59  ;;  %1993 = vmatprep.subr.bf16.mxu0 %v4741_v60  ;;  %v4825_v59 = vld [vmem:[#allocation9 + $0x57c] ss:$24 sps:$4 sm:$0xff]  }
  0xd3   :  { %2034 = vmatprep.subr.bf16.mxu1 %v4744_v61  ;;  %v4828_v60 = vld [vmem:[#allocation9 + $0x87c] ss:$24 sps:$4 sm:$0xff]   ;;  %v4823_v61 = vld [vmem:[#allocation9 + $0x578] ss:$24 sps:$4 sm:$0xff]  }
  0xd5   :  { %1994 = vmatpush2.bf16.msra.mxu0 %v4739_v62  ;;  %v4826_v62 = vld [vmem:[#allocation9 + $0x878] ss:$24 sps:$4 sm:$0xff]  }
  0xd6   :  { %2035 = vmatpush2.bf16.msra.mxu1 %v4742_v63  ;;  %1995 = vmatprep.subr.bf16.mxu0 %v4747_v0  ;;  %v4831_v63 = vld [vmem:[#allocation9 + $0x54c] ss:$24 sps:$4 sm:$0xff]  }
  0xd7   :  { %2036 = vmatprep.subr.bf16.mxu1 %v4750_v1  ;;  %v4834_v0 = vld [vmem:[#allocation9 + $0x84c] ss:$24 sps:$4 sm:$0xff]   ;;  %v4829_v1 = vld [vmem:[#allocation9 + $0x548] ss:$24 sps:$4 sm:$0xff]  }
  0xd9   :  { %1996 = vmatpush2.bf16.msra.mxu0 %v4745_v2  ;;  %v4832_v2 = vld [vmem:[#allocation9 + $0x848] ss:$24 sps:$4 sm:$0xff]  }
  0xda   :  { %2037 = vmatpush2.bf16.msra.mxu1 %v4748_v3  ;;  %1997 = vmatprep.subr.bf16.mxu0 %v4753_v4  ;;  %v4837_v3 = vld [vmem:[#allocation9 + $0x51c] ss:$24 sps:$4 sm:$0xff]  }
  0xdb   :  { %2038 = vmatprep.subr.bf16.mxu1 %v4756_v5  ;;  %v4840_v4 = vld [vmem:[#allocation9 + $0x81c] ss:$24 sps:$4 sm:$0xff]   ;;  %v4835_v5 = vld [vmem:[#allocation9 + $0x518] ss:$24 sps:$4 sm:$0xff]  }
  0xdd   :  { %1998 = vmatpush2.bf16.msra.mxu0 %v4751_v6  ;;  %v4838_v6 = vld [vmem:[#allocation9 + $0x818] ss:$24 sps:$4 sm:$0xff]  }
  0xde   :  { %2039 = vmatpush2.bf16.msra.mxu1 %v4754_v7  ;;  %1999 = vmatprep.subr.bf16.mxu0 %v4759_v10  ;;  %v4843_v7 = vld [vmem:[#allocation9 + $0x4ec] ss:$24 sps:$4 sm:$0xff]  }
  0xdf   :  { %2040 = vmatprep.subr.bf16.mxu1 %v4762_v11  ;;  %v4846_v10 = vld [vmem:[#allocation9 + $0x7ec] ss:$24 sps:$4 sm:$0xff]   ;;  %v4841_v11 = vld [vmem:[#allocation9 + $0x4e8] ss:$24 sps:$4 sm:$0xff]  }
  0xe1   :  { %2000 = vmatpush2.bf16.msra.mxu0 %v4757_v12  ;;  %v4844_v12 = vld [vmem:[#allocation9 + $0x7e8] ss:$24 sps:$4 sm:$0xff]  }
  0xe2   :  { %2041 = vmatpush2.bf16.msra.mxu1 %v4760_v13  ;;  %2051 = vmatprep.subr.bf16.mxu0 %v4765_v15  ;;  %v4849_v13 = vld [vmem:[#allocation9 + $0x4bc] ss:$24 sps:$4 sm:$0xff]   ;;  %v4847_v15 = vld [vmem:[#allocation9 + $0x4b8] ss:$24 sps:$4 sm:$0xff]  }
  0xe3   :  { %2092 = vmatprep.subr.bf16.mxu1 %v4768_v16  ;;  %v4850_v16 = vld [vmem:[#allocation9 + $0x7b8] ss:$24 sps:$4 sm:$0xff]  }
  0xe4   :  { %2002 = vmatmul.mubr.bf16.vlgmr.msra.gmra.mxu0 %v5431_v17 }
  0xe5   :  { %2043 = vmatmul.mubr.bf16.vlgmr.msra.gmra.mxu1 %v5421_v8  ;;  %2052 = vmatpush1.bf16.msra.mxu0 %v4763_v18  ;;  %v4855_v18 = vld [vmem:[#allocation9 + $0x48c] ss:$24 sps:$4 sm:$0xff]  }
  0xe6   :  { %2093 = vmatpush1.bf16.msra.mxu1 %v4766_v19  ;;  %2053 = vmatprep.subr.bf16.mxu0 %v4771_v20  ;;  %v4858_v19 = vld [vmem:[#allocation9 + $0x78c] ss:$24 sps:$4 sm:$0xff]   ;;  %v4853_v20 = vld [vmem:[#allocation9 + $0x488] ss:$24 sps:$4 sm:$0xff]  }
  0xe7   :  { %2094 = vmatprep.subr.bf16.mxu1 %v4774_v21  ;;  %2083 = vmatprep.mubr.bf16.mxu0 %v5417_v52  ;;  %v4856_v21 = vld [vmem:[#allocation9 + $0x788] ss:$24 sps:$4 sm:$0xff]  }
  0xe8   :  { %2124 = vmatprep.mubr.bf16.mxu1 %v5428_v35 }
  0xe9   :  { %2054 = vmatpush1.bf16.msra.mxu0 %v4769_v22  ;;  %v4861_v22 = vld [vmem:[#allocation9 + $0x164] ss:$24 sps:$4 sm:$0xff]  }
  0xea   :  { %2095 = vmatpush1.bf16.msra.mxu1 %v4772_v23  ;;  %2055 = vmatprep.subr.bf16.mxu0 %v4777_v24  ;;  %v4864_v23 = vld [vmem:[#allocation9 + $0x464] ss:$24 sps:$4 sm:$0xff]   ;;  %v4859_v24 = vld [vmem:[#allocation9 + $0x160] ss:$24 sps:$4 sm:$0xff]  }
  0xeb   :  { %2096 = vmatprep.subr.bf16.mxu1 %v4780_v25  ;;  %v4862_v25 = vld [vmem:[#allocation9 + $0x460] ss:$24 sps:$4 sm:$0xff]  }
  0xed   :  { %2056 = vmatpush1.bf16.msra.mxu0 %v4775_v26  ;;  %v4867_v26 = vld [vmem:[#allocation9 + $0x134] ss:$24 sps:$4 sm:$0xff]  }
  0xee   :  { %2097 = vmatpush1.bf16.msra.mxu1 %v4778_v27  ;;  %2057 = vmatprep.subr.bf16.mxu0 %v4783_v28  ;;  %v4870_v27 = vld [vmem:[#allocation9 + $0x434] ss:$24 sps:$4 sm:$0xff]   ;;  %v4865_v28 = vld [vmem:[#allocation9 + $0x130] ss:$24 sps:$4 sm:$0xff]  }
  0xef   :  { %2098 = vmatprep.subr.bf16.mxu1 %v4786_v29  ;;  %v4868_v29 = vld [vmem:[#allocation9 + $0x430] ss:$24 sps:$4 sm:$0xff]  }
  0xf1   :  { %2058 = vmatpush1.bf16.msra.mxu0 %v4781_v30  ;;  %v4873_v30 = vld [vmem:[#allocation9 + $0x104] ss:$24 sps:$4 sm:$0xff]  }
  0xf2   :  { %2099 = vmatpush1.bf16.msra.mxu1 %v4784_v31  ;;  %2059 = vmatprep.subr.bf16.mxu0 %v4789_v32  ;;  %v4876_v31 = vld [vmem:[#allocation9 + $0x404] ss:$24 sps:$4 sm:$0xff]   ;;  %v4871_v32 = vld [vmem:[#allocation9 + $0x100] ss:$24 sps:$4 sm:$0xff]  }
  0xf3   :  { %2100 = vmatprep.subr.bf16.mxu1 %v4792_v33  ;;  %v4874_v33 = vld [vmem:[#allocation9 + $0x400] ss:$24 sps:$4 sm:$0xff]  }
  0xf5   :  { %2060 = vmatpush1.bf16.msra.mxu0 %v4787_v34  ;;  %v4879_v34 = vld [vmem:[#allocation9 + $0xd4] ss:$24 sps:$4 sm:$0xff]  }
  0xf6   :  { %2101 = vmatpush1.bf16.msra.mxu1 %v4790_v36  ;;  %2061 = vmatprep.subr.bf16.mxu0 %v4795_v37  ;;  %v4882_v36 = vld [vmem:[#allocation9 + $0x3d4] ss:$24 sps:$4 sm:$0xff]   ;;  %v4877_v37 = vld [vmem:[#allocation9 + $0xd0] ss:$24 sps:$4 sm:$0xff]  }
  0xf7   :  { %2102 = vmatprep.subr.bf16.mxu1 %v4798_v38  ;;  %v4880_v38 = vld [vmem:[#allocation9 + $0x3d0] ss:$24 sps:$4 sm:$0xff]  }
  0xf9   :  { %2062 = vmatpush1.bf16.msra.mxu0 %v4793_v39  ;;  %v4885_v39 = vld [vmem:[#allocation9 + $0xa4] ss:$24 sps:$4 sm:$0xff]  }
  0xfa   :  { %2103 = vmatpush1.bf16.msra.mxu1 %v4796_v40  ;;  %2063 = vmatprep.subr.bf16.mxu0 %v4801_v41  ;;  %v4888_v40 = vld [vmem:[#allocation9 + $0x3a4] ss:$24 sps:$4 sm:$0xff]   ;;  %v4883_v41 = vld [vmem:[#allocation9 + $0xa0] ss:$24 sps:$4 sm:$0xff]  }
  0xfb   :  { %2104 = vmatprep.subr.bf16.mxu1 %v4804_v42  ;;  %v4894_v42 = vld [vmem:[#allocation9 + $0x374] ss:$24 sps:$4 sm:$0xff]  }
  0xfd   :  { %2064 = vmatpush1.bf16.msra.mxu0 %v4799_v43  ;;  %v4889_v43 = vld [vmem:[#allocation9 + $0x70] ss:$24 sps:$4 sm:$0xff]  }
  0xfe   :  { %2105 = vmatpush1.bf16.msra.mxu1 %v4802_v44  ;;  %2065 = vmatprep.subr.bf16.mxu0 %v4807_v45  ;;  %v4892_v44 = vld [vmem:[#allocation9 + $0x370] ss:$24 sps:$4 sm:$0xff]   ;;  %v4897_v45 = vld [vmem:[#allocation9 + $0x44] ss:$24 sps:$4 sm:$0xff]  }
  0xff   :  { %2106 = vmatprep.subr.bf16.mxu1 %v4810_v46  ;;  %v4900_v46 = vld [vmem:[#allocation9 + $0x344] ss:$24 sps:$4 sm:$0xff]  }
 0x101   :  { %2066 = vmatpush1.bf16.msra.mxu0 %v4805_v47  ;;  %v4895_v47 = vld [vmem:[#allocation9 + $0x40] ss:$24 sps:$4 sm:$0xff]  }
 0x102   :  { %2107 = vmatpush1.bf16.msra.mxu1 %v4808_v48  ;;  %2067 = vmatprep.subr.bf16.mxu0 %v4813_v50  ;;  %v4898_v48 = vld [vmem:[#allocation9 + $0x340] ss:$24 sps:$4 sm:$0xff]   ;;  %v4903_v50 = vld [vmem:[#allocation9 + $0x14] ss:$24 sps:$4 sm:$0xff]  }
 0x103   :  { %2108 = vmatprep.subr.bf16.mxu1 %v4816_v51  ;;  %v4906_v51 = vld [vmem:[#allocation9 + $0x314] ss:$24 sps:$4 sm:$0xff]  }
 0x105   :  { %2068 = vmatpush2.bf16.msra.mxu0 %v4811_v53  ;;  %v4901_v53 = vld [vmem:[#allocation9 + $0x10] ss:$24 sps:$4 sm:$0xff]  }
 0x106   :  { %2109 = vmatpush2.bf16.msra.mxu1 %v4814_v54  ;;  %2069 = vmatprep.subr.bf16.mxu0 %v4819_v55  ;;  %v4904_v54 = vld [vmem:[#allocation9 + $0x310] ss:$24 sps:$4 sm:$0xff]   ;;  %v4909_v55 = vld [vmem:[#allocation9 + $0x2e4] ss:$24 sps:$4 sm:$0xff]  }
 0x107   :  { %2110 = vmatprep.subr.bf16.mxu1 %v4822_v56  ;;  %v4912_v56 = vld [vmem:[#allocation9 + $0x5e4] ss:$24 sps:$4 sm:$0xff]  }
 0x109   :  { %2070 = vmatpush2.bf16.msra.mxu0 %v4817_v57  ;;  %v4907_v57 = vld [vmem:[#allocation9 + $0x2e0] ss:$24 sps:$4 sm:$0xff]  }
 0x10a   :  { %2111 = vmatpush2.bf16.msra.mxu1 %v4820_v58  ;;  %2071 = vmatprep.subr.bf16.mxu0 %v4825_v59  ;;  %v4910_v58 = vld [vmem:[#allocation9 + $0x5e0] ss:$24 sps:$4 sm:$0xff]   ;;  %v4915_v59 = vld [vmem:[#allocation9 + $0x2b4] ss:$24 sps:$4 sm:$0xff]  }
 0x10b   :  { %2112 = vmatprep.subr.bf16.mxu1 %v4828_v60  ;;  %v4918_v60 = vld [vmem:[#allocation9 + $0x5b4] ss:$24 sps:$4 sm:$0xff]  }
 0x10d   :  { %2072 = vmatpush2.bf16.msra.mxu0 %v4823_v61  ;;  %v4913_v61 = vld [vmem:[#allocation9 + $0x2b0] ss:$24 sps:$4 sm:$0xff]  }
 0x10e   :  { %2113 = vmatpush2.bf16.msra.mxu1 %v4826_v62  ;;  %2073 = vmatprep.subr.bf16.mxu0 %v4831_v63  ;;  %v4916_v62 = vld [vmem:[#allocation9 + $0x5b0] ss:$24 sps:$4 sm:$0xff]   ;;  %v4921_v63 = vld [vmem:[#allocation9 + $0x284] ss:$24 sps:$4 sm:$0xff]  }
 0x10f   :  { %2114 = vmatprep.subr.bf16.mxu1 %v4834_v0  ;;  %v4924_v0 = vld [vmem:[#allocation9 + $0x584] ss:$24 sps:$4 sm:$0xff]  }
 0x111   :  { %2074 = vmatpush2.bf16.msra.mxu0 %v4829_v1  ;;  %v4919_v1 = vld [vmem:[#allocation9 + $0x280] ss:$24 sps:$4 sm:$0xff]  }
 0x112   :  { %2115 = vmatpush2.bf16.msra.mxu1 %v4832_v2  ;;  %2075 = vmatprep.subr.bf16.mxu0 %v4837_v3  ;;  %v4922_v2 = vld [vmem:[#allocation9 + $0x580] ss:$24 sps:$4 sm:$0xff]   ;;  %v4927_v3 = vld [vmem:[#allocation9 + $0x254] ss:$24 sps:$4 sm:$0xff]  }
 0x113   :  { %2116 = vmatprep.subr.bf16.mxu1 %v4840_v4  ;;  %v4930_v4 = vld [vmem:[#allocation9 + $0x554] ss:$24 sps:$4 sm:$0xff]  }
 0x115   :  { %2076 = vmatpush2.bf16.msra.mxu0 %v4835_v5  ;;  %v4925_v5 = vld [vmem:[#allocation9 + $0x250] ss:$24 sps:$4 sm:$0xff]  }
 0x116   :  { %2117 = vmatpush2.bf16.msra.mxu1 %v4838_v6  ;;  %2077 = vmatprep.subr.bf16.mxu0 %v4843_v7  ;;  %v4928_v6 = vld [vmem:[#allocation9 + $0x550] ss:$24 sps:$4 sm:$0xff]   ;;  %v4933_v7 = vld [vmem:[#allocation9 + $0x224] ss:$24 sps:$4 sm:$0xff]  }
 0x117   :  { %2118 = vmatprep.subr.bf16.mxu1 %v4846_v10  ;;  %v4936_v10 = vld [vmem:[#allocation9 + $0x524] ss:$24 sps:$4 sm:$0xff]  }
 0x119   :  { %2078 = vmatpush2.bf16.msra.mxu0 %v4841_v11  ;;  %v4931_v11 = vld [vmem:[#allocation9 + $0x220] ss:$24 sps:$4 sm:$0xff]  }
 0x11a   :  { %2119 = vmatpush2.bf16.msra.mxu1 %v4844_v12  ;;  %2079 = vmatprep.subr.bf16.mxu0 %v4849_v13  ;;  %v4934_v12 = vld [vmem:[#allocation9 + $0x520] ss:$24 sps:$4 sm:$0xff]   ;;  %v4939_v13 = vld [vmem:[#allocation9 + $0x1f4] ss:$24 sps:$4 sm:$0xff]  }
 0x11b   :  { %2120 = vmatprep.subr.bf16.mxu1 %v4852_v14  ;;  %v4942_v14 = vld [vmem:[#allocation9 + $0x4f4] ss:$24 sps:$4 sm:$0xff]  }
 0x11d   :  { %2080 = vmatpush2.bf16.msra.mxu0 %v4847_v15  ;;  %v4937_v15 = vld [vmem:[#allocation9 + $0x1f0] ss:$24 sps:$4 sm:$0xff]  }
 0x11e   :  { %2121 = vmatpush2.bf16.msra.mxu1 %v4850_v16  ;;  %2081 = vmatprep.subr.bf16.mxu0 %v4855_v18  ;;  %v4940_v16 = vld [vmem:[#allocation9 + $0x4f0] ss:$24 sps:$4 sm:$0xff]   ;;  %v4945_v18 = vld [vmem:[#allocation9 + $0x1c4] ss:$24 sps:$4 sm:$0xff]  }
 0x11f   :  { %2122 = vmatprep.subr.bf16.mxu1 %v4858_v19  ;;  %v4948_v19 = vld [vmem:[#allocation9 + $0x4c4] ss:$24 sps:$4 sm:$0xff]  }
 0x121   :  { %2082 = vmatpush2.bf16.msra.mxu0 %v4853_v20  ;;  %v4943_v20 = vld [vmem:[#allocation9 + $0x1c0] ss:$24 sps:$4 sm:$0xff]  }
 0x122   :  { %2123 = vmatpush2.bf16.msra.mxu1 %v4856_v21  ;;  %2133 = vmatprep.subr.bf16.mxu0 %v4861_v22  ;;  %v4946_v21 = vld [vmem:[#allocation9 + $0x4c0] ss:$24 sps:$4 sm:$0xff]   ;;  %v4951_v22 = vld [vmem:[#allocation9 + $0x194] ss:$24 sps:$4 sm:$0xff]  }
 0x123   :  { %2174 = vmatprep.subr.bf16.mxu1 %v4864_v23  ;;  %v4954_v23 = vld [vmem:[#allocation9 + $0x494] ss:$24 sps:$4 sm:$0xff]  }
 0x124   :  { %2084 = vmatmul.mubr.bf16.vlgmr.msra.gmra.mxu0 %v5423_v9 }
 0x125   :  { %2125 = vmatmul.mubr.bf16.vlgmr.msra.gmra.mxu1 %v5431_v17  ;;  %2134 = vmatpush1.bf16.msra.mxu0 %v4859_v24  ;;  %v4949_v24 = vld [vmem:[#allocation9 + $0x190] ss:$24 sps:$4 sm:$0xff]  }
 0x126   :  { %2175 = vmatpush1.bf16.msra.mxu1 %v4862_v25  ;;  %2135 = vmatprep.subr.bf16.mxu0 %v4867_v26  ;;  %v4952_v25 = vld [vmem:[#allocation9 + $0x490] ss:$24 sps:$4 sm:$0xff]   ;;  %v4957_v26 = vld [vmem:[#allocation9 + $0x764] ss:$24 sps:$4 sm:$0xff]  }
 0x127   :  { %2176 = vmatprep.subr.bf16.mxu1 %v4870_v27  ;;  %2165 = vmatprep.mubr.bf16.mxu0 %v5415_v49  ;;  %v4886_v49 = vld [vmem:[#allocation9 + $0x3a0] ss:$24 sps:$4 sm:$0xff]  }
 0x128   :  { %2206 = vmatprep.mubr.bf16.mxu1 %v5417_v52  ;;  %v4891_v52 = vld [vmem:[#allocation9 + $0x74] ss:$24 sps:$4 sm:$0xff]   ;;  %v4958_v27 = vld [vmem:[#allocation12 + $0x1f8] sm:$0xff]  }
 0x129   :  { %2136 = vmatpush1.bf16.msra.mxu0 %v4865_v28  ;;  %v4955_v28 = vld [vmem:[#allocation9 + $0x760] ss:$24 sps:$4 sm:$0xff]  }
 0x12a   :  { %2177 = vmatpush1.bf16.msra.mxu1 %v4868_v29  ;;  %2137 = vmatprep.subr.bf16.mxu0 %v4873_v30  ;;  %v4959_v29 = vld [vmem:[#allocation12 + $0x1b8] sm:$0xff]   ;;  %v5441_v30 = vld [vmem:[#allocation6] sm:$0xff] }
 0x12b   :  { %2178 = vmatprep.subr.bf16.mxu1 %v4876_v31  ;;  %v4962_v31 = vld [vmem:[#allocation9 + $0x734] ss:$24 sps:$4 sm:$0xff]  }
 0x12d   :  { %2138 = vmatpush1.bf16.msra.mxu0 %v4871_v32  ;;  %v4963_v32 = vld [vmem:[#allocation12 + $0x1f0] sm:$0xff]  }
 0x12e   :  { %2179 = vmatpush1.bf16.msra.mxu1 %v4874_v33  ;;  %2139 = vmatprep.subr.bf16.mxu0 %v4879_v34  ;;  %v4960_v33 = vld [vmem:[#allocation9 + $0x730] ss:$24 sps:$4 sm:$0xff]   ;;  %v4204_v34 = vcombine.high %v5441_v30, %v5441_v30 }
 0x12f   :  { %2180 = vmatprep.subr.bf16.mxu1 %v4882_v36 }
 0x131   :  { %2140 = vmatpush1.bf16.msra.mxu0 %v4877_v37 }
 0x132   :  { %2181 = vmatpush1.bf16.msra.mxu1 %v4880_v38  ;;  %2141 = vmatprep.subr.bf16.mxu0 %v4885_v39  ;;  %v4964_v38 = vld [vmem:[#allocation12 + $0x1b0] sm:$0xff]  }
 0x133   :  { %2182 = vmatprep.subr.bf16.mxu1 %v4888_v40  ;;  %v4967_v40 = vld [vmem:[#allocation9 + $0x704] ss:$24 sps:$4 sm:$0xff]  }
 0x135   :  { %2142 = vmatpush1.bf16.msra.mxu0 %v4883_v41 }
 0x136   :  { %2183 = vmatpush1.bf16.msra.mxu1 %v4886_v49  ;;  %2143 = vmatprep.subr.bf16.mxu0 %v4891_v52  ;;  %v4968_v52 = vld [vmem:[#allocation12 + $0x1e8] sm:$0xff]  }
 0x137   :  { %2184 = vmatprep.subr.bf16.mxu1 %v4894_v42  ;;  %v4965_v42 = vld [vmem:[#allocation9 + $0x700] ss:$24 sps:$4 sm:$0xff]  }
 0x139   :  { %2144 = vmatpush1.bf16.msra.mxu0 %v4889_v43  ;;  %v4969_v43 = vld [vmem:[#allocation12 + $0x1a8] sm:$0xff]  }
 0x13a   :  { %2185 = vmatpush1.bf16.msra.mxu1 %v4892_v44  ;;  %2145 = vmatprep.subr.bf16.mxu0 %v4897_v45  ;;  %v4972_v44 = vld [vmem:[#allocation9 + $0x6d4] ss:$24 sps:$4 sm:$0xff]  }
 0x13b   :  { %2186 = vmatprep.subr.bf16.mxu1 %v4900_v46  ;;  %v4973_v46 = vld [vmem:[#allocation12 + $0x1e0] sm:$0xff]  }
 0x13d   :  { %2146 = vmatpush1.bf16.msra.mxu0 %v4895_v47 }
 0x13e   :  { %2187 = vmatpush1.bf16.msra.mxu1 %v4898_v48  ;;  %2147 = vmatprep.subr.bf16.mxu0 %v4903_v50  ;;  %v4970_v48 = vld [vmem:[#allocation9 + $0x6d0] ss:$24 sps:$4 sm:$0xff]  }
 0x13f   :  { %2188 = vmatprep.subr.bf16.mxu1 %v4906_v51  ;;  %v4974_v50 = vld [vmem:[#allocation12 + $0x1a0] sm:$0xff]  }
 0x140   :  { %v4977_v51 = vld [vmem:[#allocation9 + $0x6a4] ss:$24 sps:$4 sm:$0xff]  }
 0x141   :  { %2148 = vmatpush1.bf16.msra.mxu0 %v4901_v53  ;;  %v4978_v53 = vld [vmem:[#allocation12 + $0x1d8] sm:$0xff]  }
 0x142   :  { %2189 = vmatpush1.bf16.msra.mxu1 %v4904_v54  ;;  %2149 = vmatprep.subr.bf16.mxu0 %v4909_v55  ;;  %v4979_v54 = vld [vmem:[#allocation12 + $0x198] sm:$0xff]   ;;  %v4982_v55 = vld [vmem:[#allocation9 + $0x674] ss:$24 sps:$4 sm:$0xff]  }
 0x143   :  { %2190 = vmatprep.subr.bf16.mxu1 %v4912_v56  ;;  %v4983_v56 = vld [vmem:[#allocation12 + $0x1d0] sm:$0xff]  }
 0x145   :  { %2150 = vmatpush2.bf16.msra.mxu0 %v4907_v57  ;;  %v4980_v57 = vld [vmem:[#allocation9 + $0x670] ss:$24 sps:$4 sm:$0xff]  }
 0x146   :  { %2191 = vmatpush2.bf16.msra.mxu1 %v4910_v58  ;;  %2151 = vmatprep.subr.bf16.mxu0 %v4915_v59  ;;  %v4984_v58 = vld [vmem:[#allocation12 + $0x190] sm:$0xff]  }
 0x147   :  { %2192 = vmatprep.subr.bf16.mxu1 %v4918_v60  ;;  %v4987_v59 = vld [vmem:[#allocation9 + $0x644] ss:$24 sps:$4 sm:$0xff]   ;;  %v4988_v60 = vld [vmem:[#allocation12 + $0x1c8] sm:$0xff]  }
 0x149   :  { %2152 = vmatpush2.bf16.msra.mxu0 %v4913_v61  ;;  %v4985_v61 = vld [vmem:[#allocation9 + $0x640] ss:$24 sps:$4 sm:$0xff]  }
 0x14a   :  { %2193 = vmatpush2.bf16.msra.mxu1 %v4916_v62  ;;  %2153 = vmatprep.subr.bf16.mxu0 %v4921_v63  ;;  %v4989_v62 = vld [vmem:[#allocation12 + $0x188] sm:$0xff]  }
 0x14b   :  { %2194 = vmatprep.subr.bf16.mxu1 %v4924_v0  ;;  %v4992_v63 = vld [vmem:[#allocation9 + $0x614] ss:$24 sps:$4 sm:$0xff]  }
 0x14c   :  { %v4993_v0 = vld [vmem:[#allocation12 + $0x1c0] sm:$0xff]  }
 0x14d   :  { %2154 = vmatpush2.bf16.msra.mxu0 %v4919_v1  ;;  %v4990_v1 = vld [vmem:[#allocation9 + $0x610] ss:$24 sps:$4 sm:$0xff]  }
 0x14e   :  { %2195 = vmatpush2.bf16.msra.mxu1 %v4922_v2  ;;  %2155 = vmatprep.subr.bf16.mxu0 %v4927_v3  ;;  %v4994_v2 = vld [vmem:[#allocation12 + $0x180] sm:$0xff]  }
 0x14f   :  { %2196 = vmatprep.subr.bf16.mxu1 %v4930_v4  ;;  %v4997_v3 = vld [vmem:[#allocation9 + $0x8e4] ss:$24 sps:$4 sm:$0xff]  }
 0x150   :  { %v5000_v4 = vld [vmem:[#allocation12 + $0x278] sm:$0xff]  }
 0x151   :  { %2156 = vmatpush2.bf16.msra.mxu0 %v4925_v5  ;;  %v5454_v5 = vld [vmem:[#allocation6 + $0x8] sm:$0xff] }
 0x152   :  { %2197 = vmatpush2.bf16.msra.mxu1 %v4928_v6  ;;  %2157 = vmatprep.subr.bf16.mxu0 %v4933_v7  ;;  %v4995_v6 = vld [vmem:[#allocation9 + $0x8e0] ss:$24 sps:$4 sm:$0xff]  }
 0x153   :  { %2198 = vmatprep.subr.bf16.mxu1 %v4936_v10  ;;  %v5001_v7 = vld [vmem:[#allocation12 + $0x238] sm:$0xff]   ;;  %v4203_v10 = vcombine.low %v5441_v30, %v5441_v30  ;;  %v5025_v30 = vld [vmem:[#allocation12 + $0x250] sm:$0xff]  }
 0x155   :  { %2158 = vmatpush2.bf16.msra.mxu0 %v4931_v11  ;;  %v5004_v11 = vld [vmem:[#allocation9 + $0x8b4] ss:$24 sps:$4 sm:$0xff]  }
 0x156   :  { %2199 = vmatpush2.bf16.msra.mxu1 %v4934_v12  ;;  %2159 = vmatprep.subr.bf16.mxu0 %v4939_v13  ;;  %v5005_v12 = vld [vmem:[#allocation12 + $0x270] sm:$0xff]   ;;  %v5002_v13 = vld [vmem:[#allocation9 + $0x8b0] ss:$24 sps:$4 sm:$0xff]  }
 0x157   :  { %2200 = vmatprep.subr.bf16.mxu1 %v4942_v14  ;;  %v5006_v14 = vld [vmem:[#allocation12 + $0x230] sm:$0xff]  }
 0x159   :  { %2160 = vmatpush2.bf16.msra.mxu0 %v4937_v15  ;;  %v4206_v15 = vcombine.high %v5454_v5, %v5454_v5 }
 0x15a   :  { %2201 = vmatpush2.bf16.msra.mxu1 %v4940_v16  ;;  %2161 = vmatprep.subr.bf16.mxu0 %v4945_v18  ;;  %v5009_v16 = vld [vmem:[#allocation9 + $0x884] ss:$24 sps:$4 sm:$0xff]   ;;  %v5010_v18 = vld [vmem:[#allocation12 + $0x268] sm:$0xff]  }
 0x15b   :  { %2202 = vmatprep.subr.bf16.mxu1 %v4948_v19  ;;  %v5007_v19 = vld [vmem:[#allocation9 + $0x880] ss:$24 sps:$4 sm:$0xff]  }
 0x15d   :  { %2162 = vmatpush2.bf16.msra.mxu0 %v4943_v20  ;;  %v5011_v20 = vld [vmem:[#allocation12 + $0x228] sm:$0xff]  }
 0x15e   :  { %2203 = vmatpush2.bf16.msra.mxu1 %v4946_v21  ;;  %2163 = vmatprep.subr.bf16.mxu0 %v4951_v22  ;;  %v5014_v21 = vld [vmem:[#allocation9 + $0x854] ss:$24 sps:$4 sm:$0xff]  }
 0x15f   :  { %2204 = vmatprep.subr.bf16.mxu1 %v4954_v23  ;;  %v5015_v22 = vld [vmem:[#allocation12 + $0x260] sm:$0xff]  }
 0x160   :  { %v5012_v23 = vld [vmem:[#allocation9 + $0x850] ss:$24 sps:$4 sm:$0xff]  }
 0x161   :  { %2164 = vmatpush2.bf16.msra.mxu0 %v4949_v24  ;;  %v5016_v24 = vld [vmem:[#allocation12 + $0x220] sm:$0xff]  }
 0x162   :  { %2205 = vmatpush2.bf16.msra.mxu1 %v4952_v25  ;;  %2215 = vmatprep.subr.bf16.mxu0 %v4957_v26  ;;  %v5019_v25 = vld [vmem:[#allocation9 + $0x824] ss:$24 sps:$4 sm:$0xff]  }
 0x163   :  { %4361 = vmatprep.subr.bf16.mxu1 %v4958_v27  ;;  %v5020_v26 = vld [vmem:[#allocation12 + $0x258] sm:$0xff]  }
 0x164   :  { %v1921_v36 = vpop.f32.mrf.mxu0  ;;  %2166 = vmatmul.mubr.bf16.vlgmr.msra.gmra.mxu0 %v5421_v8  ;;  %v5017_v27 = vld [vmem:[#allocation9 + $0x820] ss:$24 sps:$4 sm:$0xff]  }
 0x165   :  { %v1962_v37 = vpop.f32.mrf.mxu1  ;;  %2207 = vmatmul.mubr.bf16.vlgmr.msra.gmra.mxu1 %v5423_v9  ;;  %2216 = vmatpush1.bf16.msra.mxu0 %v4955_v28  ;;  %v5021_v28 = vld [vmem:[#allocation12 + $0x218] sm:$0xff]  }
 0x166   :  { %v5447_v39 = vadd.f32 %v1962_v37, %v1921_v36  ;;  %4362 = vmatpush3.bf16.msra.mxu1 %v4959_v29  ;;  %v5449_v41 = vpop.f32.mrf.mxu0  ;;  %2217 = vmatprep.subr.bf16.mxu0 %v4962_v31  ;;  %v5024_v29 = vld [vmem:[#allocation9 + $0x7f4] ss:$24 sps:$4 sm:$0xff]   ;;  %v5022_v31 = vld [vmem:[#allocation9 + $0x7f0] ss:$24 sps:$4 sm:$0xff]   ;;  %v5027_v36 = vld [vmem:[#allocation9 + $0x7c0] ss:$24 sps:$4 sm:$0xff]  }
 0x167   :  { %v5451_v49 = vpop.f32.mrf.mxu1  ;;  %4363 = vmatprep.subr.bf16.mxu1 %v4963_v32  ;;  %2857 = vmatprep.mubr.bf16.mxu1 %v4204_v34  ;;  %v5026_v32 = vld [vmem:[#allocation12 + $0x210] sm:$0xff]   ;;  %v5030_v34 = vld [vmem:[#allocation12 + $0x248] sm:$0xff]  }
 0x168   :  { %2247 = vmatprep.mubr.bf16.mxu0 %v5428_v35  ;;  %v1925_v8 = vpop.f32.mrf.mxu0  ;;  %v4975_v35 = vld [vmem:[#allocation9 + $0x6a0] ss:$24 sps:$4 sm:$0xff]   ;;  %v5031_v37 = vld [vmem:[#allocation12 + $0x208] sm:$0xff]  }
 0x169   :  { %v1966_v9 = vpop.f32.mrf.mxu1  ;;  %2218 = vmatpush1.bf16.msra.mxu0 %v4960_v33  ;;  %v5029_v33 = vld [vmem:[#allocation9 + $0x7c4] ss:$24 sps:$4 sm:$0xff]   ;;  %v2279_v8 = vlaneseq }
 0x16a   :  { %4364 = vmatpush3.bf16.msra.mxu1 %v4964_v38  ;;  %v1926_v45 = vpop.f32.mrf.mxu0  ;;  %2219 = vmatprep.subr.bf16.mxu0 %v4967_v40  ;;  %v5034_v38 = vld [vmem:[#allocation9 + $0x794] ss:$24 sps:$4 sm:$0xff]   ;;  %v5040_v9 = vld [vmem:[#allocation12 + $0x78] sm:$0xff]  }
 0x16b   :  { %4365 = vmatprep.subr.bf16.mxu1 %v4968_v52  ;;  %v1967_v47 = vpop.f32.mrf.mxu1  ;;  %v5035_v40 = vld [vmem:[#allocation12 + $0x240] sm:$0xff]   ;;  %v4205_v45 = vcombine.low %v5454_v5, %v5454_v5 }
 0x16c   :  { %v5032_v52 = vld [vmem:[#allocation9 + $0x790] ss:$24 sps:$4 sm:$0xff]   ;;  %v5041_v47 = vld [vmem:[#allocation12 + $0x2b8] sm:$0xff]  }
 0x16d   :  { %2220 = vmatpush1.bf16.msra.mxu0 %v4965_v42  ;;  %v5036_v42 = vld [vmem:[#allocation12 + $0x200] sm:$0xff]  }
 0x16e   :  { %4366 = vmatpush3.bf16.msra.mxu1 %v4969_v43  ;;  %2221 = vmatprep.subr.bf16.mxu0 %v4972_v44  ;;  %v5039_v43 = vld [vmem:[#allocation12 + $0x2f8] sm:$0xff]   ;;  %v5460_v44 = vshrl.u32 %v2279_v8, 7  ;;  %v5051_v5 = vld [vmem:[#allocation12 + $0x2e0] sm:$0xff]   ;;  %v5076_v8 = vld [vmem:[#allocation12 + $0xb0] sm:$0xff]  }
 0x16f   :  { %4367 = vmatprep.subr.bf16.mxu1 %v4973_v46  ;;  %v5464_v46 = vld [vmem:[#allocation6 + $0x10] sm:$0xff] }
 0x171   :  { %2222 = vmatpush1.bf16.msra.mxu0 %v4970_v48  ;;  %v5042_v48 = vld [vmem:[#allocation12 + $0x38] sm:$0xff]  }
 0x172   :  { %4368 = vmatpush3.bf16.msra.mxu1 %v4974_v50  ;;  %2223 = vmatprep.subr.bf16.mxu0 %v4977_v51  ;;  %v2285_v50 = vsub.s32 1, %v5460_v44  ;;  %v5043_v51 = vld [vmem:[#allocation12 + $0x2f0] sm:$0xff]  }
 0x173   :  { %4369 = vmatprep.subr.bf16.mxu1 %v4978_v53  ;;  %v5044_v53 = vld [vmem:[#allocation12 + $0x70] sm:$0xff]  }
 0x175   :  { %2224 = vmatpush1.bf16.msra.mxu0 %v4975_v35  ;;  %v4208_v35 = vcombine.high %v5464_v46, %v5464_v46 }
 0x176   :  { %4370 = vmatpush3.bf16.msra.mxu1 %v4979_v54  ;;  %2225 = vmatprep.subr.bf16.mxu0 %v4982_v55  ;;  %v5471_v55 = vld [vmem:[#allocation11] sm:$0x3f] }
 0x177   :  { %4371 = vmatprep.subr.bf16.mxu1 %v4983_v56 }
 0x179   :  { %2226 = vmatpush1.bf16.msra.mxu0 %v4980_v57  ;;  %v1965_v57 = vadd.f32 %v5451_v49, %v5449_v41  ;;  %v5049_v41 = vld [vmem:[#allocation12 + $0x2a8] sm:$0xff]  }
 0x17a   :  { %4372 = vmatpush3.bf16.msra.mxu1 %v4984_v58  ;;  %2227 = vmatprep.subr.bf16.mxu0 %v4987_v59  ;;  %v2286_v58 = vrot.slane %v5471_v55, %v2285_v50  ;;  %v5045_v59 = vld [vmem:[#allocation12 + $0x2b0] sm:$0xff]   ;;  %v5050_v49 = vld [vmem:[#allocation12 + $0x28] sm:$0xff]   ;;  %v5103_v50 = vld [vmem:[#allocation12 + $0x160] sm:$0xff]  }
 0x17b   :  { %4373 = vmatprep.subr.bf16.mxu1 %v4988_v60  ;;  %v5046_v60 = vld [vmem:[#allocation12 + $0x30] sm:$0xff]  }
 0x17d   :  { %2228 = vmatpush1.bf16.msra.mxu0 %v4985_v61 }
 0x17e   :  { %4374 = vmatpush3.bf16.msra.mxu1 %v4989_v62  ;;  %2229 = vmatprep.subr.bf16.mxu0 %v4992_v63  ;;  %v5047_v62 = vld [vmem:[#allocation12 + $0x2e8] sm:$0xff]  }
 0x17f   :  { %4375 = vmatprep.subr.bf16.mxu1 %v4993_v0  ;;  %v5048_v63 = vld [vmem:[#allocation12 + $0x68] sm:$0xff]  }
 0x181   :  { %2230 = vmatpush1.bf16.msra.mxu0 %v4990_v1 }
 0x182   :  { %4376 = vmatpush3.bf16.msra.mxu1 %v4994_v2  ;;  %2231 = vmatprep.subr.bf16.mxu0 %v4997_v3 }
 0x183   :  { %4383 = vmatprep.subr.bf16.mxu1 %v5000_v4 }
 0x185   :  { %2858 = vmatmul.mubr.bf16.vlgmr.msra.gmra.mxu1 %v4203_v10  ;;  %2232 = vmatpush2.bf16.msra.mxu0 %v4995_v6  ;;  %v5052_v10 = vld [vmem:[#allocation12 + $0x60] sm:$0xff]  }
 0x186   :  { %4384 = vmatpush3.bf16.msra.mxu1 %v5001_v7  ;;  %2233 = vmatprep.subr.bf16.mxu0 %v5004_v11  ;;  %v5053_v11 = vld [vmem:[#allocation12 + $0x2a0] sm:$0xff]  }
 0x187   :  { %4385 = vmatprep.subr.bf16.mxu1 %v5005_v12  ;;  %2897 = vmatprep.mubr.bf16.mxu1 %v4206_v15  ;;  %v5054_v12 = vld [vmem:[#allocation12 + $0x20] sm:$0xff]   ;;  %v5057_v15 = vld [vmem:[#allocation12 + $0x298] sm:$0xff]  }
 0x189   :  { %2234 = vmatpush2.bf16.msra.mxu0 %v5002_v13  ;;  %v5055_v13 = vld [vmem:[#allocation12 + $0x2d8] sm:$0xff]  }
 0x18a   :  { %4386 = vmatpush3.bf16.msra.mxu1 %v5006_v14  ;;  %2235 = vmatprep.subr.bf16.mxu0 %v5009_v16  ;;  %v5056_v14 = vld [vmem:[#allocation12 + $0x58] sm:$0xff]  }
 0x18b   :  { %4387 = vmatprep.subr.bf16.mxu1 %v5010_v18  ;;  %v5058_v16 = vld [vmem:[#allocation12 + $0x18] sm:$0xff]   ;;  %v5059_v18 = vld [vmem:[#allocation12 + $0x2d0] sm:$0xff]  }
 0x18d   :  { %2236 = vmatpush2.bf16.msra.mxu0 %v5007_v19  ;;  %v5060_v19 = vld [vmem:[#allocation12 + $0x50] sm:$0xff]  }
 0x18e   :  { %4388 = vmatpush3.bf16.msra.mxu1 %v5011_v20  ;;  %2237 = vmatprep.subr.bf16.mxu0 %v5014_v21  ;;  %v5061_v20 = vld [vmem:[#allocation12 + $0x290] sm:$0xff]  }
 0x18f   :  { %4389 = vmatprep.subr.bf16.mxu1 %v5015_v22  ;;  %v5062_v21 = vld [vmem:[#allocation12 + $0x10] sm:$0xff]   ;;  %v2281_v22 = vsub.s32 0, %v5460_v44 }
 0x191   :  { %2238 = vmatpush2.bf16.msra.mxu0 %v5012_v23  ;;  %v5063_v23 = vld [vmem:[#allocation12 + $0x2c8] sm:$0xff]  }
 0x192   :  { %4390 = vmatpush3.bf16.msra.mxu1 %v5016_v24  ;;  %2239 = vmatprep.subr.bf16.mxu0 %v5019_v25  ;;  %v5064_v24 = vld [vmem:[#allocation12 + $0x48] sm:$0xff]  }
 0x193   :  { %4391 = vmatprep.subr.bf16.mxu1 %v5020_v26  ;;  %v5065_v25 = vld [vmem:[#allocation12 + $0x288] sm:$0xff]  }
 0x194   :  { %v5066_v26 = vld [vmem:[#allocation12 + $0x8] sm:$0xff]  }
 0x195   :  { %2240 = vmatpush2.bf16.msra.mxu0 %v5017_v27 }
 0x196   :  { %4392 = vmatpush3.bf16.msra.mxu1 %v5021_v28  ;;  %2241 = vmatprep.subr.bf16.mxu0 %v5024_v29  ;;  %v2282_v28 = vrot.slane %v5471_v55, %v2281_v22  ;;  %v5067_v29 = vld [vmem:[#allocation12 + $0x2c0] sm:$0xff]  }
 0x197   :  { %4393 = vmatprep.subr.bf16.mxu1 %v5025_v30  ;;  %v5068_v30 = vld [vmem:[#allocation12 + $0x40] sm:$0xff]  }
 0x198   :  { %v5123_v22 = vld [vmem:[#allocation12 + $0x100] sm:$0xff]  }
 0x199   :  { %2242 = vmatpush2.bf16.msra.mxu0 %v5022_v31  ;;  %v5069_v31 = vld [vmem:[#allocation12 + $0x280] sm:$0xff]  }
 0x19a   :  { %4394 = vmatpush3.bf16.msra.mxu1 %v5026_v32  ;;  %2243 = vmatprep.subr.bf16.mxu0 %v5029_v33  ;;  %v5070_v32 = vld [vmem:[#allocation12] sm:$0xff]  }
 0x19b   :  { %4395 = vmatprep.subr.bf16.mxu1 %v5030_v34  ;;  %v5073_v34 = vld [vmem:[#allocation12 + $0xf8] sm:$0xff]  }
 0x19d   :  { %2244 = vmatpush2.bf16.msra.mxu0 %v5027_v36  ;;  %v5091_v36 = vld [vmem:[#allocation12 + $0x178] sm:$0xff]  }
 0x19e   :  { %4396 = vmatpush3.bf16.msra.mxu1 %v5031_v37  ;;  %2245 = vmatprep.subr.bf16.mxu0 %v5034_v38  ;;  %v4207_v37 = vcombine.low %v5464_v46, %v5464_v46  ;;  %v5093_v38 = vld [vmem:[#allocation12 + $0x138] sm:$0xff]   ;;  %v5078_v46 = vld [vmem:[#allocation12 + $0xa8] sm:$0xff]  }
 0x19f   :  { %4397 = vmatprep.subr.bf16.mxu1 %v5035_v40 }
 0x1a1   :  { %2246 = vmatpush2.bf16.msra.mxu0 %v5032_v52  ;;  %v5075_v52 = vld [vmem:[#allocation12 + $0xf0] sm:$0xff]  }
 0x1a2   :  { %4398 = vmatpush3.bf16.msra.mxu1 %v5036_v42  ;;  %4405 = vmatprep.subr.bf16.mxu0 %v5039_v43  ;;  %v5095_v42 = vld [vmem:[#allocation12 + $0x170] sm:$0xff]  }
 0x1a3   :  { %4427 = vmatprep.subr.bf16.mxu1 %v5040_v9  ;;  %v5097_v43 = vld [vmem:[#allocation12 + $0x130] sm:$0xff]   ;;  %v5077_v9 = vld [vmem:[#allocation12 + $0xe8] sm:$0xff]  }
 0x1a4   :  { %v5469_v54 = vpop.f32.mrf.mxu0  ;;  %2248 = vmatmul.mubr.bf16.vlgmr.msra.gmra.mxu0 %v5431_v17 }
 0x1a5   :  { %2898 = vmatmul.mubr.bf16.vlgmr.msra.gmra.mxu1 %v4205_v45  ;;  %v5474_v56 = vpop.f32.mrf.mxu1  ;;  %4406 = vmatpush3.bf16.msra.mxu0 %v5041_v47  ;;  %v2004_v27 = vadd.f32 %v5469_v54, %v5447_v39  ;;  %v5074_v39 = vld [vmem:[#allocation12 + $0xb8] sm:$0xff]   ;;  %v5099_v45 = vld [vmem:[#allocation12 + $0x168] sm:$0xff]  }
 0x1a6   :  { %4428 = vmatpush3.bf16.msra.mxu1 %v5042_v48  ;;  %v2005_v61 = vpop.f32.mrf.mxu0  ;;  %4407 = vmatprep.subr.bf16.mxu0 %v5043_v51  ;;  %v5101_v47 = vld [vmem:[#allocation12 + $0x128] sm:$0xff]   ;;  %v5079_v48 = vld [vmem:[#allocation12 + $0xe0] sm:$0xff]   ;;  %v5107_v54 = vld [vmem:[#allocation12 + $0x158] sm:$0xff]  }
 0x1a7   :  { %4429 = vmatprep.subr.bf16.mxu1 %v5044_v53  ;;  %v5479_v0 = vpop.f32.mrf.mxu1  ;;  %v2006_v17 = vadd.f32 %v2005_v61, %v1965_v57  ;;  %2937 = vmatprep.mubr.bf16.mxu0 %v4208_v35  ;;  %v2309_v33 = vadd.f32 %v2282_v28, %v2004_v27  ;;  %v5080_v51 = vld [vmem:[#allocation12 + $0xa0] sm:$0xff]   ;;  %v5081_v35 = vld [vmem:[#allocation12 + $0xd8] sm:$0xff]   ;;  %v5084_v61 = vld [vmem:[#allocation12 + $0x90] sm:$0xff]  }
 0x1a8   :  { %v2007_v1 = vpop.f32.mrf.mxu0  ;;  %v5105_v53 = vld [vmem:[#allocation12 + $0x120] sm:$0xff]   ;;  %v5082_v57 = vld [vmem:[#allocation12 + $0x98] sm:$0xff]  }
 0x1a9   :  { %v2048_v2 = vpop.f32.mrf.mxu1  ;;  %v2310_v3 = vadd.f32 %v2286_v58, %v2006_v17  ;;  %4408 = vmatpush3.bf16.msra.mxu0 %v5045_v59  ;;  %v2315_v40 = vpack.c.bf16 %v2309_v33, %v2309_v33  ;;  %v5109_v58 = vld [vmem:[#allocation12 + $0x118] sm:$0xff]   ;;  %v5083_v59 = vld [vmem:[#allocation12 + $0xd0] sm:$0xff]   ;;  %v5086_v17 = vld [vmem:[#allocation12 + $0x88] sm:$0xff]  }
 0x1aa   :  { %4430 = vmatpush3.bf16.msra.mxu1 %v5046_v60  ;;  %v2008_v4 = vpop.f32.mrf.mxu0  ;;  %4409 = vmatprep.subr.bf16.mxu0 %v5047_v62  ;;  %v5111_v60 = vld [vmem:[#allocation12 + $0x150] sm:$0xff]   ;;  %v5087_v1 = vld [vmem:[#allocation12 + $0xc0] sm:$0xff]   ;;  %v5125_v27 = vld [vmem:[#allocation12 + $0x3f8] sm:$0xff]  }
 0x1ab   :  { %4431 = vmatprep.subr.bf16.mxu1 %v5048_v63  ;;  %v2049_v6 = vpop.f32.mrf.mxu1  ;;  %v2316_v7 = vpack.c.bf16 %v2310_v3, %v2310_v3  ;;  %v5113_v62 = vld [vmem:[#allocation12 + $0x110] sm:$0xff]   ;;  %v5085_v63 = vld [vmem:[#allocation12 + $0xc8] sm:$0xff]   ;;  %v5088_v2 = vld [vmem:[#allocation12 + $0x80] sm:$0xff]  }
 0x1ac   :  { %v5089_v3 = vld [vmem:[#allocation12 + $0x378] sm:$0xff]   ;;  %v5115_v6 = vld [vmem:[#allocation12 + $0x148] sm:$0xff]  }
 0x1ad   :  { %4410 = vmatpush3.bf16.msra.mxu0 %v5049_v41  ;;  %3265 = vmatprep.mubr.bf16.mxu1 %v2316_v7  ;;  %v2289_v41 = vsub.s32 2, %v5460_v44  ;;  %v5096_v33 = vld [vmem:[#allocation12 + $0x368] sm:$0xff]  }
 0x1ae   :  { %4432 = vmatpush3.bf16.msra.mxu1 %v5050_v49  ;;  %4411 = vmatprep.subr.bf16.mxu0 %v5051_v5  ;;  %v2293_v49 = vsub.s32 3, %v5460_v44 }
 0x1af   :  { %4433 = vmatprep.subr.bf16.mxu1 %v5052_v10  ;;  %v5117_v10 = vld [vmem:[#allocation12 + $0x108] sm:$0xff]  }
 0x1b1   :  { %4412 = vmatpush3.bf16.msra.mxu0 %v5053_v11 }
 0x1b2   :  { %4434 = vmatpush3.bf16.msra.mxu1 %v5054_v12  ;;  %4413 = vmatprep.subr.bf16.mxu0 %v5055_v13  ;;  %v2290_v12 = vrot.slane %v5471_v55, %v2289_v41 }
 0x1b3   :  { %4435 = vmatprep.subr.bf16.mxu1 %v5056_v14 }
 0x1b5   :  { %4414 = vmatpush3.bf16.msra.mxu0 %v5057_v15 }
 0x1b6   :  { %4436 = vmatpush3.bf16.msra.mxu1 %v5058_v16  ;;  %4415 = vmatprep.subr.bf16.mxu0 %v5059_v18  ;;  %v2294_v16 = vrot.slane %v5471_v55, %v2293_v49 }
 0x1b7   :  { %4437 = vmatprep.subr.bf16.mxu1 %v5060_v19 }
 0x1b9   :  { %4416 = vmatpush3.bf16.msra.mxu0 %v5061_v20  ;;  %v5119_v20 = vld [vmem:[#allocation12 + $0x140] sm:$0xff]  }
 0x1ba   :  { %4438 = vmatpush3.bf16.msra.mxu1 %v5062_v21  ;;  %4417 = vmatprep.subr.bf16.mxu0 %v5063_v23 }
 0x1bb   :  { %4439 = vmatprep.subr.bf16.mxu1 %v5064_v24 }
 0x1bd   :  { %4418 = vmatpush3.bf16.msra.mxu0 %v5065_v25  ;;  %v3353_v25 = vld [vmem:[#allocation8] sm:$0xff] }
 0x1be   :  { %4440 = vmatpush3.bf16.msra.mxu1 %v5066_v26  ;;  %4419 = vmatprep.subr.bf16.mxu0 %v5067_v29  ;;  %v5090_v29 = vld [vmem:[#allocation12 + $0x338] sm:$0xff]  }
 0x1bf   :  { %4441 = vmatprep.subr.bf16.mxu1 %v5068_v30 }
 0x1c1   :  { %4420 = vmatpush3.bf16.msra.mxu0 %v5069_v31  ;;  %v5092_v31 = vld [vmem:[#allocation12 + $0x370] sm:$0xff]  }
 0x1c2   :  { %4442 = vmatpush3.bf16.msra.mxu1 %v5070_v32  ;;  %4449 = vmatprep.subr.bf16.mxu0 %v5073_v34  ;;  %v5094_v32 = vld [vmem:[#allocation12 + $0x330] sm:$0xff]   ;;  %v5098_v34 = vld [vmem:[#allocation12 + $0x328] sm:$0xff]  }
 0x1c3   :  { %4471 = vmatprep.subr.bf16.mxu1 %v5091_v36  ;;  %v5100_v36 = vld [vmem:[#allocation12 + $0x360] sm:$0xff]  }
 0x1c4   :  { %2938 = vmatmul.mubr.bf16.vlgmr.msra.gmra.mxu0 %v4207_v37  ;;  %v5102_v37 = vld [vmem:[#allocation12 + $0x320] sm:$0xff]  }
 0x1c5   :  { %3266 = vmatmul.mubr.bf16.vlgmr.msra.gmra.mxu1 %v2315_v40  ;;  %4450 = vmatpush3.bf16.msra.mxu0 %v5074_v39  ;;  %v5104_v39 = vld [vmem:[#allocation12 + $0x358] sm:$0xff]   ;;  %v5108_v40 = vld [vmem:[#allocation12 + $0x350] sm:$0xff]  }
 0x1c6   :  { %4472 = vmatpush3.bf16.msra.mxu1 %v5093_v38  ;;  %4451 = vmatprep.subr.bf16.mxu0 %v5075_v52  ;;  %v5106_v38 = vld [vmem:[#allocation12 + $0x318] sm:$0xff]   ;;  %v5110_v52 = vld [vmem:[#allocation12 + $0x310] sm:$0xff]  }
 0x1c7   :  { %4473 = vmatprep.subr.bf16.mxu1 %v5095_v42  ;;  %v5112_v42 = vld [vmem:[#allocation12 + $0x348] sm:$0xff]  }
 0x1c9   :  { %4452 = vmatpush3.bf16.msra.mxu0 %v5076_v8  ;;  %v5114_v8 = vld [vmem:[#allocation12 + $0x308] sm:$0xff]  }
 0x1ca   :  { %4474 = vmatpush3.bf16.msra.mxu1 %v5097_v43  ;;  %4453 = vmatprep.subr.bf16.mxu0 %v5077_v9  ;;  %v5116_v43 = vld [vmem:[#allocation12 + $0x340] sm:$0xff]  }
 0x1cb   :  { %4475 = vmatprep.subr.bf16.mxu1 %v5099_v45  ;;  %v5118_v9 = vld [vmem:[#allocation12 + $0x300] sm:$0xff]   ;;  %v5122_v45 = vld [vmem:[#allocation12 + $0x478] sm:$0xff]  }
 0x1cd   :  { %4454 = vmatpush3.bf16.msra.mxu0 %v5078_v46  ;;  %v3355_v46 = vld [vmem:[#allocation8 + $0x10] sm:$0xff] }
 0x1ce   :  { %4476 = vmatpush3.bf16.msra.mxu1 %v5101_v47  ;;  %4455 = vmatprep.subr.bf16.mxu0 %v5079_v48  ;;  %v4305_v47 = vcombine.low %v3353_v25, %v3353_v25  ;;  %v5124_v48 = vld [vmem:[#allocation12 + $0x438] sm:$0xff]  }
 0x1cf   :  { %4477 = vmatprep.subr.bf16.mxu1 %v5103_v50  ;;  %v4310_v50 = vcombine.high %v3355_v46, %v3355_v46 }
 0x1d1   :  { %4456 = vmatpush3.bf16.msra.mxu0 %v5080_v51  ;;  %v5126_v51 = vld [vmem:[#allocation12 + $0x470] sm:$0xff]  }
 0x1d2   :  { %4478 = vmatpush3.bf16.msra.mxu1 %v5105_v53  ;;  %4457 = vmatprep.subr.bf16.mxu0 %v5081_v35  ;;  %v5128_v53 = vld [vmem:[#allocation12 + $0x430] sm:$0xff]   ;;  %v5130_v35 = vld [vmem:[#allocation12 + $0x468] sm:$0xff]  }
 0x1d3   :  { %4479 = vmatprep.subr.bf16.mxu1 %v5107_v54  ;;  %v5132_v54 = vld [vmem:[#allocation12 + $0x428] sm:$0xff]  }
 0x1d5   :  { %4458 = vmatpush3.bf16.msra.mxu0 %v5082_v57  ;;  %v5134_v57 = vld [vmem:[#allocation12 + $0x460] sm:$0xff]  }
 0x1d6   :  { %4480 = vmatpush3.bf16.msra.mxu1 %v5109_v58  ;;  %4459 = vmatprep.subr.bf16.mxu0 %v5083_v59  ;;  %v5136_v58 = vld [vmem:[#allocation12 + $0x420] sm:$0xff]   ;;  %v5138_v59 = vld [vmem:[#allocation12 + $0x458] sm:$0xff]  }
 0x1d7   :  { %4481 = vmatprep.subr.bf16.mxu1 %v5111_v60  ;;  %v5140_v60 = vld [vmem:[#allocation12 + $0x418] sm:$0xff]  }
 0x1d9   :  { %4460 = vmatpush3.bf16.msra.mxu0 %v5084_v61  ;;  %v5142_v61 = vld [vmem:[#allocation12 + $0x450] sm:$0xff]  }
 0x1da   :  { %4482 = vmatpush3.bf16.msra.mxu1 %v5113_v62  ;;  %4461 = vmatprep.subr.bf16.mxu0 %v5085_v63  ;;  %v5144_v62 = vld [vmem:[#allocation12 + $0x410] sm:$0xff]   ;;  %v5146_v63 = vld [vmem:[#allocation12 + $0x448] sm:$0xff]  }
 0x1db   :  { %4483 = vmatprep.subr.bf16.mxu1 %v5115_v6 }
 0x1dd   :  { %4462 = vmatpush3.bf16.msra.mxu0 %v5086_v17 }
 0x1de   :  { %4463 = vmatprep.subr.bf16.mxu0 %v5087_v1  ;;  %4484 = vmatpush3.bf16.msra.mxu1 %v5117_v10 }
 0x1df   :  { %4485 = vmatprep.subr.bf16.mxu1 %v5119_v20  ;;  %v2301_v20 = vsub.s32 5, %v5460_v44 }
 0x1e1   :  { %4464 = vmatpush3.bf16.msra.mxu0 %v5088_v2 }
 0x1e2   :  { %4493 = vmatprep.subr.bf16.mxu0 %v5089_v3  ;;  %4486 = vmatpush3.bf16.msra.mxu1 %v5123_v22  ;;  %v5148_v3 = vld [vmem:[#allocation12 + $0x408] sm:$0xff]  }
 0x1e3   :  { %4515 = vmatprep.subr.bf16.mxu1 %v5125_v27 }
 0x1e4   :  { %v2085_v4 = vpop.f32.mrf.mxu0 }
 0x1e5   :  { %v2126_v5 = vpop.f32.mrf.mxu1  ;;  %v2086_v7 = vadd.f32 %v2085_v4, %v5474_v56  ;;  %v5150_v4 = vld [vmem:[#allocation12 + $0x440] sm:$0xff]  }
 0x1e6   :  { %v2087_v11 = vpop.f32.mrf.mxu0 }
 0x1e7   :  { %v2128_v13 = vpop.f32.mrf.mxu1  ;;  %v2088_v14 = vadd.f32 %v2087_v11, %v5479_v0  ;;  %v2127_v15 = vadd.f32 %v2126_v5, %v2086_v7  ;;  %v4306_v0 = vcombine.high %v3353_v25, %v3353_v25  ;;  %v5152_v7 = vld [vmem:[#allocation12 + $0x400] sm:$0xff]   ;;  %v2302_v25 = vrot.slane %v5471_v55, %v2301_v20 }
 0x1e8   :  { %v2089_v18 = vpop.f32.mrf.mxu0 }
 0x1e9   :  { %v2130_v19 = vpop.f32.mrf.mxu1  ;;  %v2129_v21 = vadd.f32 %v2128_v13, %v2088_v14  ;;  %v2311_v23 = vadd.f32 %v2290_v12, %v2127_v15  ;;  %v4309_v12 = vcombine.low %v3355_v46, %v3355_v46  ;;  %v5143_v46 = vld [vmem:[#allocation12 + $0x398] sm:$0xff]  }
 0x1ea   :  { %v2090_v24 = vpop.f32.mrf.mxu0  ;;  %v2297_v19 = vsub.s32 4, %v5460_v44 }
 0x1eb   :  { %v2131_v56 = vpop.f32.mrf.mxu1  ;;  %v2312_v26 = vadd.f32 %v2294_v16, %v2129_v21  ;;  %v2317_v30 = vpack.c.bf16 %v2311_v23, %v2311_v23 }
 0x1ec   :  { %v2298_v22 = vrot.slane %v5471_v55, %v2297_v19  ;;  %v5131_v55 = vld [vmem:[#allocation12 + $0x3b0] sm:$0xff]  }
 0x1ed   :  { %v2318_v28 = vpack.c.bf16 %v2312_v26, %v2312_v26 }
 0x1ef   :  { %3305 = vmatprep.mubr.bf16.mxu0 %v2318_v28 }
 0x1f0   :  { %3306 = vmatmul.mubr.bf16.vlgmr.msra.gmra.mxu0 %v2317_v30 }
 0x1f1   :  { %4494 = vmatpush3.bf16.msra.mxu0 %v5090_v29  ;;  %3793 = vmatprep.mubr.bf16.mxu0 %v4306_v0 }
 0x1f2   :  { %4495 = vmatprep.subr.bf16.mxu0 %v5092_v31 }
 0x1f5   :  { %4496 = vmatpush3.bf16.msra.mxu0 %v5094_v32  ;;  %v3354_v32 = vld [vmem:[#allocation8 + $0x8] sm:$0xff] }
 0x1f6   :  { %4497 = vmatprep.subr.bf16.mxu0 %v5096_v33 }
 0x1f9   :  { %4498 = vmatpush3.bf16.msra.mxu0 %v5098_v34 }
 0x1fa   :  { %4499 = vmatprep.subr.bf16.mxu0 %v5100_v36 }
 0x1fd   :  { %4500 = vmatpush3.bf16.msra.mxu0 %v5102_v37 }
 0x1fe   :  { %4501 = vmatprep.subr.bf16.mxu0 %v5104_v39  ;;  %v5127_v39 = vld [vmem:[#allocation12 + $0x3b8] sm:$0xff]  }
 0x201   :  { %4502 = vmatpush3.bf16.msra.mxu0 %v5106_v38  ;;  %v4308_v38 = vcombine.high %v3354_v32, %v3354_v32 }
 0x202   :  { %4503 = vmatprep.subr.bf16.mxu0 %v5108_v40 }
 0x205   :  { %4504 = vmatpush3.bf16.msra.mxu0 %v5110_v52  ;;  %v5129_v52 = vld [vmem:[#allocation12 + $0x3f0] sm:$0xff]  }
 0x206   :  { %4505 = vmatprep.subr.bf16.mxu0 %v5112_v42  ;;  %v5133_v42 = vld [vmem:[#allocation12 + $0x3e8] sm:$0xff]  }
 0x209   :  { %4506 = vmatpush3.bf16.msra.mxu0 %v5114_v8  ;;  %v5135_v8 = vld [vmem:[#allocation12 + $0x3a8] sm:$0xff]  }
 0x20a   :  { %4507 = vmatprep.subr.bf16.mxu0 %v5116_v43  ;;  %v5137_v43 = vld [vmem:[#allocation12 + $0x3e0] sm:$0xff]  }
 0x20d   :  { %4508 = vmatpush3.bf16.msra.mxu0 %v5118_v9  ;;  %v5139_v9 = vld [vmem:[#allocation12 + $0x3a0] sm:$0xff]  }
 0x20e   :  { %4537 = vmatprep.subr.bf16.mxu0 %v5122_v45  ;;  %v5141_v45 = vld [vmem:[#allocation12 + $0x3d8] sm:$0xff]  }
 0x210   :  { %3794 = vmatmul.mubr.bf16.vlgmr.msra.gmra.mxu0 %v4305_v47  ;;  %v5145_v47 = vld [vmem:[#allocation12 + $0x3d0] sm:$0xff]  }
 0x211   :  { %4538 = vmatpush3.bf16.msra.mxu0 %v5124_v48  ;;  %3873 = vmatprep.mubr.bf16.mxu0 %v4310_v50  ;;  %v5147_v48 = vld [vmem:[#allocation12 + $0x390] sm:$0xff]   ;;  %v5149_v50 = vld [vmem:[#allocation12 + $0x3c8] sm:$0xff]  }
 0x212   :  { %4539 = vmatprep.subr.bf16.mxu0 %v5126_v51  ;;  %v5151_v51 = vld [vmem:[#allocation12 + $0x388] sm:$0xff]  }
 0x215   :  { %4540 = vmatpush3.bf16.msra.mxu0 %v5128_v53 }
 0x216   :  { %4541 = vmatprep.subr.bf16.mxu0 %v5130_v35 }
 0x219   :  { %4542 = vmatpush3.bf16.msra.mxu0 %v5132_v54  ;;  %v5155_v54 = vld [vmem:[#allocation12 + $0x3c0] sm:$0xff]  }
 0x21a   :  { %4543 = vmatprep.subr.bf16.mxu0 %v5134_v57 }
 0x21d   :  { %4544 = vmatpush3.bf16.msra.mxu0 %v5136_v58 }
 0x21e   :  { %4545 = vmatprep.subr.bf16.mxu0 %v5138_v59 }
 0x221   :  { %4546 = vmatpush3.bf16.msra.mxu0 %v5140_v60 }
 0x222   :  { %4547 = vmatprep.subr.bf16.mxu0 %v5142_v61  ;;  %v5156_v61 = vld [vmem:[#allocation12 + $0x380] sm:$0xff]  }
 0x224   :  { %v2167_v17 = vpop.f32.mrf.mxu0 }
 0x225   :  { %v2208_v1 = vpop.f32.mrf.mxu1  ;;  %4548 = vmatpush3.bf16.msra.mxu0 %v5144_v62 }
 0x226   :  { %v2209_v2 = vadd.f32 %v2208_v1, %v2167_v17  ;;  %v2169_v41 = vpop.f32.mrf.mxu0  ;;  %4549 = vmatprep.subr.bf16.mxu0 %v5146_v63 }
 0x227   :  { %v2210_v49 = vpop.f32.mrf.mxu1 }
 0x228   :  { %v2171_v5 = vpop.f32.mrf.mxu0  ;;  %v2211_v24 = vadd.f32 %v2210_v49, %v2169_v41 }
 0x229   :  { %v2212_v6 = vpop.f32.mrf.mxu1  ;;  %4550 = vmatpush3.bf16.msra.mxu0 %v5148_v3 }
 0x22a   :  { %v2172_v10 = vpop.f32.mrf.mxu0  ;;  %4551 = vmatprep.subr.bf16.mxu0 %v5150_v4 }
 0x22b   :  { %v2213_v11 = vpop.f32.mrf.mxu1 }
 0x22d   :  { %4552 = vmatpush3.bf16.msra.mxu0 %v5152_v7 }
 0x230   :  { %3874 = vmatmul.mubr.bf16.vlgmr.msra.gmra.mxu0 %v4309_v12 }
 0x245   :  { %v4377_v13 = vpop.f32.mrf.mxu1 }
 0x247   :  { %v4378_v14 = vpop.f32.mrf.mxu1 }
 0x248   :  { %v4379_v15 = vadd.f32 %v4378_v14, %v4377_v13 }
 0x249   :  { %v4380_v16 = vpop.f32.mrf.mxu1 }
 0x24b   :  { %v4381_v18 = vpop.f32.mrf.mxu1 }
 0x264   :  { %v2249_v21 = vpop.f32.mrf.mxu0 }
 0x265   :  { %v4399_v23 = vpop.f32.mrf.mxu1  ;;  %v2250_v56 = vadd.f32 %v2249_v21, %v2209_v2  ;;  %v4307_v2 = vcombine.low %v3354_v32, %v3354_v32 }
 0x266   :  { %v2251_v26 = vpop.f32.mrf.mxu0 }
 0x267   :  { %v4400_v27 = vpop.f32.mrf.mxu1  ;;  %v2252_v28 = vadd.f32 %v2251_v26, %v2211_v24  ;;  %v2313_v0 = vadd.f32 %v2298_v22, %v2250_v56 }
 0x268   :  { %v4401_v29 = vadd.f32 %v4400_v27, %v4399_v23  ;;  %v2253_v30 = vpop.f32.mrf.mxu0 }
 0x269   :  { %v4402_v31 = vpop.f32.mrf.mxu1  ;;  %v2314_v33 = vadd.f32 %v2302_v25, %v2252_v28  ;;  %v2319_v40 = vpack.c.bf16 %v2313_v0, %v2313_v0 }
 0x26a   :  { %v2900_v34 = vadd.f32 %v4401_v29, %v4379_v15  ;;  %v2254_v36 = vpop.f32.mrf.mxu0 }
 0x26b   :  { %v4403_v44 = vpop.f32.mrf.mxu1  ;;  %v2320_v37 = vpack.c.bf16 %v2314_v33, %v2314_v33  ;;  %v4359_v33 = vld [vmem:[#allocation14] ss:$0 sm:$0xff] }
 0x26c   :  { %v4360_v44 = vld [vmem:[#allocation15] ss:$0 sm:$0xff] }
 0x26d   :  { %3345 = vmatprep.mubr.bf16.mxu1 %v2320_v37 }
 0x26e   :  { %3346 = vmatmul.mubr.bf16.vlgmr.msra.gmra.mxu1 %v2319_v40 }
 0x26f   :  { %4516 = vmatpush3.bf16.msra.mxu1 %v5127_v39  ;;  %3833 = vmatprep.mubr.bf16.mxu1 %v4308_v38  ;;  %v3902_v38 = vstv %s5511_s8 }
 0x270   :  { %4517 = vmatprep.subr.bf16.mxu1 %v5129_v52 }
 0x273   :  { %4518 = vmatpush3.bf16.msra.mxu1 %v5131_v55 }
 0x274   :  { %4519 = vmatprep.subr.bf16.mxu1 %v5133_v42 }
 0x277   :  { %4520 = vmatpush3.bf16.msra.mxu1 %v5135_v8 }
 0x278   :  { %4521 = vmatprep.subr.bf16.mxu1 %v5137_v43 }
 0x27b   :  { %4522 = vmatpush3.bf16.msra.mxu1 %v5139_v9 }
 0x27c   :  { %4523 = vmatprep.subr.bf16.mxu1 %v5141_v45 }
 0x27f   :  { %4524 = vmatpush3.bf16.msra.mxu1 %v5143_v46 }
 0x280   :  { %4525 = vmatprep.subr.bf16.mxu1 %v5145_v47 }
 0x283   :  { %4526 = vmatpush3.bf16.msra.mxu1 %v5147_v48 }
 0x284   :  { %v4421_v53 = vpop.f32.mrf.mxu0  ;;  %4527 = vmatprep.subr.bf16.mxu1 %v5149_v50 }
 0x285   :  { %v4443_v35 = vpop.f32.mrf.mxu1 }
 0x286   :  { %v4422_v57 = vpop.f32.mrf.mxu0 }
 0x287   :  { %v4444_v58 = vpop.f32.mrf.mxu1  ;;  %v4423_v59 = vadd.f32 %v4422_v57, %v4421_v53  ;;  %4528 = vmatpush3.bf16.msra.mxu1 %v5151_v51 }
 0x288   :  { %v4445_v60 = vadd.f32 %v4444_v58, %v4443_v35  ;;  %4529 = vmatprep.subr.bf16.mxu1 %v5155_v54  ;;  %v4424_v63 = vpop.f32.mrf.mxu0 }
 0x289   :  { %v4446_v62 = vpop.f32.mrf.mxu1  ;;  %v2940_v17 = vadd.f32 %v4423_v59, %v2900_v34 }
 0x28a   :  { %v4425_v3 = vpop.f32.mrf.mxu0 }
 0x28b   :  { %v4447_v1 = vpop.f32.mrf.mxu1  ;;  %v3268_v41 = vadd.f32 %v4445_v60, %v2940_v17  ;;  %4530 = vmatpush3.bf16.msra.mxu1 %v5156_v61 }
 0x28e   :  { %3834 = vmatmul.mubr.bf16.vlgmr.msra.gmra.mxu1 %v4307_v2 }
 0x2b0   :  { %v4465_v49 = vpop.f32.mrf.mxu0 }
 0x2b2   :  { %v4466_v4 = vpop.f32.mrf.mxu0 }
 0x2b3   :  { %v4467_v5 = vadd.f32 %v4466_v4, %v4465_v49 }
 0x2b4   :  { %v4468_v6 = vpop.f32.mrf.mxu0 }
 0x2b5   :  { %v3308_v7 = vadd.f32 %v4467_v5, %v3268_v41 }
 0x2b6   :  { %v4469_v10 = vpop.f32.mrf.mxu0 }
 0x2d0   :  { %v4509_v11 = vpop.f32.mrf.mxu0 }
 0x2d2   :  { %v4510_v12 = vpop.f32.mrf.mxu0 }
 0x2d3   :  { %v4511_v13 = vadd.f32 %v4510_v12, %v4509_v11 }
 0x2d4   :  { %v4512_v14 = vpop.f32.mrf.mxu0 }
 0x2d6   :  { %v4513_v15 = vpop.f32.mrf.mxu0 }
 0x2f0   :  { %v4553_v16 = vpop.f32.mrf.mxu0 }
 0x2f2   :  { %v4554_v18 = vpop.f32.mrf.mxu0 }
 0x2f3   :  { %v4555_v19 = vadd.f32 %v4554_v18, %v4553_v16 }
 0x2f4   :  { %v4556_v20 = vpop.f32.mrf.mxu0 }
 0x2f6   :  { %v4557_v21 = vpop.f32.mrf.mxu0 }
 0x32e   :  { %v4487_v22 = vpop.f32.mrf.mxu1 }
 0x330   :  { %v4488_v23 = vpop.f32.mrf.mxu1 }
 0x331   :  { %v4489_v27 = vadd.f32 %v4488_v23, %v4487_v22 }
 0x332   :  { %v4490_v24 = vpop.f32.mrf.mxu1 }
 0x333   :  { %v3348_v31 = vadd.f32 %v4489_v27, %v3308_v7 }
 0x334   :  { %v4491_v56 = vpop.f32.mrf.mxu1 }
 0x34e   :  { %v4531_v25 = vpop.f32.mrf.mxu1 }
 0x350   :  { %v4532_v26 = vpop.f32.mrf.mxu1 }
 0x351   :  { %v4533_v28 = vadd.f32 %v4532_v26, %v4531_v25 }
 0x352   :  { %v4534_v29 = vpop.f32.mrf.mxu1 }
 0x353   :  { %v3836_v0 = vadd.f32 %v4533_v28, %v4511_v13 }
 0x354   :  { %v4535_v30 = vpop.f32.mrf.mxu1 }
 0x355   :  { %v3876_v32 = vadd.f32 %v4555_v19, %v3836_v0 }
 0x357   :  { %v3881_v34 = vadd.f32 %v3876_v32, %v3348_v31 }
 0x359   :  { %v3889_v36 = vadd.f32 %v4359_v33, %v3881_v34 }
 0x35b   :  { %v3890_v37 = vmax.f32 %v3889_v36, 0.0 }
 0x35d   :  { %v3898_v39 = vmul.f32 %v4360_v44, %v3890_v37 }
 0x35f   :  { %3899 = vadd.xlane.f32.xlu0 %v3898_v39 }
 0x3e8   :  { %v3900_v40 = vpop.xlane.xlu0 %3899 }
 0x3e9   :  { %v3903_v52 = vadd.f32 %v3902_v38, %v3900_v40 }
 0x3eb   :  { %3905 = vst.msk [vmem:[%s5512_s9] sm:$0xff] %vm3904_vm0, %v3903_v52 }
 0x3ec   :  { %3910 = vsyncpa [#allocation5], 1 }
 0x3ed   :  { %3911 = vsyncpa [#allocation7], 1 }
 0x3ee   :  { %3912 = vsyncpa [#allocation10], 1 }
 0x3ef   :  { %3913 = vsyncpa [#allocation13], 1 }
 0x3f0   :  { %3914 = vsyncpa [#allocation16], 1 }

</bundles_post_ra>
